<compile_context>
chip_gen: v6e
topology: v6e:2x2x1
jax: 0.10.0
libtpu: 0.0.40
codegen_flags: <defaults>
</compile_context>

<pallas_src>
import functools

import jax
import jax.numpy as jnp
from jax.experimental import pallas as pl
from jax.experimental.pallas import tpu as pltpu

LEAKY_SLOPE = 0.01          # nn.LeakyReLU default
BN_EPS = 1e-5               # nn.BatchNorm2d default
LANE = 128                  # TPU lane width
MAX_TILE_R = 512            # row tile: big enough to amortize per-step overhead on
                            # v5e/v6e, small enough for v7x's 64 MiB VMEM at C=256
VMEM_LIMIT = 32 * 1024 * 1024


def _round_up(x, m):
    return (x + m - 1) // m * m


# ---------------------------------------------------------------------------
# Fused per-layer kernel.  Grid = (2, n_rt):
#   pass 0, tile r : y = patches @ w (MXU, f32 acc) -> VMEM scratch; accumulate
#                    per-channel sum / sumsq.
#   pass 1, tile 0 : finalize folded BN scale/shift once (pl.when).
#   pass 1, tile r : out = y * scale + shift, activation, store (bf16/f32).
# ---------------------------------------------------------------------------
def _fused_layer_kernel(p_ref, w_ref, g_ref, b_ref, o_ref,
                        y_acc, sum_ref, ssq_ref, scale_ref, shift_ref,
                        *, inv_n, act):
    pas = pl.program_id(0)
    rt = pl.program_id(1)

    @pl.when(jnp.logical_and(pas == 0, rt == 0))
    def _init():
        sum_ref[...] = jnp.zeros_like(sum_ref)
        ssq_ref[...] = jnp.zeros_like(ssq_ref)

    @pl.when(pas == 0)
    def _matmul_stats():
        y = jnp.dot(p_ref[...], w_ref[...], preferred_element_type=jnp.float32)
        y_acc[rt] = y
        sum_ref[...] += jnp.sum(y, axis=0, keepdims=True)
        ssq_ref[...] += jnp.sum(y * y, axis=0, keepdims=True)

    @pl.when(jnp.logical_and(pas == 1, rt == 0))
    def _finalize_stats():
        mean = sum_ref[...] * inv_n
        var = jnp.maximum(ssq_ref[...] * inv_n - mean * mean, 0.0)
        scale = g_ref[...] * jax.lax.rsqrt(var + BN_EPS)
        scale_ref[...] = scale
        shift_ref[...] = b_ref[...] - mean * scale

    @pl.when(pas == 1)
    def _apply():
        y = y_acc[rt]
        out = y * scale_ref[...] + shift_ref[...]
        if act == "leaky":
            out = jnp.maximum(out, LEAKY_SLOPE * out)
        else:  # plain ReLU for the last block
            out = jnp.maximum(out, 0.0)
        o_ref[...] = out.astype(o_ref.dtype)


# ---------------------------------------------------------------------------
# Host-side glue
# ---------------------------------------------------------------------------
def _im2col(x_nhwc, stride):
    """3x3, padding=1 im2col. Returns [B*Ho*Wo, 9*C] patches (dtype of x)."""
    xp = jnp.pad(x_nhwc, ((0, 0), (1, 1), (1, 1), (0, 0)))
    B, Hp, Wp, C = xp.shape
    Ho = (Hp - 3) // stride + 1
    Wo = (Wp - 3) // stride + 1
    cols = []
    for dy in range(3):
        for dx in range(3):
            patch = jax.lax.slice(
                xp,
                (0, dy, dx, 0),
                (B, dy + (Ho - 1) * stride + 1, dx + (Wo - 1) * stride + 1, C),
                (1, stride, stride, 1),
            )
            cols.append(patch)
    patches = jnp.stack(cols, axis=3)  # [B, Ho, Wo, 9, C]  (dy*3+dx order)
    return patches.reshape(B * Ho * Wo, 9 * C), Ho, Wo


def conv_bn_act(x_nhwc, w, gamma, beta, stride, act, out_dtype):
    """Conv2d(3x3, pad=1, stride, bias dropped) + BatchNorm2d(train) + activation.

    x_nhwc: [B, H, W, Cin] bf16 (true channel count, no lane padding).
    Returns [B, Ho, Wo, Cout] in `out_dtype`.
    """
    B = x_nhwc.shape[0]
    Cout = w.shape[-1]
    Cp = _round_up(Cout, LANE)         # lane-pad only the output channel dim

    patches, Ho, Wo = _im2col(x_nhwc, stride)
    R, K = patches.shape               # K = 9*Cin (unpadded contraction dim)

    # Row tiling: pad R up to an aligned tile count; padded rows are all-zero
    # (no bias), so they contribute nothing to sum/sumsq (inv_n uses true R).
    if R <= MAX_TILE_R:
        tile_r = _round_up(R, 16)
        r_pad = tile_r
    else:
        tile_r = MAX_TILE_R
        r_pad = _round_up(R, tile_r)
    if r_pad != R:
        patches = jnp.pad(patches, ((0, r_pad - R), (0, 0)))
    n_rt = r_pad // tile_r

    w2 = w.reshape(K, Cout).astype(jnp.bfloat16)   # [3,3,Cin,Cout] -> [9*Cin, Cout]
    if Cp != Cout:
        w2 = jnp.pad(w2, ((0, 0), (0, Cp - Cout)))
        gamma = jnp.pad(gamma, ((0, Cp - Cout),))
        beta = jnp.pad(beta, ((0, Cp - Cout),))

    kernel = functools.partial(_fused_layer_kernel, inv_n=1.0 / float(R), act=act)

    out = pl.pallas_call(
        kernel,
        out_shape=jax.ShapeDtypeStruct((r_pad, Cp), out_dtype),
        grid=(2, n_rt),
        in_specs=[
            # pass 0: walk row tiles; pass 1: stay on the last-fetched tile (no DMA)
            pl.BlockSpec((tile_r, K),
                         lambda p, r: ((1 - p) * r + p * (n_rt - 1), 0)),
            pl.BlockSpec((K, Cp), lambda p, r: (0, 0)),    # weights resident
            pl.BlockSpec((1, Cp), lambda p, r: (0, 0)),    # gamma resident
            pl.BlockSpec((1, Cp), lambda p, r: (0, 0)),    # beta resident
        ],
        # pass 0: park on block 0 (never written -> never flushed);
        # pass 1: write each row tile exactly once.
        out_specs=pl.BlockSpec((tile_r, Cp), lambda p, r: (p * r, 0)),
        scratch_shapes=[
            pltpu.VMEM((n_rt, tile_r, Cp), jnp.float32),   # layer-resident y
            pltpu.VMEM((1, Cp), jnp.float32),              # sum
            pltpu.VMEM((1, Cp), jnp.float32),              # sumsq
            pltpu.VMEM((1, Cp), jnp.float32),              # folded scale
            pltpu.VMEM((1, Cp), jnp.float32),              # folded shift
        ],
        compiler_params=pltpu.CompilerParams(
            dimension_semantics=("arbitrary", "arbitrary"),  # scratch carried across
            vmem_limit_bytes=VMEM_LIMIT,
        ),
        cost_estimate=pl.CostEstimate(
            flops=2 * r_pad * K * Cp + 4 * r_pad * Cp,
            transcendentals=Cp,
            bytes_accessed=(r_pad * K * 2 + K * Cp * 2
                            + r_pad * Cp * jnp.dtype(out_dtype).itemsize),
        ),
    )(patches, w2, gamma.reshape(1, Cp), beta.reshape(1, Cp))

    out = out[:R, :Cout]               # drop padded rows / padded lanes
    return out.reshape(B, Ho, Wo, Cout)


STRIDES = (1, 2, 1, 2, 1, 2)
ACTS = ("leaky", "leaky", "leaky", "leaky", "leaky", "relu")


def reducedim2_forward(feature, params):
    """feature: [B, C, N] (N == 441, or 431 which gets padded to 441)."""
    B, C, N = feature.shape
    if N == 431:
        # TODO(synk): PyTorch concatenates an *uninitialized* torch.empty tensor here;
        # zeros are used instead (torch.zeros_like does not modify `zero` in-place).
        feature = jnp.concatenate(
            [feature, jnp.zeros((B, C, 10), feature.dtype)], axis=2
        )
    y = feature.reshape(B, C, 21, 21)                    # NCHW
    x = jnp.transpose(y, (0, 2, 3, 1)).astype(jnp.bfloat16)  # NHWC, bf16 MXU operands

    n_layers = len(params)
    for li, ((w, _b, g, bt), s, a) in enumerate(zip(params, STRIDES, ACTS)):
        # conv bias `_b` is dropped: training-mode BN subtracts the per-channel
        # batch mean right after the conv, so a per-channel constant cancels exactly.
        out_dtype = jnp.float32 if li == n_layers - 1 else jnp.bfloat16
        x = conv_bn_act(x, w, g, bt, s, a, out_dtype)

    y = jnp.transpose(x, (0, 3, 1, 2))                   # back to NCHW: [B, C, 3, 3]
    return y.reshape(B, -1)                              # [B, C*9]


# ---------------------------------------------------------------------------
# Plain-JAX f32 reference (faithful to PyTorch: conv bias included, 2-pass BN)
# ---------------------------------------------------------------------------
def _ref_block(x_nhwc, w, b, gamma, beta, stride, act):
    y = jax.lax.conv_general_dilated(
        x_nhwc, w, (stride, stride), ((1, 1), (1, 1)),
        dimension_numbers=("NHWC", "HWIO", "NHWC"),
    ) + b[None, None, None, :]
    mean = jnp.mean(y, axis=(0, 1, 2), keepdims=True)
    var = jnp.mean((y - mean) ** 2, axis=(0, 1, 2), keepdims=True)
    yn = (y - mean) * jax.lax.rsqrt(var + BN_EPS)
    yn = yn * gamma[None, None, None, :] + beta[None, None, None, :]
    if act == "leaky":
        return jnp.where(yn >= 0.0, yn, LEAKY_SLOPE * yn)
    return jnp.maximum(yn, 0.0)


def reducedim2_reference(feature, params):
    B, C, N = feature.shape
    y = feature.reshape(B, C, 21, 21)
    x = jnp.transpose(y, (0, 2, 3, 1))
    for (w, b, g, bt), s, a in zip(params, STRIDES, ACTS):
        x = _ref_block(x, w, b, g, bt, s, a)
    return jnp.transpose(x, (0, 3, 1, 2)).reshape(B, -1)


# ---------------------------------------------------------------------------
def make_params(key, channel):
    params = []
    for _ in range(6):
        key, kw, kb, kg, kbt = jax.random.split(key, 5)
        w = jax.random.normal(kw, (3, 3, channel, channel), jnp.float32) * 0.05
        b = jax.random.normal(kb, (channel,), jnp.float32) * 0.05
        gamma = 1.0 + 0.1 * jax.random.normal(kg, (channel,), jnp.float32)
        beta = 0.1 * jax.random.normal(kbt, (channel,), jnp.float32)
        params.append((w, b, gamma, beta))
    return params


if __name__ == "__main__":
    B, C, N = 2, 32, 441  # small-channel stand-in for channel=256; N = 21*21
    key = jax.random.PRNGKey(0)
    key, kx = jax.random.split(key)
    feature = jax.random.normal(kx, (B, C, N), jnp.float32)
    params = make_params(key, C)

    fwd = jax.jit(reducedim2_forward)
    out = jax.block_until_ready(fwd(feature, params))
    ref = jax.block_until_ready(reducedim2_reference(feature, params))

    assert out.shape == (B, C * 9), out.shape
    assert bool(jnp.all(jnp.isfinite(out)))
    max_err = float(jnp.max(jnp.abs(out - ref)))
    # bf16 MXU operands / bf16 inter-layer activations through 6 normalized layers
    # -> ~1e-2 abs error vs f32 ref
    assert jnp.allclose(out, ref, rtol=5e-2, atol=5e-2), f"max abs err {max_err}"
    print("KERNEL_OK")
</pallas_src>

<mosaic_0001>
module attributes {stable_mosaic.version = 11 : i64} {
  func.func @_fused_layer_kernel(%arg0: i32, %arg1: i32, %arg2: memref<512x288xbf16, #tpu.memory_space<vmem>>, %arg3: memref<288x128xbf16, #tpu.memory_space<vmem>>, %arg4: memref<1x128xf32, #tpu.memory_space<vmem>>, %arg5: memref<1x128xf32, #tpu.memory_space<vmem>>, %arg6: memref<512x128xbf16, #tpu.memory_space<vmem>>, %arg7: memref<2x512x128xf32, #tpu.memory_space<vmem>>, %arg8: memref<1x128xf32, #tpu.memory_space<vmem>>, %arg9: memref<1x128xf32, #tpu.memory_space<vmem>>, %arg10: memref<1x128xf32, #tpu.memory_space<vmem>>, %arg11: memref<1x128xf32, #tpu.memory_space<vmem>>) attributes {dimension_semantics = [#tpu.dimension_semantics<arbitrary>, #tpu.dimension_semantics<arbitrary>], iteration_bounds = array<i64: 2, 2>, scalar_prefetch = 0 : i64, scratch_operands = 5 : i64, tpu.core_type = #tpu.core_type<tc>, window_params = [{transform_indices = @transform_0, window_bounds = array<i64: 512, 288>}, {pipeline_mode = #tpu.pipeline_mode<synchronous>, transform_indices = @transform_1, window_bounds = array<i64: 288, 128>}, {pipeline_mode = #tpu.pipeline_mode<synchronous>, transform_indices = @transform_2, window_bounds = array<i64: 1, 128>}, {pipeline_mode = #tpu.pipeline_mode<synchronous>, transform_indices = @transform_3, window_bounds = array<i64: 1, 128>}, {transform_indices = @transform_4, window_bounds = array<i64: 512, 128>}]} {
    %c0_i32 = arith.constant 0 : i32
    %0 = arith.cmpi eq, %arg0, %c0_i32 : i32
    %c0_i32_0 = arith.constant 0 : i32
    %1 = arith.cmpi eq, %arg1, %c0_i32_0 : i32
    %2 = arith.andi %0, %1 : i1
    %3 = arith.extui %2 : i1 to i32
    %c0_i32_1 = arith.constant 0 : i32
    %4 = arith.cmpi ne, %3, %c0_i32_1 : i32
    scf.if %4 {
      %cst = arith.constant 0.000000e+00 : f32
      %16 = vector.broadcast %cst : f32 to vector<1x128xf32>
      %c0 = arith.constant 0 : index
      %c0_8 = arith.constant 0 : index
      %17 = vector.load %arg8[%c0, %c0_8] : memref<1x128xf32, #tpu.memory_space<vmem>>, vector<1x128xf32>
      tpu.vector_store %arg8[%c0, %c0_8], %16 {strides = array<i32>} : memref<1x128xf32, #tpu.memory_space<vmem>>, vector<1x128xf32>,
      %cst_9 = arith.constant 0.000000e+00 : f32
      %18 = vector.broadcast %cst_9 : f32 to vector<1x128xf32>
      %c0_10 = arith.constant 0 : index
      %c0_11 = arith.constant 0 : index
      %19 = vector.load %arg9[%c0_10, %c0_11] : memref<1x128xf32, #tpu.memory_space<vmem>>, vector<1x128xf32>
      tpu.vector_store %arg9[%c0_10, %c0_11], %18 {strides = array<i32>} : memref<1x128xf32, #tpu.memory_space<vmem>>, vector<1x128xf32>,
    } else {
    }
    %c0_i32_2 = arith.constant 0 : i32
    %5 = arith.cmpi eq, %arg0, %c0_i32_2 : i32
    %6 = arith.extui %5 : i1 to i32
    %c0_i32_3 = arith.constant 0 : i32
    %7 = arith.cmpi ne, %6, %c0_i32_3 : i32
    scf.if %7 {
      %c0 = arith.constant 0 : index
      %c0_8 = arith.constant 0 : index
      %16 = vector.load %arg2[%c0, %c0_8] : memref<512x288xbf16, #tpu.memory_space<vmem>>, vector<512x288xbf16>
      %c0_9 = arith.constant 0 : index
      %c0_10 = arith.constant 0 : index
      %17 = vector.load %arg3[%c0_9, %c0_10] : memref<288x128xbf16, #tpu.memory_space<vmem>>, vector<288x128xbf16>
      %cst = arith.constant dense<0.000000e+00> : vector<512x128xf32>
      %18 = tpu.matmul %16, %17, %cst {dimension_numbers = #tpu.dot_dimension_numbers<[1], [0], [0], [1], [0, 0, 1, 1], [], []>} : vector<512x288xbf16>, vector<288x128xbf16>, vector<512x128xf32> -> vector<512x128xf32>
      %19 = arith.index_cast %arg1 : i32 to index
      %c0_11 = arith.constant 0 : index
      %c0_12 = arith.constant 0 : index
      %20 = vector.load %arg7[%19, %c0_11, %c0_12] : memref<2x512x128xf32, #tpu.memory_space<vmem>>, vector<1x512x128xf32>
      %21 = vector.shape_cast %20 : vector<1x512x128xf32> to vector<512x128xf32>
      %22 = vector.shape_cast %18 : vector<512x128xf32> to vector<1x512x128xf32>
      tpu.vector_store %arg7[%19, %c0_11, %c0_12], %22 {strides = array<i32>} : memref<2x512x128xf32, #tpu.memory_space<vmem>>, vector<1x512x128xf32>,
      %c0_13 = arith.constant 0 : index
      %c0_14 = arith.constant 0 : index
      %23 = vector.load %arg8[%c0_13, %c0_14] : memref<1x128xf32, #tpu.memory_space<vmem>>, vector<1x128xf32>
      %cst_15 = arith.constant dense<0.000000e+00> : vector<128xf32>
      %24 = vector.multi_reduction <add>, %18, %cst_15 [0] : vector<512x128xf32> to vector<128xf32>
      %25 = vector.shape_cast %24 : vector<128xf32> to vector<1x128xf32>
      %26 = arith.addf %23, %25 : vector<1x128xf32>
      %c0_16 = arith.constant 0 : index
      %c0_17 = arith.constant 0 : index
      %27 = vector.load %arg8[%c0_16, %c0_17] : memref<1x128xf32, #tpu.memory_space<vmem>>, vector<1x128xf32>
      tpu.vector_store %arg8[%c0_16, %c0_17], %26 {strides = array<i32>} : memref<1x128xf32, #tpu.memory_space<vmem>>, vector<1x128xf32>,
      %c0_18 = arith.constant 0 : index
      %c0_19 = arith.constant 0 : index
      %28 = vector.load %arg9[%c0_18, %c0_19] : memref<1x128xf32, #tpu.memory_space<vmem>>, vector<1x128xf32>
      %29 = arith.mulf %18, %18 : vector<512x128xf32>
      %cst_20 = arith.constant dense<0.000000e+00> : vector<128xf32>
      %30 = vector.multi_reduction <add>, %29, %cst_20 [0] : vector<512x128xf32> to vector<128xf32>
      %31 = vector.shape_cast %30 : vector<128xf32> to vector<1x128xf32>
      %32 = arith.addf %28, %31 : vector<1x128xf32>
      %c0_21 = arith.constant 0 : index
      %c0_22 = arith.constant 0 : index
      %33 = vector.load %arg9[%c0_21, %c0_22] : memref<1x128xf32, #tpu.memory_space<vmem>>, vector<1x128xf32>
      tpu.vector_store %arg9[%c0_21, %c0_22], %32 {strides = array<i32>} : memref<1x128xf32, #tpu.memory_space<vmem>>, vector<1x128xf32>,
    } else {
    }
    %c1_i32 = arith.constant 1 : i32
    %8 = arith.cmpi eq, %arg0, %c1_i32 : i32
    %c0_i32_4 = arith.constant 0 : i32
    %9 = arith.cmpi eq, %arg1, %c0_i32_4 : i32
    %10 = arith.andi %8, %9 : i1
    %11 = arith.extui %10 : i1 to i32
    %c0_i32_5 = arith.constant 0 : i32
    %12 = arith.cmpi ne, %11, %c0_i32_5 : i32
    scf.if %12 {
      %c0 = arith.constant 0 : index
      %c0_8 = arith.constant 0 : index
      %16 = vector.load %arg8[%c0, %c0_8] : memref<1x128xf32, #tpu.memory_space<vmem>>, vector<1x128xf32>
      %cst = arith.constant 0.00113378686 : f32
      %17 = vector.broadcast %cst : f32 to vector<1x128xf32>
      %18 = arith.mulf %16, %17 : vector<1x128xf32>
      %c0_9 = arith.constant 0 : index
      %c0_10 = arith.constant 0 : index
      %19 = vector.load %arg9[%c0_9, %c0_10] : memref<1x128xf32, #tpu.memory_space<vmem>>, vector<1x128xf32>
      %cst_11 = arith.constant 0.00113378686 : f32
      %20 = vector.broadcast %cst_11 : f32 to vector<1x128xf32>
      %21 = arith.mulf %19, %20 : vector<1x128xf32>
      %22 = arith.mulf %18, %18 : vector<1x128xf32>
      %23 = arith.subf %21, %22 : vector<1x128xf32>
      %cst_12 = arith.constant 0.000000e+00 : f32
      %24 = vector.broadcast %cst_12 : f32 to vector<1x128xf32>
      %25 = arith.maximumf %23, %24 : vector<1x128xf32>
      %c0_13 = arith.constant 0 : index
      %c0_14 = arith.constant 0 : index
      %26 = vector.load %arg4[%c0_13, %c0_14] : memref<1x128xf32, #tpu.memory_space<vmem>>, vector<1x128xf32>
      %cst_15 = arith.constant 9.99999974E-6 : f32
      %27 = vector.broadcast %cst_15 : f32 to vector<1x128xf32>
      %28 = arith.addf %25, %27 : vector<1x128xf32>
      %29 = math.rsqrt %28 : vector<1x128xf32>
      %30 = arith.mulf %26, %29 : vector<1x128xf32>
      %c0_16 = arith.constant 0 : index
      %c0_17 = arith.constant 0 : index
      %31 = vector.load %arg10[%c0_16, %c0_17] : memref<1x128xf32, #tpu.memory_space<vmem>>, vector<1x128xf32>
      tpu.vector_store %arg10[%c0_16, %c0_17], %30 {strides = array<i32>} : memref<1x128xf32, #tpu.memory_space<vmem>>, vector<1x128xf32>,
      %c0_18 = arith.constant 0 : index
      %c0_19 = arith.constant 0 : index
      %32 = vector.load %arg5[%c0_18, %c0_19] : memref<1x128xf32, #tpu.memory_space<vmem>>, vector<1x128xf32>
      %33 = arith.mulf %18, %30 : vector<1x128xf32>
      %34 = arith.subf %32, %33 : vector<1x128xf32>
      %c0_20 = arith.constant 0 : index
      %c0_21 = arith.constant 0 : index
      %35 = vector.load %arg11[%c0_20, %c0_21] : memref<1x128xf32, #tpu.memory_space<vmem>>, vector<1x128xf32>
      tpu.vector_store %arg11[%c0_20, %c0_21], %34 {strides = array<i32>} : memref<1x128xf32, #tpu.memory_space<vmem>>, vector<1x128xf32>,
    } else {
    }
    %c1_i32_6 = arith.constant 1 : i32
    %13 = arith.cmpi eq, %arg0, %c1_i32_6 : i32
    %14 = arith.extui %13 : i1 to i32
    %c0_i32_7 = arith.constant 0 : i32
    %15 = arith.cmpi ne, %14, %c0_i32_7 : i32
    scf.if %15 {
      %16 = arith.index_cast %arg1 : i32 to index
      %c0 = arith.constant 0 : index
      %c0_8 = arith.constant 0 : index
      %17 = vector.load %arg7[%16, %c0, %c0_8] : memref<2x512x128xf32, #tpu.memory_space<vmem>>, vector<1x512x128xf32>
      %18 = vector.shape_cast %17 : vector<1x512x128xf32> to vector<512x128xf32>
      %c0_9 = arith.constant 0 : index
      %c0_10 = arith.constant 0 : index
      %19 = vector.load %arg10[%c0_9, %c0_10] : memref<1x128xf32, #tpu.memory_space<vmem>>, vector<1x128xf32>
      %20 = vector.broadcast %19 : vector<1x128xf32> to vector<512x128xf32>
      %21 = arith.mulf %18, %20 : vector<512x128xf32>
      %c0_11 = arith.constant 0 : index
      %c0_12 = arith.constant 0 : index
      %22 = vector.load %arg11[%c0_11, %c0_12] : memref<1x128xf32, #tpu.memory_space<vmem>>, vector<1x128xf32>
      %23 = vector.broadcast %22 : vector<1x128xf32> to vector<512x128xf32>
      %24 = arith.addf %21, %23 : vector<512x128xf32>
      %cst = arith.constant 0.00999999977 : f32
      %25 = vector.broadcast %cst : f32 to vector<512x128xf32>
      %26 = arith.mulf %25, %24 : vector<512x128xf32>
      %27 = arith.maximumf %24, %26 : vector<512x128xf32>
      %28 = arith.truncf %27 : vector<512x128xf32> to vector<512x128xbf16>
      %c0_13 = arith.constant 0 : index
      %c0_14 = arith.constant 0 : index
      %29 = vector.load %arg6[%c0_13, %c0_14] : memref<512x128xbf16, #tpu.memory_space<vmem>>, vector<512x128xbf16>
      tpu.vector_store %arg6[%c0_13, %c0_14], %28 {strides = array<i32>} : memref<512x128xbf16, #tpu.memory_space<vmem>>, vector<512x128xbf16>,
    } else {
    }
    return
  }
  func.func @transform_0(%arg0: i32, %arg1: i32) -> (i32, i32) {
    %c1_i32 = arith.constant 1 : i32
    %0 = arith.subi %c1_i32, %arg0 : i32
    %1 = arith.muli %0, %arg1 : i32
    %c1_i32_0 = arith.constant 1 : i32
    %2 = arith.muli %arg0, %c1_i32_0 : i32
    %3 = arith.addi %1, %2 : i32
    %c0_i32 = arith.constant 0 : i32
    %c0_i32_1 = arith.constant 0 : i32
    return %3, %c0_i32 : i32, i32
  }
  func.func @transform_1(%arg0: i32, %arg1: i32) -> (i32, i32) {
    %c0_i32 = arith.constant 0 : i32
    %c0_i32_0 = arith.constant 0 : i32
    %c0_i32_1 = arith.constant 0 : i32
    return %c0_i32, %c0_i32_0 : i32, i32
  }
  func.func @transform_2(%arg0: i32, %arg1: i32) -> (i32, i32) {
    %c0_i32 = arith.constant 0 : i32
    %c0_i32_0 = arith.constant 0 : i32
    %c0_i32_1 = arith.constant 0 : i32
    return %c0_i32, %c0_i32_0 : i32, i32
  }
  func.func @transform_3(%arg0: i32, %arg1: i32) -> (i32, i32) {
    %c0_i32 = arith.constant 0 : i32
    %c0_i32_0 = arith.constant 0 : i32
    %c0_i32_1 = arith.constant 0 : i32
    return %c0_i32, %c0_i32_0 : i32, i32
  }
  func.func @transform_4(%arg0: i32, %arg1: i32) -> (i32, i32) {
    %0 = arith.muli %arg0, %arg1 : i32
    %c0_i32 = arith.constant 0 : i32
    %c0_i32_0 = arith.constant 0 : i32
    return %0, %c0_i32 : i32, i32
  }
}

module attributes {stable_mosaic.version = 11 : i64} {
  func.func @_fused_layer_kernel(%arg0: i32, %arg1: i32, %arg2: memref<256x288xbf16, #tpu.memory_space<vmem>>, %arg3: memref<288x128xbf16, #tpu.memory_space<vmem>>, %arg4: memref<1x128xf32, #tpu.memory_space<vmem>>, %arg5: memref<1x128xf32, #tpu.memory_space<vmem>>, %arg6: memref<256x128xbf16, #tpu.memory_space<vmem>>, %arg7: memref<1x256x128xf32, #tpu.memory_space<vmem>>, %arg8: memref<1x128xf32, #tpu.memory_space<vmem>>, %arg9: memref<1x128xf32, #tpu.memory_space<vmem>>, %arg10: memref<1x128xf32, #tpu.memory_space<vmem>>, %arg11: memref<1x128xf32, #tpu.memory_space<vmem>>) attributes {dimension_semantics = [#tpu.dimension_semantics<arbitrary>, #tpu.dimension_semantics<arbitrary>], iteration_bounds = array<i64: 2, 1>, scalar_prefetch = 0 : i64, scratch_operands = 5 : i64, tpu.core_type = #tpu.core_type<tc>, window_params = [{transform_indices = @transform_0, window_bounds = array<i64: 256, 288>}, {pipeline_mode = #tpu.pipeline_mode<synchronous>, transform_indices = @transform_1, window_bounds = array<i64: 288, 128>}, {pipeline_mode = #tpu.pipeline_mode<synchronous>, transform_indices = @transform_2, window_bounds = array<i64: 1, 128>}, {pipeline_mode = #tpu.pipeline_mode<synchronous>, transform_indices = @transform_3, window_bounds = array<i64: 1, 128>}, {transform_indices = @transform_4, window_bounds = array<i64: 256, 128>}]} {
    %c0_i32 = arith.constant 0 : i32
    %0 = arith.cmpi eq, %arg0, %c0_i32 : i32
    %c0_i32_0 = arith.constant 0 : i32
    %1 = arith.cmpi eq, %arg1, %c0_i32_0 : i32
    %2 = arith.andi %0, %1 : i1
    %3 = arith.extui %2 : i1 to i32
    %c0_i32_1 = arith.constant 0 : i32
    %4 = arith.cmpi ne, %3, %c0_i32_1 : i32
    scf.if %4 {
      %cst = arith.constant 0.000000e+00 : f32
      %16 = vector.broadcast %cst : f32 to vector<1x128xf32>
      %c0 = arith.constant 0 : index
      %c0_8 = arith.constant 0 : index
      %17 = vector.load %arg8[%c0, %c0_8] : memref<1x128xf32, #tpu.memory_space<vmem>>, vector<1x128xf32>
      tpu.vector_store %arg8[%c0, %c0_8], %16 {strides = array<i32>} : memref<1x128xf32, #tpu.memory_space<vmem>>, vector<1x128xf32>,
      %cst_9 = arith.constant 0.000000e+00 : f32
      %18 = vector.broadcast %cst_9 : f32 to vector<1x128xf32>
      %c0_10 = arith.constant 0 : index
      %c0_11 = arith.constant 0 : index
      %19 = vector.load %arg9[%c0_10, %c0_11] : memref<1x128xf32, #tpu.memory_space<vmem>>, vector<1x128xf32>
      tpu.vector_store %arg9[%c0_10, %c0_11], %18 {strides = array<i32>} : memref<1x128xf32, #tpu.memory_space<vmem>>, vector<1x128xf32>,
    } else {
    }
    %c0_i32_2 = arith.constant 0 : i32
    %5 = arith.cmpi eq, %arg0, %c0_i32_2 : i32
    %6 = arith.extui %5 : i1 to i32
    %c0_i32_3 = arith.constant 0 : i32
    %7 = arith.cmpi ne, %6, %c0_i32_3 : i32
    scf.if %7 {
      %c0 = arith.constant 0 : index
      %c0_8 = arith.constant 0 : index
      %16 = vector.load %arg2[%c0, %c0_8] : memref<256x288xbf16, #tpu.memory_space<vmem>>, vector<256x288xbf16>
      %c0_9 = arith.constant 0 : index
      %c0_10 = arith.constant 0 : index
      %17 = vector.load %arg3[%c0_9, %c0_10] : memref<288x128xbf16, #tpu.memory_space<vmem>>, vector<288x128xbf16>
      %cst = arith.constant dense<0.000000e+00> : vector<256x128xf32>
      %18 = tpu.matmul %16, %17, %cst {dimension_numbers = #tpu.dot_dimension_numbers<[1], [0], [0], [1], [0, 0, 1, 1], [], []>} : vector<256x288xbf16>, vector<288x128xbf16>, vector<256x128xf32> -> vector<256x128xf32>
      %19 = arith.index_cast %arg1 : i32 to index
      %c0_11 = arith.constant 0 : index
      %c0_12 = arith.constant 0 : index
      %20 = vector.load %arg7[%19, %c0_11, %c0_12] : memref<1x256x128xf32, #tpu.memory_space<vmem>>, vector<1x256x128xf32>
      %21 = vector.shape_cast %20 : vector<1x256x128xf32> to vector<256x128xf32>
      %22 = vector.shape_cast %18 : vector<256x128xf32> to vector<1x256x128xf32>
      tpu.vector_store %arg7[%19, %c0_11, %c0_12], %22 {strides = array<i32>} : memref<1x256x128xf32, #tpu.memory_space<vmem>>, vector<1x256x128xf32>,
      %c0_13 = arith.constant 0 : index
      %c0_14 = arith.constant 0 : index
      %23 = vector.load %arg8[%c0_13, %c0_14] : memref<1x128xf32, #tpu.memory_space<vmem>>, vector<1x128xf32>
      %cst_15 = arith.constant dense<0.000000e+00> : vector<128xf32>
      %24 = vector.multi_reduction <add>, %18, %cst_15 [0] : vector<256x128xf32> to vector<128xf32>
      %25 = vector.shape_cast %24 : vector<128xf32> to vector<1x128xf32>
      %26 = arith.addf %23, %25 : vector<1x128xf32>
      %c0_16 = arith.constant 0 : index
      %c0_17 = arith.constant 0 : index
      %27 = vector.load %arg8[%c0_16, %c0_17] : memref<1x128xf32, #tpu.memory_space<vmem>>, vector<1x128xf32>
      tpu.vector_store %arg8[%c0_16, %c0_17], %26 {strides = array<i32>} : memref<1x128xf32, #tpu.memory_space<vmem>>, vector<1x128xf32>,
      %c0_18 = arith.constant 0 : index
      %c0_19 = arith.constant 0 : index
      %28 = vector.load %arg9[%c0_18, %c0_19] : memref<1x128xf32, #tpu.memory_space<vmem>>, vector<1x128xf32>
      %29 = arith.mulf %18, %18 : vector<256x128xf32>
      %cst_20 = arith.constant dense<0.000000e+00> : vector<128xf32>
      %30 = vector.multi_reduction <add>, %29, %cst_20 [0] : vector<256x128xf32> to vector<128xf32>
      %31 = vector.shape_cast %30 : vector<128xf32> to vector<1x128xf32>
      %32 = arith.addf %28, %31 : vector<1x128xf32>
      %c0_21 = arith.constant 0 : index
      %c0_22 = arith.constant 0 : index
      %33 = vector.load %arg9[%c0_21, %c0_22] : memref<1x128xf32, #tpu.memory_space<vmem>>, vector<1x128xf32>
      tpu.vector_store %arg9[%c0_21, %c0_22], %32 {strides = array<i32>} : memref<1x128xf32, #tpu.memory_space<vmem>>, vector<1x128xf32>,
    } else {
    }
    %c1_i32 = arith.constant 1 : i32
    %8 = arith.cmpi eq, %arg0, %c1_i32 : i32
    %c0_i32_4 = arith.constant 0 : i32
    %9 = arith.cmpi eq, %arg1, %c0_i32_4 : i32
    %10 = arith.andi %8, %9 : i1
    %11 = arith.extui %10 : i1 to i32
    %c0_i32_5 = arith.constant 0 : i32
    %12 = arith.cmpi ne, %11, %c0_i32_5 : i32
    scf.if %12 {
      %c0 = arith.constant 0 : index
      %c0_8 = arith.constant 0 : index
      %16 = vector.load %arg8[%c0, %c0_8] : memref<1x128xf32, #tpu.memory_space<vmem>>, vector<1x128xf32>
      %cst = arith.constant 0.00413223123 : f32
      %17 = vector.broadcast %cst : f32 to vector<1x128xf32>
      %18 = arith.mulf %16, %17 : vector<1x128xf32>
      %c0_9 = arith.constant 0 : index
      %c0_10 = arith.constant 0 : index
      %19 = vector.load %arg9[%c0_9, %c0_10] : memref<1x128xf32, #tpu.memory_space<vmem>>, vector<1x128xf32>
      %cst_11 = arith.constant 0.00413223123 : f32
      %20 = vector.broadcast %cst_11 : f32 to vector<1x128xf32>
      %21 = arith.mulf %19, %20 : vector<1x128xf32>
      %22 = arith.mulf %18, %18 : vector<1x128xf32>
      %23 = arith.subf %21, %22 : vector<1x128xf32>
      %cst_12 = arith.constant 0.000000e+00 : f32
      %24 = vector.broadcast %cst_12 : f32 to vector<1x128xf32>
      %25 = arith.maximumf %23, %24 : vector<1x128xf32>
      %c0_13 = arith.constant 0 : index
      %c0_14 = arith.constant 0 : index
      %26 = vector.load %arg4[%c0_13, %c0_14] : memref<1x128xf32, #tpu.memory_space<vmem>>, vector<1x128xf32>
      %cst_15 = arith.constant 9.99999974E-6 : f32
      %27 = vector.broadcast %cst_15 : f32 to vector<1x128xf32>
      %28 = arith.addf %25, %27 : vector<1x128xf32>
      %29 = math.rsqrt %28 : vector<1x128xf32>
      %30 = arith.mulf %26, %29 : vector<1x128xf32>
      %c0_16 = arith.constant 0 : index
      %c0_17 = arith.constant 0 : index
      %31 = vector.load %arg10[%c0_16, %c0_17] : memref<1x128xf32, #tpu.memory_space<vmem>>, vector<1x128xf32>
      tpu.vector_store %arg10[%c0_16, %c0_17], %30 {strides = array<i32>} : memref<1x128xf32, #tpu.memory_space<vmem>>, vector<1x128xf32>,
      %c0_18 = arith.constant 0 : index
      %c0_19 = arith.constant 0 : index
      %32 = vector.load %arg5[%c0_18, %c0_19] : memref<1x128xf32, #tpu.memory_space<vmem>>, vector<1x128xf32>
      %33 = arith.mulf %18, %30 : vector<1x128xf32>
      %34 = arith.subf %32, %33 : vector<1x128xf32>
      %c0_20 = arith.constant 0 : index
      %c0_21 = arith.constant 0 : index
      %35 = vector.load %arg11[%c0_20, %c0_21] : memref<1x128xf32, #tpu.memory_space<vmem>>, vector<1x128xf32>
      tpu.vector_store %arg11[%c0_20, %c0_21], %34 {strides = array<i32>} : memref<1x128xf32, #tpu.memory_space<vmem>>, vector<1x128xf32>,
    } else {
    }
    %c1_i32_6 = arith.constant 1 : i32
    %13 = arith.cmpi eq, %arg0, %c1_i32_6 : i32
    %14 = arith.extui %13 : i1 to i32
    %c0_i32_7 = arith.constant 0 : i32
    %15 = arith.cmpi ne, %14, %c0_i32_7 : i32
    scf.if %15 {
      %16 = arith.index_cast %arg1 : i32 to index
      %c0 = arith.constant 0 : index
      %c0_8 = arith.constant 0 : index
      %17 = vector.load %arg7[%16, %c0, %c0_8] : memref<1x256x128xf32, #tpu.memory_space<vmem>>, vector<1x256x128xf32>
      %18 = vector.shape_cast %17 : vector<1x256x128xf32> to vector<256x128xf32>
      %c0_9 = arith.constant 0 : index
      %c0_10 = arith.constant 0 : index
      %19 = vector.load %arg10[%c0_9, %c0_10] : memref<1x128xf32, #tpu.memory_space<vmem>>, vector<1x128xf32>
      %20 = vector.broadcast %19 : vector<1x128xf32> to vector<256x128xf32>
      %21 = arith.mulf %18, %20 : vector<256x128xf32>
      %c0_11 = arith.constant 0 : index
      %c0_12 = arith.constant 0 : index
      %22 = vector.load %arg11[%c0_11, %c0_12] : memref<1x128xf32, #tpu.memory_space<vmem>>, vector<1x128xf32>
      %23 = vector.broadcast %22 : vector<1x128xf32> to vector<256x128xf32>
      %24 = arith.addf %21, %23 : vector<256x128xf32>
      %cst = arith.constant 0.00999999977 : f32
      %25 = vector.broadcast %cst : f32 to vector<256x128xf32>
      %26 = arith.mulf %25, %24 : vector<256x128xf32>
      %27 = arith.maximumf %24, %26 : vector<256x128xf32>
      %28 = arith.truncf %27 : vector<256x128xf32> to vector<256x128xbf16>
      %c0_13 = arith.constant 0 : index
      %c0_14 = arith.constant 0 : index
      %29 = vector.load %arg6[%c0_13, %c0_14] : memref<256x128xbf16, #tpu.memory_space<vmem>>, vector<256x128xbf16>
      tpu.vector_store %arg6[%c0_13, %c0_14], %28 {strides = array<i32>} : memref<256x128xbf16, #tpu.memory_space<vmem>>, vector<256x128xbf16>,
    } else {
    }
    return
  }
  func.func @transform_0(%arg0: i32, %arg1: i32) -> (i32, i32) {
    %c1_i32 = arith.constant 1 : i32
    %0 = arith.subi %c1_i32, %arg0 : i32
    %1 = arith.muli %0, %arg1 : i32
    %c0_i32 = arith.constant 0 : i32
    %2 = arith.muli %arg0, %c0_i32 : i32
    %3 = arith.addi %1, %2 : i32
    %c0_i32_0 = arith.constant 0 : i32
    %c0_i32_1 = arith.constant 0 : i32
    return %3, %c0_i32_0 : i32, i32
  }
  func.func @transform_1(%arg0: i32, %arg1: i32) -> (i32, i32) {
    %c0_i32 = arith.constant 0 : i32
    %c0_i32_0 = arith.constant 0 : i32
    %c0_i32_1 = arith.constant 0 : i32
    return %c0_i32, %c0_i32_0 : i32, i32
  }
  func.func @transform_2(%arg0: i32, %arg1: i32) -> (i32, i32) {
    %c0_i32 = arith.constant 0 : i32
    %c0_i32_0 = arith.constant 0 : i32
    %c0_i32_1 = arith.constant 0 : i32
    return %c0_i32, %c0_i32_0 : i32, i32
  }
  func.func @transform_3(%arg0: i32, %arg1: i32) -> (i32, i32) {
    %c0_i32 = arith.constant 0 : i32
    %c0_i32_0 = arith.constant 0 : i32
    %c0_i32_1 = arith.constant 0 : i32
    return %c0_i32, %c0_i32_0 : i32, i32
  }
  func.func @transform_4(%arg0: i32, %arg1: i32) -> (i32, i32) {
    %0 = arith.muli %arg0, %arg1 : i32
    %c0_i32 = arith.constant 0 : i32
    %c0_i32_0 = arith.constant 0 : i32
    return %0, %c0_i32 : i32, i32
  }
}

module attributes {stable_mosaic.version = 11 : i64} {
  func.func @_fused_layer_kernel(%arg0: i32, %arg1: i32, %arg2: memref<80x288xbf16, #tpu.memory_space<vmem>>, %arg3: memref<288x128xbf16, #tpu.memory_space<vmem>>, %arg4: memref<1x128xf32, #tpu.memory_space<vmem>>, %arg5: memref<1x128xf32, #tpu.memory_space<vmem>>, %arg6: memref<80x128xbf16, #tpu.memory_space<vmem>>, %arg7: memref<1x80x128xf32, #tpu.memory_space<vmem>>, %arg8: memref<1x128xf32, #tpu.memory_space<vmem>>, %arg9: memref<1x128xf32, #tpu.memory_space<vmem>>, %arg10: memref<1x128xf32, #tpu.memory_space<vmem>>, %arg11: memref<1x128xf32, #tpu.memory_space<vmem>>) attributes {dimension_semantics = [#tpu.dimension_semantics<arbitrary>, #tpu.dimension_semantics<arbitrary>], iteration_bounds = array<i64: 2, 1>, scalar_prefetch = 0 : i64, scratch_operands = 5 : i64, tpu.core_type = #tpu.core_type<tc>, window_params = [{transform_indices = @transform_0, window_bounds = array<i64: 80, 288>}, {pipeline_mode = #tpu.pipeline_mode<synchronous>, transform_indices = @transform_1, window_bounds = array<i64: 288, 128>}, {pipeline_mode = #tpu.pipeline_mode<synchronous>, transform_indices = @transform_2, window_bounds = array<i64: 1, 128>}, {pipeline_mode = #tpu.pipeline_mode<synchronous>, transform_indices = @transform_3, window_bounds = array<i64: 1, 128>}, {transform_indices = @transform_4, window_bounds = array<i64: 80, 128>}]} {
    %c0_i32 = arith.constant 0 : i32
    %0 = arith.cmpi eq, %arg0, %c0_i32 : i32
    %c0_i32_0 = arith.constant 0 : i32
    %1 = arith.cmpi eq, %arg1, %c0_i32_0 : i32
    %2 = arith.andi %0, %1 : i1
    %3 = arith.extui %2 : i1 to i32
    %c0_i32_1 = arith.constant 0 : i32
    %4 = arith.cmpi ne, %3, %c0_i32_1 : i32
    scf.if %4 {
      %cst = arith.constant 0.000000e+00 : f32
      %16 = vector.broadcast %cst : f32 to vector<1x128xf32>
      %c0 = arith.constant 0 : index
      %c0_8 = arith.constant 0 : index
      %17 = vector.load %arg8[%c0, %c0_8] : memref<1x128xf32, #tpu.memory_space<vmem>>, vector<1x128xf32>
      tpu.vector_store %arg8[%c0, %c0_8], %16 {strides = array<i32>} : memref<1x128xf32, #tpu.memory_space<vmem>>, vector<1x128xf32>,
      %cst_9 = arith.constant 0.000000e+00 : f32
      %18 = vector.broadcast %cst_9 : f32 to vector<1x128xf32>
      %c0_10 = arith.constant 0 : index
      %c0_11 = arith.constant 0 : index
      %19 = vector.load %arg9[%c0_10, %c0_11] : memref<1x128xf32, #tpu.memory_space<vmem>>, vector<1x128xf32>
      tpu.vector_store %arg9[%c0_10, %c0_11], %18 {strides = array<i32>} : memref<1x128xf32, #tpu.memory_space<vmem>>, vector<1x128xf32>,
    } else {
    }
    %c0_i32_2 = arith.constant 0 : i32
    %5 = arith.cmpi eq, %arg0, %c0_i32_2 : i32
    %6 = arith.extui %5 : i1 to i32
    %c0_i32_3 = arith.constant 0 : i32
    %7 = arith.cmpi ne, %6, %c0_i32_3 : i32
    scf.if %7 {
      %c0 = arith.constant 0 : index
      %c0_8 = arith.constant 0 : index
      %16 = vector.load %arg2[%c0, %c0_8] : memref<80x288xbf16, #tpu.memory_space<vmem>>, vector<80x288xbf16>
      %c0_9 = arith.constant 0 : index
      %c0_10 = arith.constant 0 : index
      %17 = vector.load %arg3[%c0_9, %c0_10] : memref<288x128xbf16, #tpu.memory_space<vmem>>, vector<288x128xbf16>
      %cst = arith.constant dense<0.000000e+00> : vector<80x128xf32>
      %18 = tpu.matmul %16, %17, %cst {dimension_numbers = #tpu.dot_dimension_numbers<[1], [0], [0], [1], [0, 0, 1, 1], [], []>} : vector<80x288xbf16>, vector<288x128xbf16>, vector<80x128xf32> -> vector<80x128xf32>
      %19 = arith.index_cast %arg1 : i32 to index
      %c0_11 = arith.constant 0 : index
      %c0_12 = arith.constant 0 : index
      %20 = vector.load %arg7[%19, %c0_11, %c0_12] : memref<1x80x128xf32, #tpu.memory_space<vmem>>, vector<1x80x128xf32>
      %21 = vector.shape_cast %20 : vector<1x80x128xf32> to vector<80x128xf32>
      %22 = vector.shape_cast %18 : vector<80x128xf32> to vector<1x80x128xf32>
      tpu.vector_store %arg7[%19, %c0_11, %c0_12], %22 {strides = array<i32>} : memref<1x80x128xf32, #tpu.memory_space<vmem>>, vector<1x80x128xf32>,
      %c0_13 = arith.constant 0 : index
      %c0_14 = arith.constant 0 : index
      %23 = vector.load %arg8[%c0_13, %c0_14] : memref<1x128xf32, #tpu.memory_space<vmem>>, vector<1x128xf32>
      %cst_15 = arith.constant dense<0.000000e+00> : vector<128xf32>
      %24 = vector.multi_reduction <add>, %18, %cst_15 [0] : vector<80x128xf32> to vector<128xf32>
      %25 = vector.shape_cast %24 : vector<128xf32> to vector<1x128xf32>
      %26 = arith.addf %23, %25 : vector<1x128xf32>
      %c0_16 = arith.constant 0 : index
      %c0_17 = arith.constant 0 : index
      %27 = vector.load %arg8[%c0_16, %c0_17] : memref<1x128xf32, #tpu.memory_space<vmem>>, vector<1x128xf32>
      tpu.vector_store %arg8[%c0_16, %c0_17], %26 {strides = array<i32>} : memref<1x128xf32, #tpu.memory_space<vmem>>, vector<1x128xf32>,
      %c0_18 = arith.constant 0 : index
      %c0_19 = arith.constant 0 : index
      %28 = vector.load %arg9[%c0_18, %c0_19] : memref<1x128xf32, #tpu.memory_space<vmem>>, vector<1x128xf32>
      %29 = arith.mulf %18, %18 : vector<80x128xf32>
      %cst_20 = arith.constant dense<0.000000e+00> : vector<128xf32>
      %30 = vector.multi_reduction <add>, %29, %cst_20 [0] : vector<80x128xf32> to vector<128xf32>
      %31 = vector.shape_cast %30 : vector<128xf32> to vector<1x128xf32>
      %32 = arith.addf %28, %31 : vector<1x128xf32>
      %c0_21 = arith.constant 0 : index
      %c0_22 = arith.constant 0 : index
      %33 = vector.load %arg9[%c0_21, %c0_22] : memref<1x128xf32, #tpu.memory_space<vmem>>, vector<1x128xf32>
      tpu.vector_store %arg9[%c0_21, %c0_22], %32 {strides = array<i32>} : memref<1x128xf32, #tpu.memory_space<vmem>>, vector<1x128xf32>,
    } else {
    }
    %c1_i32 = arith.constant 1 : i32
    %8 = arith.cmpi eq, %arg0, %c1_i32 : i32
    %c0_i32_4 = arith.constant 0 : i32
    %9 = arith.cmpi eq, %arg1, %c0_i32_4 : i32
    %10 = arith.andi %8, %9 : i1
    %11 = arith.extui %10 : i1 to i32
    %c0_i32_5 = arith.constant 0 : i32
    %12 = arith.cmpi ne, %11, %c0_i32_5 : i32
    scf.if %12 {
      %c0 = arith.constant 0 : index
      %c0_8 = arith.constant 0 : index
      %16 = vector.load %arg8[%c0, %c0_8] : memref<1x128xf32, #tpu.memory_space<vmem>>, vector<1x128xf32>
      %cst = arith.constant 0.013888889 : f32
      %17 = vector.broadcast %cst : f32 to vector<1x128xf32>
      %18 = arith.mulf %16, %17 : vector<1x128xf32>
      %c0_9 = arith.constant 0 : index
      %c0_10 = arith.constant 0 : index
      %19 = vector.load %arg9[%c0_9, %c0_10] : memref<1x128xf32, #tpu.memory_space<vmem>>, vector<1x128xf32>
      %cst_11 = arith.constant 0.013888889 : f32
      %20 = vector.broadcast %cst_11 : f32 to vector<1x128xf32>
      %21 = arith.mulf %19, %20 : vector<1x128xf32>
      %22 = arith.mulf %18, %18 : vector<1x128xf32>
      %23 = arith.subf %21, %22 : vector<1x128xf32>
      %cst_12 = arith.constant 0.000000e+00 : f32
      %24 = vector.broadcast %cst_12 : f32 to vector<1x128xf32>
      %25 = arith.maximumf %23, %24 : vector<1x128xf32>
      %c0_13 = arith.constant 0 : index
      %c0_14 = arith.constant 0 : index
      %26 = vector.load %arg4[%c0_13, %c0_14] : memref<1x128xf32, #tpu.memory_space<vmem>>, vector<1x128xf32>
      %cst_15 = arith.constant 9.99999974E-6 : f32
      %27 = vector.broadcast %cst_15 : f32 to vector<1x128xf32>
      %28 = arith.addf %25, %27 : vector<1x128xf32>
      %29 = math.rsqrt %28 : vector<1x128xf32>
      %30 = arith.mulf %26, %29 : vector<1x128xf32>
      %c0_16 = arith.constant 0 : index
      %c0_17 = arith.constant 0 : index
      %31 = vector.load %arg10[%c0_16, %c0_17] : memref<1x128xf32, #tpu.memory_space<vmem>>, vector<1x128xf32>
      tpu.vector_store %arg10[%c0_16, %c0_17], %30 {strides = array<i32>} : memref<1x128xf32, #tpu.memory_space<vmem>>, vector<1x128xf32>,
      %c0_18 = arith.constant 0 : index
      %c0_19 = arith.constant 0 : index
      %32 = vector.load %arg5[%c0_18, %c0_19] : memref<1x128xf32, #tpu.memory_space<vmem>>, vector<1x128xf32>
      %33 = arith.mulf %18, %30 : vector<1x128xf32>
      %34 = arith.subf %32, %33 : vector<1x128xf32>
      %c0_20 = arith.constant 0 : index
      %c0_21 = arith.constant 0 : index
      %35 = vector.load %arg11[%c0_20, %c0_21] : memref<1x128xf32, #tpu.memory_space<vmem>>, vector<1x128xf32>
      tpu.vector_store %arg11[%c0_20, %c0_21], %34 {strides = array<i32>} : memref<1x128xf32, #tpu.memory_space<vmem>>, vector<1x128xf32>,
    } else {
    }
    %c1_i32_6 = arith.constant 1 : i32
    %13 = arith.cmpi eq, %arg0, %c1_i32_6 : i32
    %14 = arith.extui %13 : i1 to i32
    %c0_i32_7 = arith.constant 0 : i32
    %15 = arith.cmpi ne, %14, %c0_i32_7 : i32
    scf.if %15 {
      %16 = arith.index_cast %arg1 : i32 to index
      %c0 = arith.constant 0 : index
      %c0_8 = arith.constant 0 : index
      %17 = vector.load %arg7[%16, %c0, %c0_8] : memref<1x80x128xf32, #tpu.memory_space<vmem>>, vector<1x80x128xf32>
      %18 = vector.shape_cast %17 : vector<1x80x128xf32> to vector<80x128xf32>
      %c0_9 = arith.constant 0 : index
      %c0_10 = arith.constant 0 : index
      %19 = vector.load %arg10[%c0_9, %c0_10] : memref<1x128xf32, #tpu.memory_space<vmem>>, vector<1x128xf32>
      %20 = vector.broadcast %19 : vector<1x128xf32> to vector<80x128xf32>
      %21 = arith.mulf %18, %20 : vector<80x128xf32>
      %c0_11 = arith.constant 0 : index
      %c0_12 = arith.constant 0 : index
      %22 = vector.load %arg11[%c0_11, %c0_12] : memref<1x128xf32, #tpu.memory_space<vmem>>, vector<1x128xf32>
      %23 = vector.broadcast %22 : vector<1x128xf32> to vector<80x128xf32>
      %24 = arith.addf %21, %23 : vector<80x128xf32>
      %cst = arith.constant 0.00999999977 : f32
      %25 = vector.broadcast %cst : f32 to vector<80x128xf32>
      %26 = arith.mulf %25, %24 : vector<80x128xf32>
      %27 = arith.maximumf %24, %26 : vector<80x128xf32>
      %28 = arith.truncf %27 : vector<80x128xf32> to vector<80x128xbf16>
      %c0_13 = arith.constant 0 : index
      %c0_14 = arith.constant 0 : index
      %29 = vector.load %arg6[%c0_13, %c0_14] : memref<80x128xbf16, #tpu.memory_space<vmem>>, vector<80x128xbf16>
      tpu.vector_store %arg6[%c0_13, %c0_14], %28 {strides = array<i32>} : memref<80x128xbf16, #tpu.memory_space<vmem>>, vector<80x128xbf16>,
    } else {
    }
    return
  }
  func.func @transform_0(%arg0: i32, %arg1: i32) -> (i32, i32) {
    %c1_i32 = arith.constant 1 : i32
    %0 = arith.subi %c1_i32, %arg0 : i32
    %1 = arith.muli %0, %arg1 : i32
    %c0_i32 = arith.constant 0 : i32
    %2 = arith.muli %arg0, %c0_i32 : i32
    %3 = arith.addi %1, %2 : i32
    %c0_i32_0 = arith.constant 0 : i32
    %c0_i32_1 = arith.constant 0 : i32
    return %3, %c0_i32_0 : i32, i32
  }
  func.func @transform_1(%arg0: i32, %arg1: i32) -> (i32, i32) {
    %c0_i32 = arith.constant 0 : i32
    %c0_i32_0 = arith.constant 0 : i32
    %c0_i32_1 = arith.constant 0 : i32
    return %c0_i32, %c0_i32_0 : i32, i32
  }
  func.func @transform_2(%arg0: i32, %arg1: i32) -> (i32, i32) {
    %c0_i32 = arith.constant 0 : i32
    %c0_i32_0 = arith.constant 0 : i32
    %c0_i32_1 = arith.constant 0 : i32
    return %c0_i32, %c0_i32_0 : i32, i32
  }
  func.func @transform_3(%arg0: i32, %arg1: i32) -> (i32, i32) {
    %c0_i32 = arith.constant 0 : i32
    %c0_i32_0 = arith.constant 0 : i32
    %c0_i32_1 = arith.constant 0 : i32
    return %c0_i32, %c0_i32_0 : i32, i32
  }
  func.func @transform_4(%arg0: i32, %arg1: i32) -> (i32, i32) {
    %0 = arith.muli %arg0, %arg1 : i32
    %c0_i32 = arith.constant 0 : i32
    %c0_i32_0 = arith.constant 0 : i32
    return %0, %c0_i32 : i32, i32
  }
}

module attributes {stable_mosaic.version = 11 : i64} {
  func.func @_fused_layer_kernel(%arg0: i32, %arg1: i32, %arg2: memref<32x288xbf16, #tpu.memory_space<vmem>>, %arg3: memref<288x128xbf16, #tpu.memory_space<vmem>>, %arg4: memref<1x128xf32, #tpu.memory_space<vmem>>, %arg5: memref<1x128xf32, #tpu.memory_space<vmem>>, %arg6: memref<32x128xf32, #tpu.memory_space<vmem>>, %arg7: memref<1x32x128xf32, #tpu.memory_space<vmem>>, %arg8: memref<1x128xf32, #tpu.memory_space<vmem>>, %arg9: memref<1x128xf32, #tpu.memory_space<vmem>>, %arg10: memref<1x128xf32, #tpu.memory_space<vmem>>, %arg11: memref<1x128xf32, #tpu.memory_space<vmem>>) attributes {dimension_semantics = [#tpu.dimension_semantics<arbitrary>, #tpu.dimension_semantics<arbitrary>], iteration_bounds = array<i64: 2, 1>, scalar_prefetch = 0 : i64, scratch_operands = 5 : i64, tpu.core_type = #tpu.core_type<tc>, window_params = [{transform_indices = @transform_0, window_bounds = array<i64: 32, 288>}, {pipeline_mode = #tpu.pipeline_mode<synchronous>, transform_indices = @transform_1, window_bounds = array<i64: 288, 128>}, {pipeline_mode = #tpu.pipeline_mode<synchronous>, transform_indices = @transform_2, window_bounds = array<i64: 1, 128>}, {pipeline_mode = #tpu.pipeline_mode<synchronous>, transform_indices = @transform_3, window_bounds = array<i64: 1, 128>}, {transform_indices = @transform_4, window_bounds = array<i64: 32, 128>}]} {
    %c0_i32 = arith.constant 0 : i32
    %0 = arith.cmpi eq, %arg0, %c0_i32 : i32
    %c0_i32_0 = arith.constant 0 : i32
    %1 = arith.cmpi eq, %arg1, %c0_i32_0 : i32
    %2 = arith.andi %0, %1 : i1
    %3 = arith.extui %2 : i1 to i32
    %c0_i32_1 = arith.constant 0 : i32
    %4 = arith.cmpi ne, %3, %c0_i32_1 : i32
    scf.if %4 {
      %cst = arith.constant 0.000000e+00 : f32
      %16 = vector.broadcast %cst : f32 to vector<1x128xf32>
      %c0 = arith.constant 0 : index
      %c0_8 = arith.constant 0 : index
      %17 = vector.load %arg8[%c0, %c0_8] : memref<1x128xf32, #tpu.memory_space<vmem>>, vector<1x128xf32>
      tpu.vector_store %arg8[%c0, %c0_8], %16 {strides = array<i32>} : memref<1x128xf32, #tpu.memory_space<vmem>>, vector<1x128xf32>,
      %cst_9 = arith.constant 0.000000e+00 : f32
      %18 = vector.broadcast %cst_9 : f32 to vector<1x128xf32>
      %c0_10 = arith.constant 0 : index
      %c0_11 = arith.constant 0 : index
      %19 = vector.load %arg9[%c0_10, %c0_11] : memref<1x128xf32, #tpu.memory_space<vmem>>, vector<1x128xf32>
      tpu.vector_store %arg9[%c0_10, %c0_11], %18 {strides = array<i32>} : memref<1x128xf32, #tpu.memory_space<vmem>>, vector<1x128xf32>,
    } else {
    }
    %c0_i32_2 = arith.constant 0 : i32
    %5 = arith.cmpi eq, %arg0, %c0_i32_2 : i32
    %6 = arith.extui %5 : i1 to i32
    %c0_i32_3 = arith.constant 0 : i32
    %7 = arith.cmpi ne, %6, %c0_i32_3 : i32
    scf.if %7 {
      %c0 = arith.constant 0 : index
      %c0_8 = arith.constant 0 : index
      %16 = vector.load %arg2[%c0, %c0_8] : memref<32x288xbf16, #tpu.memory_space<vmem>>, vector<32x288xbf16>
      %c0_9 = arith.constant 0 : index
      %c0_10 = arith.constant 0 : index
      %17 = vector.load %arg3[%c0_9, %c0_10] : memref<288x128xbf16, #tpu.memory_space<vmem>>, vector<288x128xbf16>
      %cst = arith.constant dense<0.000000e+00> : vector<32x128xf32>
      %18 = tpu.matmul %16, %17, %cst {dimension_numbers = #tpu.dot_dimension_numbers<[1], [0], [0], [1], [0, 0, 1, 1], [], []>} : vector<32x288xbf16>, vector<288x128xbf16>, vector<32x128xf32> -> vector<32x128xf32>
      %19 = arith.index_cast %arg1 : i32 to index
      %c0_11 = arith.constant 0 : index
      %c0_12 = arith.constant 0 : index
      %20 = vector.load %arg7[%19, %c0_11, %c0_12] : memref<1x32x128xf32, #tpu.memory_space<vmem>>, vector<1x32x128xf32>
      %21 = vector.shape_cast %20 : vector<1x32x128xf32> to vector<32x128xf32>
      %22 = vector.shape_cast %18 : vector<32x128xf32> to vector<1x32x128xf32>
      tpu.vector_store %arg7[%19, %c0_11, %c0_12], %22 {strides = array<i32>} : memref<1x32x128xf32, #tpu.memory_space<vmem>>, vector<1x32x128xf32>,
      %c0_13 = arith.constant 0 : index
      %c0_14 = arith.constant 0 : index
      %23 = vector.load %arg8[%c0_13, %c0_14] : memref<1x128xf32, #tpu.memory_space<vmem>>, vector<1x128xf32>
      %cst_15 = arith.constant dense<0.000000e+00> : vector<128xf32>
      %24 = vector.multi_reduction <add>, %18, %cst_15 [0] : vector<32x128xf32> to vector<128xf32>
      %25 = vector.shape_cast %24 : vector<128xf32> to vector<1x128xf32>
      %26 = arith.addf %23, %25 : vector<1x128xf32>
      %c0_16 = arith.constant 0 : index
      %c0_17 = arith.constant 0 : index
      %27 = vector.load %arg8[%c0_16, %c0_17] : memref<1x128xf32, #tpu.memory_space<vmem>>, vector<1x128xf32>
      tpu.vector_store %arg8[%c0_16, %c0_17], %26 {strides = array<i32>} : memref<1x128xf32, #tpu.memory_space<vmem>>, vector<1x128xf32>,
      %c0_18 = arith.constant 0 : index
      %c0_19 = arith.constant 0 : index
      %28 = vector.load %arg9[%c0_18, %c0_19] : memref<1x128xf32, #tpu.memory_space<vmem>>, vector<1x128xf32>
      %29 = arith.mulf %18, %18 : vector<32x128xf32>
      %cst_20 = arith.constant dense<0.000000e+00> : vector<128xf32>
      %30 = vector.multi_reduction <add>, %29, %cst_20 [0] : vector<32x128xf32> to vector<128xf32>
      %31 = vector.shape_cast %30 : vector<128xf32> to vector<1x128xf32>
      %32 = arith.addf %28, %31 : vector<1x128xf32>
      %c0_21 = arith.constant 0 : index
      %c0_22 = arith.constant 0 : index
      %33 = vector.load %arg9[%c0_21, %c0_22] : memref<1x128xf32, #tpu.memory_space<vmem>>, vector<1x128xf32>
      tpu.vector_store %arg9[%c0_21, %c0_22], %32 {strides = array<i32>} : memref<1x128xf32, #tpu.memory_space<vmem>>, vector<1x128xf32>,
    } else {
    }
    %c1_i32 = arith.constant 1 : i32
    %8 = arith.cmpi eq, %arg0, %c1_i32 : i32
    %c0_i32_4 = arith.constant 0 : i32
    %9 = arith.cmpi eq, %arg1, %c0_i32_4 : i32
    %10 = arith.andi %8, %9 : i1
    %11 = arith.extui %10 : i1 to i32
    %c0_i32_5 = arith.constant 0 : i32
    %12 = arith.cmpi ne, %11, %c0_i32_5 : i32
    scf.if %12 {
      %c0 = arith.constant 0 : index
      %c0_8 = arith.constant 0 : index
      %16 = vector.load %arg8[%c0, %c0_8] : memref<1x128xf32, #tpu.memory_space<vmem>>, vector<1x128xf32>
      %cst = arith.constant 0.055555556 : f32
      %17 = vector.broadcast %cst : f32 to vector<1x128xf32>
      %18 = arith.mulf %16, %17 : vector<1x128xf32>
      %c0_9 = arith.constant 0 : index
      %c0_10 = arith.constant 0 : index
      %19 = vector.load %arg9[%c0_9, %c0_10] : memref<1x128xf32, #tpu.memory_space<vmem>>, vector<1x128xf32>
      %cst_11 = arith.constant 0.055555556 : f32
      %20 = vector.broadcast %cst_11 : f32 to vector<1x128xf32>
      %21 = arith.mulf %19, %20 : vector<1x128xf32>
      %22 = arith.mulf %18, %18 : vector<1x128xf32>
      %23 = arith.subf %21, %22 : vector<1x128xf32>
      %cst_12 = arith.constant 0.000000e+00 : f32
      %24 = vector.broadcast %cst_12 : f32 to vector<1x128xf32>
      %25 = arith.maximumf %23, %24 : vector<1x128xf32>
      %c0_13 = arith.constant 0 : index
      %c0_14 = arith.constant 0 : index
      %26 = vector.load %arg4[%c0_13, %c0_14] : memref<1x128xf32, #tpu.memory_space<vmem>>, vector<1x128xf32>
      %cst_15 = arith.constant 9.99999974E-6 : f32
      %27 = vector.broadcast %cst_15 : f32 to vector<1x128xf32>
      %28 = arith.addf %25, %27 : vector<1x128xf32>
      %29 = math.rsqrt %28 : vector<1x128xf32>
      %30 = arith.mulf %26, %29 : vector<1x128xf32>
      %c0_16 = arith.constant 0 : index
      %c0_17 = arith.constant 0 : index
      %31 = vector.load %arg10[%c0_16, %c0_17] : memref<1x128xf32, #tpu.memory_space<vmem>>, vector<1x128xf32>
      tpu.vector_store %arg10[%c0_16, %c0_17], %30 {strides = array<i32>} : memref<1x128xf32, #tpu.memory_space<vmem>>, vector<1x128xf32>,
      %c0_18 = arith.constant 0 : index
      %c0_19 = arith.constant 0 : index
      %32 = vector.load %arg5[%c0_18, %c0_19] : memref<1x128xf32, #tpu.memory_space<vmem>>, vector<1x128xf32>
      %33 = arith.mulf %18, %30 : vector<1x128xf32>
      %34 = arith.subf %32, %33 : vector<1x128xf32>
      %c0_20 = arith.constant 0 : index
      %c0_21 = arith.constant 0 : index
      %35 = vector.load %arg11[%c0_20, %c0_21] : memref<1x128xf32, #tpu.memory_space<vmem>>, vector<1x128xf32>
      tpu.vector_store %arg11[%c0_20, %c0_21], %34 {strides = array<i32>} : memref<1x128xf32, #tpu.memory_space<vmem>>, vector<1x128xf32>,
    } else {
    }
    %c1_i32_6 = arith.constant 1 : i32
    %13 = arith.cmpi eq, %arg0, %c1_i32_6 : i32
    %14 = arith.extui %13 : i1 to i32
    %c0_i32_7 = arith.constant 0 : i32
    %15 = arith.cmpi ne, %14, %c0_i32_7 : i32
    scf.if %15 {
      %16 = arith.index_cast %arg1 : i32 to index
      %c0 = arith.constant 0 : index
      %c0_8 = arith.constant 0 : index
      %17 = vector.load %arg7[%16, %c0, %c0_8] : memref<1x32x128xf32, #tpu.memory_space<vmem>>, vector<1x32x128xf32>
      %18 = vector.shape_cast %17 : vector<1x32x128xf32> to vector<32x128xf32>
      %c0_9 = arith.constant 0 : index
      %c0_10 = arith.constant 0 : index
      %19 = vector.load %arg10[%c0_9, %c0_10] : memref<1x128xf32, #tpu.memory_space<vmem>>, vector<1x128xf32>
      %20 = vector.broadcast %19 : vector<1x128xf32> to vector<32x128xf32>
      %21 = arith.mulf %18, %20 : vector<32x128xf32>
      %c0_11 = arith.constant 0 : index
      %c0_12 = arith.constant 0 : index
      %22 = vector.load %arg11[%c0_11, %c0_12] : memref<1x128xf32, #tpu.memory_space<vmem>>, vector<1x128xf32>
      %23 = vector.broadcast %22 : vector<1x128xf32> to vector<32x128xf32>
      %24 = arith.addf %21, %23 : vector<32x128xf32>
      %cst = arith.constant 0.000000e+00 : f32
      %25 = vector.broadcast %cst : f32 to vector<32x128xf32>
      %26 = arith.maximumf %24, %25 : vector<32x128xf32>
      %c0_13 = arith.constant 0 : index
      %c0_14 = arith.constant 0 : index
      %27 = vector.load %arg6[%c0_13, %c0_14] : memref<32x128xf32, #tpu.memory_space<vmem>>, vector<32x128xf32>
      tpu.vector_store %arg6[%c0_13, %c0_14], %26 {strides = array<i32>} : memref<32x128xf32, #tpu.memory_space<vmem>>, vector<32x128xf32>,
    } else {
    }
    return
  }
  func.func @transform_0(%arg0: i32, %arg1: i32) -> (i32, i32) {
    %c1_i32 = arith.constant 1 : i32
    %0 = arith.subi %c1_i32, %arg0 : i32
    %1 = arith.muli %0, %arg1 : i32
    %c0_i32 = arith.constant 0 : i32
    %2 = arith.muli %arg0, %c0_i32 : i32
    %3 = arith.addi %1, %2 : i32
    %c0_i32_0 = arith.constant 0 : i32
    %c0_i32_1 = arith.constant 0 : i32
    return %3, %c0_i32_0 : i32, i32
  }
  func.func @transform_1(%arg0: i32, %arg1: i32) -> (i32, i32) {
    %c0_i32 = arith.constant 0 : i32
    %c0_i32_0 = arith.constant 0 : i32
    %c0_i32_1 = arith.constant 0 : i32
    return %c0_i32, %c0_i32_0 : i32, i32
  }
  func.func @transform_2(%arg0: i32, %arg1: i32) -> (i32, i32) {
    %c0_i32 = arith.constant 0 : i32
    %c0_i32_0 = arith.constant 0 : i32
    %c0_i32_1 = arith.constant 0 : i32
    return %c0_i32, %c0_i32_0 : i32, i32
  }
  func.func @transform_3(%arg0: i32, %arg1: i32) -> (i32, i32) {
    %c0_i32 = arith.constant 0 : i32
    %c0_i32_0 = arith.constant 0 : i32
    %c0_i32_1 = arith.constant 0 : i32
    return %c0_i32, %c0_i32_0 : i32, i32
  }
  func.func @transform_4(%arg0: i32, %arg1: i32) -> (i32, i32) {
    %0 = arith.muli %arg0, %arg1 : i32
    %c0_i32 = arith.constant 0 : i32
    %c0_i32_0 = arith.constant 0 : i32
    return %0, %c0_i32 : i32, i32
  }
}

</mosaic_0001>

<bundles_post_ra>
// kernel: reducedim2_forward.6
= control target key start
LH: loop header
LB: loop body
LE: loop exit
PB: predicated region body
PF: predicated region fallthrough
CT: control target
= control target key end

     0   :  { %s3584_s15 = smov 0   ;;  %s3586_s16 = smov 0   ;;  %s4418_s0 = inlined_call_operand.vmem [shape: bf16[1024,288], index: 0, kind: input, shape index: {}]   ;;  %s4419_s1 = inlined_call_operand.vmem [shape: bf16[288,128], index: 1, kind: input, shape index: {}]   ;;  %s4420_s2 = inlined_call_operand.vmem [shape: f32[1,128], index: 2, kind: input, shape index: {}]   ;;  %s4421_s3 = inlined_call_operand.vmem [shape: f32[1,128], index: 3, kind: input, shape index: {}]   ;;  %s4422_s4 = inlined_call_operand.vmem [shape: bf16[1024,128], index: 4, kind: output, shape index: {}]  }
   0x1   :  { %s3588_s17 = smov 0   ;;  %s3590_s18 = smov 0  }
   0x2   :  { %s3592_s19 = smov 0  }
   0x3 LB: > { %s23_s20 = sadd.s32 1, %s3547_s17  ;;  %s26_s21 = sadd.s32 1, %s3551_s18  ;;  %s3555_s19 = sphi %s3592_s19, %s14_s19   ;;  %s3551_s18 = sphi %s3590_s18, %s4426_s18   ;;  %s3547_s17 = sphi %s3588_s17, %s4425_s17   ;;  %s3543_s16 = sphi %s3586_s16, %s4424_s16   ;;  %s3539_s15 = sphi %s3584_s15, %s4423_s15  }
   0x4   : > { %p24_p0 = scmp.ge.s32.totalorder %s23_s20, 2  ;;  %p2714_p1 = scmp.ge.s32.totalorder %s3555_s19, 1 }
   0x5   : > { %p190_p2 = scmp.lt.s32.totalorder %s3555_s19, 5 }
   0x6   : > { %s4428_s20 = smov (%p24_p0, %s23_s20), 0  ;;  %s4430_s21 = smov (!%p24_p0, %s26_s21), %s3551_s18 }
   0x7   : > { %p191_p3 = pnand %p2714_p1, %p190_p2  ;;  %p28_p4 = scmp.ge.s32.totalorder %s4430_s21, 2 }
   0x8   : > { %s221_s22 = ssub.s32 (!%p191_p3), 1, %s3543_s16  ;;  %s234_s23 = smul.u32 (!%p191_p3), %s3539_s15, %s3543_s16 }
   0x9   : > { %s4432_s21 = smov (%p28_p4, %s4430_s21), 0  ;;  %194 = sbr.rel (%p191_p3) target bundleno = 657 (0x291), region = 36 }
   0xa   : > { %s222_s24 = smul.u32 (!%p191_p3), %s3539_s15, %s221_s22  ;;  %p243_p5 = scmp.eq.s32.totalorder (!%p191_p3), %s3543_s16, 0 }
   0xb   : > { %s2717_s25 = sshll.u32 (!%p191_p3), %s234_s23, 6  ;;  %p244_p6 = scmp.eq.s32.totalorder (!%p191_p3), %s3539_s15, 0 }
   0xc   : > { %s223_s26 = sadd.s32 (!%p191_p3), %s3543_s16, %s222_s24  ;;  %p236_p7 = scmp.lt.s32.totalorder (!%p191_p3), %s2717_s25, 127 }
   0xd   : > { %s2715_s27 = sshll.u32 (!%p191_p3), %s223_s26, 6  ;;  %p245_p8 = pnand (!%p191_p3), %p244_p6, %p243_p5 }
   0xe   : > { %p225_p9 = scmp.lt.s32.totalorder %s2715_s27, 127  ;;  %s4434_s25 = smov (!%p236_p7, %s2717_s25), 127 }
   0xf   : > { %s2718_s28 = sshll.u32 %s4434_s25, 2  ;;  %248 = sbr.rel (%p245_p8) target bundleno = 22 (0x16), region = 40 }
  0x10   : > { %s4436_s27 = smov (!%p225_p9, %s2715_s27), 127  ;;  %s3630_s6 = scalar_lea.vmem %s4422_s4, %s2718_s28 }
  0x11   : > { %s3326_s29 = smul.u32 12, %s4436_s27 }
  0x13   : > { %s3635_s9 = scalar_lea.vmem %s4418_s0, %s3326_s29 }
  0x14   : > { %v3557_v0 = vmov 0.0  }
  0x15   : > { %249 = vst [vmem:[#allocation3] sm:$0x1] %v3557_v0  ;;  %250 = vst [vmem:[#allocation4] sm:$0x1] %v3557_v0 }
  0x16 PF: > { %p2719_p10 = scmp.ne.s32.totalorder %s3543_s16, 0 }
  0x18   : > { %253 = sbr.rel (%p2719_p10) target bundleno = 528 (0x210), region = 44 }
  0x1d   : > { %v3369_v1 = vld [vmem:[%s4419_s1 + $0x38] sm:$0xff]   ;;  %v3558_v2 = vmov 0   ;;  %v3370_v3 = vld [vmem:[%s4419_s1 + $0x30] sm:$0xff]   ;;  %v3371_v4 = vld [vmem:[%s4419_s1 + $0x28] sm:$0xff]   ;;  %vm1006_vm0 = vcmask 261120  }
  0x1e   : > { %1103 = vmatprep.subr.bf16.mxu0 %v3558_v2  ;;  %3294 = vmatprep.subr.bf16.mxu1 %v3558_v2  ;;  %v3372_v5 = vld [vmem:[%s4419_s1 + $0x20] sm:$0xff]   ;;  %v3373_v6 = vld [vmem:[%s4419_s1 + $0x18] sm:$0xff]   ;;  %v3374_v8 = vld [vmem:[%s4419_s1 + $0x10] sm:$0xff]  }
  0x1f   : > { %1104 = vmatpush1.bf16.msra.mxu0 %v3369_v1  ;;  %3310 = vmatpush1.bf16.msra.mxu1 %v3369_v1  ;;  %v3387_v7 = vld [vmem:[%s3635_s9 + $0x4] ss:$12 sps:$4 sm:$0xff]   ;;  %v3375_v10 = vld [vmem:[%s4419_s1 + $0x8] sm:$0xff]   ;;  %v3377_v12 = vld [vmem:[%s4419_s1 + $0x78] sm:$0xff]  }
  0x20   : > { %1105 = vmatprep.subr.bf16.mxu0 %v3558_v2  ;;  %3295 = vmatprep.subr.bf16.mxu1 %v3558_v2  ;;  %v3390_v9 = vld [vmem:[%s3635_s9 + $0x244] ss:$12 sps:$4 sm:$0xff]   ;;  %v3379_v14 = vld [vmem:[%s4419_s1 + $0x68] sm:$0xff]   ;;  %v3381_v16 = vld [vmem:[%s4419_s1 + $0x58] sm:$0xff]  }
  0x21   : > { %1135 = vmatprep.mubr.bf16.mxu0 %v3387_v7  ;;  %1327 = vmatprep.mubr.bf16.mxu1 %v3390_v9  ;;  %v3376_v11 = vld [vmem:[%s4419_s1] sm:$0xff]   ;;  %v3378_v13 = vld [vmem:[%s4419_s1 + $0x70] sm:$0xff]   ;;  %v3383_v18 = vld [vmem:[%s4419_s1 + $0x48] sm:$0xff]  }
  0x22   : > { %v3380_v15 = vld [vmem:[%s4419_s1 + $0x60] sm:$0xff]   ;;  %v3382_v17 = vld [vmem:[%s4419_s1 + $0x50] sm:$0xff]   ;;  %v3409_v20 = vld [vmem:[%s4419_s1 + $0x88] sm:$0xff]  }
  0x23   : > { %1106 = vmatpush1.bf16.msra.mxu0 %v3370_v3  ;;  %3311 = vmatpush1.bf16.msra.mxu1 %v3370_v3  ;;  %v3384_v19 = vld [vmem:[%s4419_s1 + $0x40] sm:$0xff]   ;;  %v3391_v23 = vld [vmem:[%s3635_s9 + $0x1c] ss:$12 sps:$4 sm:$0xff]   ;;  %v3403_v32 = vld [vmem:[%s3635_s9 + $0x4c] ss:$12 sps:$4 sm:$0xff]  }
  0x24   : > { %1107 = vmatprep.subr.bf16.mxu0 %v3558_v2  ;;  %3296 = vmatprep.subr.bf16.mxu1 %v3558_v2  ;;  %v3385_v21 = vld [vmem:[%s3635_s9] ss:$12 sps:$4 sm:$0xff]   ;;  %v3393_v24 = vld [vmem:[%s3635_s9 + $0x25c] ss:$12 sps:$4 sm:$0xff]   ;;  %v3395_v26 = vld [vmem:[%s3635_s9 + $0x18] ss:$12 sps:$4 sm:$0xff]  }
  0x25   : > { %v3388_v22 = vld [vmem:[%s3635_s9 + $0x240] ss:$12 sps:$4 sm:$0xff]   ;;  %v3396_v27 = vld [vmem:[%s3635_s9 + $0x258] ss:$12 sps:$4 sm:$0xff]   ;;  %v3401_v30 = vld [vmem:[%s3635_s9 + $0x30] ss:$12 sps:$4 sm:$0xff]  }
  0x26   : > { %v3434_v25 = vld [vmem:[%s4419_s1 + $0x80] sm:$0xff]   ;;  %v3402_v31 = vld [vmem:[%s3635_s9 + $0x270] ss:$12 sps:$4 sm:$0xff]   ;;  %v3405_v33 = vld [vmem:[%s3635_s9 + $0x28c] ss:$12 sps:$4 sm:$0xff]  }
  0x27   : > { %1108 = vmatpush1.bf16.msra.mxu0 %v3371_v4  ;;  %3312 = vmatpush1.bf16.msra.mxu1 %v3371_v4  ;;  %v3397_v28 = vld [vmem:[%s3635_s9 + $0x34] ss:$12 sps:$4 sm:$0xff]   ;;  %v3410_v36 = vld [vmem:[%s3635_s9 + $0x64] ss:$12 sps:$4 sm:$0xff]   ;;  %v3416_v40 = vld [vmem:[%s3635_s9 + $0x7c] ss:$12 sps:$4 sm:$0xff]  }
  0x28   : > { %1109 = vmatprep.subr.bf16.mxu0 %v3558_v2  ;;  %3297 = vmatprep.subr.bf16.mxu1 %v3558_v2  ;;  %v3399_v29 = vld [vmem:[%s3635_s9 + $0x274] ss:$12 sps:$4 sm:$0xff]   ;;  %v3412_v37 = vld [vmem:[%s3635_s9 + $0x2a4] ss:$12 sps:$4 sm:$0xff]   ;;  %v3418_v41 = vld [vmem:[%s3635_s9 + $0x2bc] ss:$12 sps:$4 sm:$0xff]  }
  0x29   : > { %v3407_v34 = vld [vmem:[%s3635_s9 + $0x48] ss:$12 sps:$4 sm:$0xff]   ;;  %v3414_v38 = vld [vmem:[%s3635_s9 + $0x60] ss:$12 sps:$4 sm:$0xff]   ;;  %v3420_v42 = vld [vmem:[%s3635_s9 + $0x78] ss:$12 sps:$4 sm:$0xff]  }
  0x2a   : > { %v3408_v35 = vld [vmem:[%s3635_s9 + $0x288] ss:$12 sps:$4 sm:$0xff]   ;;  %v3415_v39 = vld [vmem:[%s3635_s9 + $0x2a0] ss:$12 sps:$4 sm:$0xff]   ;;  %v3421_v43 = vld [vmem:[%s3635_s9 + $0x2b8] ss:$12 sps:$4 sm:$0xff]  }
  0x2b   : > { %1110 = vmatpush1.bf16.msra.mxu0 %v3372_v5  ;;  %3313 = vmatpush1.bf16.msra.mxu1 %v3372_v5  ;;  %v3422_v44 = vld [vmem:[%s3635_s9 + $0x94] ss:$12 sps:$4 sm:$0xff]   ;;  %v3426_v46 = vld [vmem:[%s3635_s9 + $0x90] ss:$12 sps:$4 sm:$0xff]   ;;  %v3428_v48 = vld [vmem:[%s3635_s9 + $0xac] ss:$12 sps:$4 sm:$0xff]  }
  0x2c   : > { %1111 = vmatprep.subr.bf16.mxu0 %v3558_v2  ;;  %3298 = vmatprep.subr.bf16.mxu1 %v3558_v2  ;;  %v3424_v45 = vld [vmem:[%s3635_s9 + $0x2d4] ss:$12 sps:$4 sm:$0xff]   ;;  %v3427_v47 = vld [vmem:[%s3635_s9 + $0x2d0] ss:$12 sps:$4 sm:$0xff]   ;;  %v3430_v49 = vld [vmem:[%s3635_s9 + $0x2ec] ss:$12 sps:$4 sm:$0xff]  }
  0x2d   : > { %v3432_v50 = vld [vmem:[%s3635_s9 + $0xa8] ss:$12 sps:$4 sm:$0xff]   ;;  %v3435_v52 = vld [vmem:[%s3635_s9 + $0xc4] ss:$12 sps:$4 sm:$0xff]   ;;  %v3438_v54 = vld [vmem:[%s3635_s9 + $0xc0] ss:$12 sps:$4 sm:$0xff]  }
  0x2e   : > { %v3433_v51 = vld [vmem:[%s3635_s9 + $0x2e8] ss:$12 sps:$4 sm:$0xff]   ;;  %v3439_v55 = vld [vmem:[%s3635_s9 + $0x20] ss:$12 sps:$4 sm:$0xff]   ;;  %v3442_v57 = vld [vmem:[%s3635_s9 + $0x38] ss:$12 sps:$4 sm:$0xff]  }
  0x2f   : > { %1112 = vmatpush1.bf16.msra.mxu0 %v3373_v6  ;;  %3314 = vmatpush1.bf16.msra.mxu1 %v3373_v6  ;;  %v3437_v53 = vld [vmem:[%s3635_s9 + $0x8] ss:$12 sps:$4 sm:$0xff]   ;;  %v3443_v58 = vld [vmem:[%s3635_s9 + $0xd8] ss:$12 sps:$4 sm:$0xff]   ;;  %v3444_v59 = vld [vmem:[%s3635_s9 + $0x50] ss:$12 sps:$4 sm:$0xff]  }
  0x30   : > { %1113 = vmatprep.subr.bf16.mxu0 %v3558_v2  ;;  %3299 = vmatprep.subr.bf16.mxu1 %v3558_v2  ;;  %v3440_v56 = vld [vmem:[%s3635_s9 + $0xdc] ss:$12 sps:$4 sm:$0xff]   ;;  %v3445_v60 = vld [vmem:[%s3635_s9 + $0xf4] ss:$12 sps:$4 sm:$0xff]   ;;  %v3450_v0 = vld [vmem:[%s3635_s9 + $0x10c] ss:$12 sps:$4 sm:$0xff]  }
  0x31   : > { %v3447_v61 = vld [vmem:[%s3635_s9 + $0x68] ss:$12 sps:$4 sm:$0xff]   ;;  %v3448_v62 = vld [vmem:[%s3635_s9 + $0xf0] ss:$12 sps:$4 sm:$0xff]   ;;  %v3449_v63 = vld [vmem:[%s3635_s9 + $0x80] ss:$12 sps:$4 sm:$0xff]  }
  0x32   : > { %v3452_v1 = vld [vmem:[%s3635_s9 + $0x98] ss:$12 sps:$4 sm:$0xff]   ;;  %v3454_v3 = vld [vmem:[%s3635_s9 + $0xb0] ss:$12 sps:$4 sm:$0xff]   ;;  %v3457_v5 = vld [vmem:[%s3635_s9 + $0xc8] ss:$12 sps:$4 sm:$0xff]  }
  0x33   : > { %1114 = vmatpush1.bf16.msra.mxu0 %v3374_v8  ;;  %3315 = vmatpush1.bf16.msra.mxu1 %v3374_v8  ;;  %v3455_v4 = vld [vmem:[%s3635_s9 + $0x124] ss:$12 sps:$4 sm:$0xff]   ;;  %v3458_v6 = vld [vmem:[%s3635_s9 + $0x120] ss:$12 sps:$4 sm:$0xff]   ;;  %v3460_v8 = vld [vmem:[%s3635_s9 + $0x13c] ss:$12 sps:$4 sm:$0xff]  }
  0x34   : > { %1115 = vmatprep.subr.bf16.mxu0 %v3558_v2  ;;  %3300 = vmatprep.subr.bf16.mxu1 %v3558_v2  ;;  %v3459_v7 = vld [vmem:[%s3635_s9 + $0xe0] ss:$12 sps:$4 sm:$0xff]   ;;  %v3462_v9 = vld [vmem:[%s3635_s9 + $0xf8] ss:$12 sps:$4 sm:$0xff]  }
  0x37   : > { %1116 = vmatpush1.bf16.msra.mxu0 %v3375_v10  ;;  %3316 = vmatpush1.bf16.msra.mxu1 %v3375_v10  ;;  %v3463_v10 = vld [vmem:[%s3635_s9 + $0x138] ss:$12 sps:$4 sm:$0xff]  }
  0x38   : > { %1117 = vmatprep.subr.bf16.mxu0 %v3558_v2  ;;  %3301 = vmatprep.subr.bf16.mxu1 %v3558_v2 }
  0x3b   : > { %1118 = vmatpush1.bf16.msra.mxu0 %v3376_v11  ;;  %3317 = vmatpush1.bf16.msra.mxu1 %v3376_v11  ;;  %v3464_v11 = vld [vmem:[%s3635_s9 + $0x110] ss:$12 sps:$4 sm:$0xff]  }
  0x3c   : > { %1119 = vmatprep.subr.bf16.mxu0 %v3558_v2  ;;  %3302 = vmatprep.subr.bf16.mxu1 %v3558_v2 }
  0x3f   : > { %1120 = vmatpush2.bf16.msra.mxu0 %v3377_v12  ;;  %3318 = vmatpush2.bf16.msra.mxu1 %v3377_v12  ;;  %v3465_v12 = vld [vmem:[%s3635_s9 + $0x154] ss:$12 sps:$4 sm:$0xff]  }
  0x40   : > { %1121 = vmatprep.subr.bf16.mxu0 %v3558_v2  ;;  %3303 = vmatprep.subr.bf16.mxu1 %v3558_v2 }
  0x43   : > { %1122 = vmatpush2.bf16.msra.mxu0 %v3378_v13  ;;  %3319 = vmatpush2.bf16.msra.mxu1 %v3378_v13  ;;  %v3467_v13 = vld [vmem:[%s3635_s9 + $0x128] ss:$12 sps:$4 sm:$0xff]  }
  0x44   : > { %1123 = vmatprep.subr.bf16.mxu0 %v3558_v2  ;;  %3304 = vmatprep.subr.bf16.mxu1 %v3558_v2 }
  0x47   : > { %1124 = vmatpush2.bf16.msra.mxu0 %v3379_v14  ;;  %3320 = vmatpush2.bf16.msra.mxu1 %v3379_v14  ;;  %v3468_v14 = vld [vmem:[%s3635_s9 + $0x150] ss:$12 sps:$4 sm:$0xff]  }
  0x48   : > { %1125 = vmatprep.subr.bf16.mxu0 %v3558_v2  ;;  %3305 = vmatprep.subr.bf16.mxu1 %v3558_v2 }
  0x4b   : > { %1126 = vmatpush2.bf16.msra.mxu0 %v3380_v15  ;;  %3321 = vmatpush2.bf16.msra.mxu1 %v3380_v15  ;;  %v3469_v15 = vld [vmem:[%s3635_s9 + $0x140] ss:$12 sps:$4 sm:$0xff]  }
  0x4c   : > { %1127 = vmatprep.subr.bf16.mxu0 %v3558_v2  ;;  %3306 = vmatprep.subr.bf16.mxu1 %v3558_v2 }
  0x4f   : > { %1128 = vmatpush2.bf16.msra.mxu0 %v3381_v16  ;;  %3322 = vmatpush2.bf16.msra.mxu1 %v3381_v16  ;;  %v3470_v16 = vld [vmem:[%s3635_s9 + $0x16c] ss:$12 sps:$4 sm:$0xff]  }
  0x50   : > { %1129 = vmatprep.subr.bf16.mxu0 %v3558_v2  ;;  %3307 = vmatprep.subr.bf16.mxu1 %v3558_v2 }
  0x53   : > { %1130 = vmatpush2.bf16.msra.mxu0 %v3382_v17  ;;  %3323 = vmatpush2.bf16.msra.mxu1 %v3382_v17  ;;  %v3472_v17 = vld [vmem:[%s3635_s9 + $0x158] ss:$12 sps:$4 sm:$0xff]  }
  0x54   : > { %1131 = vmatprep.subr.bf16.mxu0 %v3558_v2  ;;  %3308 = vmatprep.subr.bf16.mxu1 %v3558_v2 }
  0x57   : > { %1132 = vmatpush2.bf16.msra.mxu0 %v3383_v18  ;;  %3324 = vmatpush2.bf16.msra.mxu1 %v3383_v18  ;;  %v3473_v18 = vld [vmem:[%s3635_s9 + $0x168] ss:$12 sps:$4 sm:$0xff]  }
  0x58   : > { %1133 = vmatprep.subr.bf16.mxu0 %v3558_v2  ;;  %3309 = vmatprep.subr.bf16.mxu1 %v3558_v2  ;;  %v3453_v2 = vld [vmem:[%s3635_s9 + $0x108] ss:$12 sps:$4 sm:$0xff]  }
  0x5b   : > { %1134 = vmatpush2.bf16.msra.mxu0 %v3384_v19  ;;  %3325 = vmatpush2.bf16.msra.mxu1 %v3384_v19  ;;  %v3474_v19 = vld [vmem:[%s3635_s9 + $0x170] ss:$12 sps:$4 sm:$0xff]  }
  0x5c   : > { %3226 = vmatprep.subr.bf16.mxu1 %v3409_v20 }
  0x5e   : > { %1136 = vmatmul.mubr.bf16.vlgmr.msra.gmra.mxu0 %v3385_v21  ;;  %1328 = vmatmul.mubr.bf16.vlgmr.msra.gmra.mxu1 %v3388_v22  ;;  %v3477_v21 = vld [vmem:[%s3635_s9 + $0x188] ss:$12 sps:$4 sm:$0xff]   ;;  %v3478_v22 = vld [vmem:[%s3635_s9 + $0x180] ss:$12 sps:$4 sm:$0xff]  }
  0x5f   : > { %1143 = vmatprep.mubr.bf16.mxu0 %v3391_v23  ;;  %1335 = vmatprep.mubr.bf16.mxu1 %v3393_v24  ;;  %v3479_v23 = vld [vmem:[%s3635_s9 + $0x1a0] ss:$12 sps:$4 sm:$0xff]   ;;  %v3480_v24 = vld [vmem:[%s3635_s9 + $0x19c] ss:$12 sps:$4 sm:$0xff]  }
  0x60   : > { %3227 = vmatpush3.bf16.msra.mxu1 %v3409_v20  ;;  %v3475_v20 = vld [vmem:[%s3635_s9 + $0x184] ss:$12 sps:$4 sm:$0xff]  }
  0x61   : > { %3228 = vmatprep.subr.bf16.mxu1 %v3434_v25 }
  0x64   : > { %3229 = vmatpush3.bf16.msra.mxu1 %v3434_v25  ;;  %v3482_v25 = vld [vmem:[%s3635_s9 + $0x1b8] ss:$12 sps:$4 sm:$0xff]  }
  0x66   : > { %1144 = vmatmul.mubr.bf16.gmra.mxu0 %v3395_v26  ;;  %1336 = vmatmul.mubr.bf16.gmra.mxu1 %v3396_v27  ;;  %v3483_v26 = vld [vmem:[%s3635_s9 + $0x198] ss:$12 sps:$4 sm:$0xff]   ;;  %v3484_v27 = vld [vmem:[%s3635_s9 + $0x1d0] ss:$12 sps:$4 sm:$0xff]  }
  0x67   : > { %1151 = vmatprep.mubr.bf16.mxu0 %v3397_v28  ;;  %1343 = vmatprep.mubr.bf16.mxu1 %v3399_v29  ;;  %v3485_v28 = vld [vmem:[%s3635_s9 + $0x1b4] ss:$12 sps:$4 sm:$0xff]  }
  0x68   : > { %v3487_v29 = vld [vmem:[%s3635_s9 + $0x1e8] ss:$12 sps:$4 sm:$0xff]  }
  0x6e   : > { %1152 = vmatmul.mubr.bf16.gmra.mxu0 %v3401_v30  ;;  %1344 = vmatmul.mubr.bf16.gmra.mxu1 %v3402_v31  ;;  %v3488_v30 = vld [vmem:[%s3635_s9 + $0x1b0] ss:$12 sps:$4 sm:$0xff]   ;;  %v3489_v31 = vld [vmem:[%s3635_s9 + $0x200] ss:$12 sps:$4 sm:$0xff]  }
  0x6f   : > { %1159 = vmatprep.mubr.bf16.mxu0 %v3403_v32  ;;  %1351 = vmatprep.mubr.bf16.mxu1 %v3405_v33  ;;  %v3490_v32 = vld [vmem:[%s3635_s9 + $0x1cc] ss:$12 sps:$4 sm:$0xff]  }
  0x70   : > { %v3492_v33 = vld [vmem:[%s3635_s9 + $0x218] ss:$12 sps:$4 sm:$0xff]  }
  0x76   : > { %1160 = vmatmul.mubr.bf16.gmra.mxu0 %v3407_v34  ;;  %1352 = vmatmul.mubr.bf16.gmra.mxu1 %v3408_v35  ;;  %v3493_v34 = vld [vmem:[%s3635_s9 + $0x1c8] ss:$12 sps:$4 sm:$0xff]   ;;  %v3494_v35 = vld [vmem:[%s3635_s9 + $0x230] ss:$12 sps:$4 sm:$0xff]  }
  0x77   : > { %1167 = vmatprep.mubr.bf16.mxu0 %v3410_v36  ;;  %1359 = vmatprep.mubr.bf16.mxu1 %v3412_v37  ;;  %v3495_v36 = vld [vmem:[%s3635_s9 + $0x1e4] ss:$12 sps:$4 sm:$0xff]   ;;  %v3497_v37 = vld [vmem:[%s3635_s9 + $0x248] ss:$12 sps:$4 sm:$0xff]  }
  0x7e   : > { %1168 = vmatmul.mubr.bf16.gmra.mxu0 %v3414_v38  ;;  %1360 = vmatmul.mubr.bf16.gmra.mxu1 %v3415_v39  ;;  %v3498_v38 = vld [vmem:[%s3635_s9 + $0x1e0] ss:$12 sps:$4 sm:$0xff]  }
  0x7f   : > { %1175 = vmatprep.mubr.bf16.mxu0 %v3416_v40  ;;  %1367 = vmatprep.mubr.bf16.mxu1 %v3418_v41  ;;  %v3499_v39 = vld [vmem:[%s3635_s9 + $0x260] ss:$12 sps:$4 sm:$0xff]   ;;  %v3500_v40 = vld [vmem:[%s3635_s9 + $0x1fc] ss:$12 sps:$4 sm:$0xff]   ;;  %v3502_v41 = vld [vmem:[%s3635_s9 + $0x278] ss:$12 sps:$4 sm:$0xff]  }
  0x86   : > { %1176 = vmatmul.mubr.bf16.gmra.mxu0 %v3420_v42  ;;  %1368 = vmatmul.mubr.bf16.gmra.mxu1 %v3421_v43  ;;  %v3503_v42 = vld [vmem:[%s3635_s9 + $0x1f8] ss:$12 sps:$4 sm:$0xff]   ;;  %v3504_v43 = vld [vmem:[%s3635_s9 + $0x290] ss:$12 sps:$4 sm:$0xff]  }
  0x87   : > { %1183 = vmatprep.mubr.bf16.mxu0 %v3422_v44  ;;  %1375 = vmatprep.mubr.bf16.mxu1 %v3424_v45  ;;  %v3505_v44 = vld [vmem:[%s3635_s9 + $0x214] ss:$12 sps:$4 sm:$0xff]  }
  0x88   : > { %v3507_v45 = vld [vmem:[%s3635_s9 + $0x2a8] ss:$12 sps:$4 sm:$0xff]  }
  0x8e   : > { %1184 = vmatmul.mubr.bf16.gmra.mxu0 %v3426_v46  ;;  %1376 = vmatmul.mubr.bf16.gmra.mxu1 %v3427_v47  ;;  %v3508_v46 = vld [vmem:[%s3635_s9 + $0x210] ss:$12 sps:$4 sm:$0xff]   ;;  %v3509_v47 = vld [vmem:[%s3635_s9 + $0x2c0] ss:$12 sps:$4 sm:$0xff]  }
  0x8f   : > { %1191 = vmatprep.mubr.bf16.mxu0 %v3428_v48  ;;  %1383 = vmatprep.mubr.bf16.mxu1 %v3430_v49  ;;  %v3510_v48 = vld [vmem:[%s3635_s9 + $0x22c] ss:$12 sps:$4 sm:$0xff]  }
  0x90   : > { %v3512_v49 = vld [vmem:[%s3635_s9 + $0x2d8] ss:$12 sps:$4 sm:$0xff]  }
  0x96   : > { %1192 = vmatmul.mubr.bf16.gmra.mxu0 %v3432_v50  ;;  %1384 = vmatmul.mubr.bf16.gmra.mxu1 %v3433_v51  ;;  %v3513_v50 = vld [vmem:[%s3635_s9 + $0x228] ss:$12 sps:$4 sm:$0xff]   ;;  %v3514_v51 = vld [vmem:[%s3635_s9 + $0x2f0] ss:$12 sps:$4 sm:$0xff]   ;;  %s2866_s9 = sshll.u32 %s3539_s15, 9 }
  0x97   : > { %1199 = vmatprep.mubr.bf16.mxu0 %v3435_v52  ;;  %3230 = vmatprep.mubr.msk.bf16.mxu1 %vm1006_vm0, %v3437_v53  ;;  %s3917_s12 = scalar_lea.vmem [#allocation2], %s2866_s9 }
  0x9e   : > { %1200 = vmatmul.mubr.bf16.gmra.mxu0 %v3438_v54  ;;  %3231 = vmatmul.mubr.msk.bf16.vlgmr.msra.gmra.mxu1 %vm1006_vm0, %v3439_v55 }
  0x9f   : > { %1207 = vmatprep.mubr.bf16.mxu0 %v3440_v56  ;;  %3234 = vmatprep.mubr.msk.bf16.mxu1 %vm1006_vm0, %v3442_v57 }
  0xa6   : > { %1208 = vmatmul.mubr.bf16.gmra.mxu0 %v3443_v58  ;;  %3235 = vmatmul.mubr.msk.bf16.gmra.mxu1 %vm1006_vm0, %v3444_v59 }
  0xa7   : > { %1215 = vmatprep.mubr.bf16.mxu0 %v3445_v60  ;;  %3238 = vmatprep.mubr.msk.bf16.mxu1 %vm1006_vm0, %v3447_v61 }
  0xae   : > { %1216 = vmatmul.mubr.bf16.gmra.mxu0 %v3448_v62  ;;  %3239 = vmatmul.mubr.msk.bf16.gmra.mxu1 %vm1006_vm0, %v3449_v63 }
  0xaf   : > { %1223 = vmatprep.mubr.bf16.mxu0 %v3450_v0  ;;  %3242 = vmatprep.mubr.msk.bf16.mxu1 %vm1006_vm0, %v3452_v1 }
  0xb6   : > { %1224 = vmatmul.mubr.bf16.gmra.mxu0 %v3453_v2  ;;  %3243 = vmatmul.mubr.msk.bf16.gmra.mxu1 %vm1006_vm0, %v3454_v3 }
  0xb7   : > { %1231 = vmatprep.mubr.bf16.mxu0 %v3455_v4  ;;  %3246 = vmatprep.mubr.msk.bf16.mxu1 %vm1006_vm0, %v3457_v5 }
  0xbe   : > { %1232 = vmatmul.mubr.bf16.gmra.mxu0 %v3458_v6  ;;  %3247 = vmatmul.mubr.msk.bf16.gmra.mxu1 %vm1006_vm0, %v3459_v7 }
  0xbf   : > { %1239 = vmatprep.mubr.bf16.mxu0 %v3460_v8  ;;  %3250 = vmatprep.mubr.msk.bf16.mxu1 %vm1006_vm0, %v3462_v9 }
  0xc6   : > { %1240 = vmatmul.mubr.bf16.gmra.mxu0 %v3463_v10  ;;  %3251 = vmatmul.mubr.msk.bf16.gmra.mxu1 %vm1006_vm0, %v3464_v11 }
  0xc7   : > { %1247 = vmatprep.mubr.bf16.mxu0 %v3465_v12  ;;  %3254 = vmatprep.mubr.msk.bf16.mxu1 %vm1006_vm0, %v3467_v13 }
  0xce   : > { %1248 = vmatmul.mubr.bf16.gmra.mxu0 %v3468_v14  ;;  %3255 = vmatmul.mubr.msk.bf16.gmra.mxu1 %vm1006_vm0, %v3469_v15 }
  0xcf   : > { %1255 = vmatprep.mubr.bf16.mxu0 %v3470_v16  ;;  %3258 = vmatprep.mubr.msk.bf16.mxu1 %vm1006_vm0, %v3472_v17 }
  0xd6   : > { %1256 = vmatmul.mubr.bf16.gmra.mxu0 %v3473_v18  ;;  %3259 = vmatmul.mubr.msk.bf16.gmra.mxu1 %vm1006_vm0, %v3474_v19 }
  0xd7   : > { %1263 = vmatprep.mubr.bf16.mxu0 %v3475_v20  ;;  %3262 = vmatprep.mubr.msk.bf16.mxu1 %vm1006_vm0, %v3477_v21 }
  0xde   : > { %1264 = vmatmul.mubr.bf16.gmra.mxu0 %v3478_v22  ;;  %3263 = vmatmul.mubr.msk.bf16.gmra.mxu1 %vm1006_vm0, %v3479_v23 }
  0xdf   : > { %1271 = vmatprep.mubr.bf16.mxu0 %v3480_v24  ;;  %3266 = vmatprep.mubr.msk.bf16.mxu1 %vm1006_vm0, %v3482_v25 }
  0xe6   : > { %1272 = vmatmul.mubr.bf16.gmra.mxu0 %v3483_v26  ;;  %3267 = vmatmul.mubr.msk.bf16.gmra.mxu1 %vm1006_vm0, %v3484_v27 }
  0xe7   : > { %1279 = vmatprep.mubr.bf16.mxu0 %v3485_v28  ;;  %3270 = vmatprep.mubr.msk.bf16.mxu1 %vm1006_vm0, %v3487_v29 }
  0xee   : > { %1280 = vmatmul.mubr.bf16.gmra.mxu0 %v3488_v30  ;;  %3271 = vmatmul.mubr.msk.bf16.gmra.mxu1 %vm1006_vm0, %v3489_v31 }
  0xef   : > { %1287 = vmatprep.mubr.bf16.mxu0 %v3490_v32  ;;  %3274 = vmatprep.mubr.msk.bf16.mxu1 %vm1006_vm0, %v3492_v33 }
  0xf6   : > { %1288 = vmatmul.mubr.bf16.gmra.mxu0 %v3493_v34  ;;  %3275 = vmatmul.mubr.msk.bf16.gmra.mxu1 %vm1006_vm0, %v3494_v35 }
  0xf7   : > { %1295 = vmatprep.mubr.bf16.mxu0 %v3495_v36  ;;  %3278 = vmatprep.mubr.msk.bf16.mxu1 %vm1006_vm0, %v3497_v37 }
  0xfe   : > { %1296 = vmatmul.mubr.bf16.gmra.mxu0 %v3498_v38  ;;  %3279 = vmatmul.mubr.msk.bf16.gmra.mxu1 %vm1006_vm0, %v3499_v39 }
  0xff   : > { %1303 = vmatprep.mubr.bf16.mxu0 %v3500_v40  ;;  %3282 = vmatprep.mubr.msk.bf16.mxu1 %vm1006_vm0, %v3502_v41 }
 0x106   : > { %1304 = vmatmul.mubr.bf16.gmra.mxu0 %v3503_v42  ;;  %3283 = vmatmul.mubr.msk.bf16.gmra.mxu1 %vm1006_vm0, %v3504_v43 }
 0x107   : > { %1311 = vmatprep.mubr.bf16.mxu0 %v3505_v44  ;;  %3286 = vmatprep.mubr.msk.bf16.mxu1 %vm1006_vm0, %v3507_v45 }
 0x10e   : > { %1312 = vmatmul.mubr.bf16.gmra.mxu0 %v3508_v46  ;;  %3287 = vmatmul.mubr.msk.bf16.gmra.mxu1 %vm1006_vm0, %v3509_v47 }
 0x10f   : > { %1319 = vmatprep.mubr.bf16.mxu0 %v3510_v48  ;;  %3290 = vmatprep.mubr.msk.bf16.mxu1 %vm1006_vm0, %v3512_v49 }
 0x116   : > { %1320 = vmatmul.mubr.bf16.gmra.mxu0 %v3513_v50  ;;  %3291 = vmatmul.mubr.msk.bf16.gmra.mxu1 %vm1006_vm0, %v3514_v51 }
 0x11e   : > { %v3852_v52 = vpop.f32.mrf.mxu0  ;;  %v3854_v53 = vpop.f32.mrf.mxu1 }
 0x120   : > { %v1139_v54 = vpop.f32.mrf.mxu0  ;;  %v1331_v55 = vpop.f32.mrf.mxu1 }
 0x122   : > { %v3856_v56 = vpop.f32.mrf.mxu0  ;;  %v3858_v57 = vpop.f32.mrf.mxu1 }
 0x124   : > { %v1142_v58 = vpop.f32.mrf.mxu0  ;;  %v1334_v59 = vpop.f32.mrf.mxu1 }
 0x126   : > { %v1145_v60 = vpop.f32.mrf.mxu0  ;;  %v3860_v61 = vpop.f32.mrf.mxu1 }
 0x128   : > { %v1147_v62 = vpop.f32.mrf.mxu0  ;;  %v1339_v63 = vpop.f32.mrf.mxu1 }
 0x12a   : > { %v3862_v0 = vpop.f32.mrf.mxu0  ;;  %v3864_v1 = vpop.f32.mrf.mxu1 }
 0x12c   : > { %v1150_v2 = vpop.f32.mrf.mxu0  ;;  %v1342_v3 = vpop.f32.mrf.mxu1 }
 0x12e   : > { %v3866_v4 = vpop.f32.mrf.mxu0  ;;  %v3868_v5 = vpop.f32.mrf.mxu1 }
 0x130   : > { %v1155_v6 = vpop.f32.mrf.mxu0  ;;  %v1347_v7 = vpop.f32.mrf.mxu1 }
 0x132   : > { %v3870_v8 = vpop.f32.mrf.mxu0  ;;  %v3872_v9 = vpop.f32.mrf.mxu1 }
 0x134   : > { %v1158_v10 = vpop.f32.mrf.mxu0  ;;  %v1350_v11 = vpop.f32.mrf.mxu1 }
 0x136   : > { %v3874_v12 = vpop.f32.mrf.mxu0  ;;  %v3876_v13 = vpop.f32.mrf.mxu1 }
 0x138   : > { %v1163_v14 = vpop.f32.mrf.mxu0  ;;  %v1355_v15 = vpop.f32.mrf.mxu1 }
 0x13a   : > { %v3878_v16 = vpop.f32.mrf.mxu0  ;;  %v3880_v17 = vpop.f32.mrf.mxu1 }
 0x13c   : > { %v1166_v18 = vpop.f32.mrf.mxu0  ;;  %v1358_v19 = vpop.f32.mrf.mxu1 }
 0x13e   : > { %v3882_v20 = vpop.f32.mrf.mxu0  ;;  %v3884_v21 = vpop.f32.mrf.mxu1 }
 0x140   : > { %v1171_v22 = vpop.f32.mrf.mxu0  ;;  %v1363_v23 = vpop.f32.mrf.mxu1 }
 0x142   : > { %v3886_v24 = vpop.f32.mrf.mxu0  ;;  %v3888_v25 = vpop.f32.mrf.mxu1 }
 0x144   : > { %v1174_v26 = vpop.f32.mrf.mxu0  ;;  %v1366_v27 = vpop.f32.mrf.mxu1 }
 0x146   : > { %v3890_v28 = vpop.f32.mrf.mxu0  ;;  %v3892_v29 = vpop.f32.mrf.mxu1 }
 0x148   : > { %v1179_v30 = vpop.f32.mrf.mxu0  ;;  %v1371_v31 = vpop.f32.mrf.mxu1 }
 0x14a   : > { %v3894_v32 = vpop.f32.mrf.mxu0  ;;  %v3896_v33 = vpop.f32.mrf.mxu1 }
 0x14c   : > { %v1182_v34 = vpop.f32.mrf.mxu0  ;;  %v1374_v35 = vpop.f32.mrf.mxu1 }
 0x14e   : > { %v3898_v36 = vpop.f32.mrf.mxu0  ;;  %v3900_v37 = vpop.f32.mrf.mxu1 }
 0x150   : > { %v1187_v38 = vpop.f32.mrf.mxu0  ;;  %v1379_v39 = vpop.f32.mrf.mxu1 }
 0x152   : > { %v3902_v40 = vpop.f32.mrf.mxu0  ;;  %v3904_v41 = vpop.f32.mrf.mxu1 }
 0x154   : > { %v1190_v42 = vpop.f32.mrf.mxu0  ;;  %v1382_v43 = vpop.f32.mrf.mxu1 }
 0x156   : > { %v3906_v44 = vpop.f32.mrf.mxu0  ;;  %v3908_v45 = vpop.f32.mrf.mxu1 }
 0x158   : > { %v1195_v46 = vpop.f32.mrf.mxu0  ;;  %v1387_v47 = vpop.f32.mrf.mxu1 }
 0x15a   : > { %v3910_v48 = vpop.f32.mrf.mxu0  ;;  %v3912_v49 = vpop.f32.mrf.mxu1 }
 0x15c   : > { %v1198_v50 = vpop.f32.mrf.mxu0  ;;  %v1390_v51 = vpop.f32.mrf.mxu1 }
 0x15e   : > { %v3915_v54 = vpop.f32.mrf.mxu0  ;;  %v3232_v55 = vpop.f32.mrf.mxu1 }
 0x15f   : > { %v1435_v58 = vadd.f32 %v3232_v55, %v1145_v60 }
 0x160   : > { %v1203_v59 = vpop.f32.mrf.mxu0  ;;  %v1426_v62 = vpop.f32.mrf.mxu1 }
 0x161   : > { %1685 = vst [vmem:[%s3917_s12 + $0x10] sm:$0xff] %v1435_v58  ;;  %v1427_v63 = vadd.f32 %v1426_v62, %v3852_v52  ;;  %v1822_v26 = vmul.f32 %v1435_v58, %v1435_v58 }
 0x162   : > { %v3921_v2 = vpop.f32.mrf.mxu0  ;;  %v3233_v3 = vpop.f32.mrf.mxu1 }
 0x163   : > { %1683 = vst [vmem:[%s3917_s12] sm:$0xff] %v1427_v63  ;;  %v1438_v6 = vadd.f32 %v3233_v3, %v3862_v0  ;;  %v1820_v15 = vmul.f32 %v1427_v63, %v1427_v63 }
 0x164   : > { %v1206_v7 = vpop.f32.mrf.mxu0  ;;  %v1429_v60 = vpop.f32.mrf.mxu1 }
 0x165   : > { %1686 = vst [vmem:[%s3917_s12 + $0x18] sm:$0xff] %v1438_v6  ;;  %v1430_v10 = vadd.f32 %v1429_v60, %v3856_v56  ;;  %v1823_v34 = vmul.f32 %v1438_v6, %v1438_v6 }
 0x166   : > { %v3927_v11 = vpop.f32.mrf.mxu0  ;;  %v3236_v14 = vpop.f32.mrf.mxu1 }
 0x167   : > { %1684 = vst [vmem:[%s3917_s12 + $0x8] sm:$0xff] %v1430_v10  ;;  %v1748_v18 = vadd.f32 %v1430_v10, %v1427_v63  ;;  %v1821_v52 = vmul.f32 %v1430_v10, %v1430_v10  ;;  %v1451_v19 = vadd.f32 %v3236_v14, %v3874_v12 }
 0x168   : > { %v1211_v22 = vpop.f32.mrf.mxu0  ;;  %v1442_v23 = vpop.f32.mrf.mxu1 }
 0x169   : > { %v1749_v0 = vadd.f32 %v1748_v18, %v1435_v58  ;;  %v1884_v27 = vadd.f32 %v1821_v52, %v1820_v15  ;;  %1689 = vst [vmem:[%s3917_s12 + $0x30] sm:$0xff] %v1451_v19  ;;  %v1443_v30 = vadd.f32 %v1442_v23, %v3866_v4  ;;  %v1826_v3 = vmul.f32 %v1451_v19, %v1451_v19 }
 0x16a   : > { %v3933_v56 = vpop.f32.mrf.mxu0  ;;  %v3237_v31 = vpop.f32.mrf.mxu1 }
 0x16b   : > { %v1885_v35 = vadd.f32 %v1884_v27, %v1822_v26  ;;  %1687 = vst [vmem:[%s3917_s12 + $0x20] sm:$0xff] %v1443_v30  ;;  %v1750_v38 = vadd.f32 %v1749_v0, %v1438_v6  ;;  %v1454_v39 = vadd.f32 %v3237_v31, %v3878_v16  ;;  %v1824_v46 = vmul.f32 %v1443_v30, %v1443_v30 }
 0x16c   : > { %v1214_v12 = vpop.f32.mrf.mxu0  ;;  %v1445_v42 = vpop.f32.mrf.mxu1 }
 0x16d   : > { %v1751_v43 = vadd.f32 %v1750_v38, %v1443_v30  ;;  %v1886_v47 = vadd.f32 %v1885_v35, %v1823_v34  ;;  %1690 = vst [vmem:[%s3917_s12 + $0x38] sm:$0xff] %v1454_v39  ;;  %v1446_v50 = vadd.f32 %v1445_v42, %v3870_v8  ;;  %v1827_v14 = vmul.f32 %v1454_v39, %v1454_v39 }
 0x16e   : > { %v3939_v4 = vpop.f32.mrf.mxu0  ;;  %v3240_v51 = vpop.f32.mrf.mxu1 }
 0x16f   : > { %v1887_v55 = vadd.f32 %v1886_v47, %v1824_v46  ;;  %1688 = vst [vmem:[%s3917_s12 + $0x28] sm:$0xff] %v1446_v50  ;;  %v1752_v58 = vadd.f32 %v1751_v43, %v1446_v50  ;;  %v1825_v59 = vmul.f32 %v1446_v50, %v1446_v50  ;;  %v1467_v62 = vadd.f32 %v3240_v51, %v3890_v28 }
 0x170   : > { %v1219_v16 = vpop.f32.mrf.mxu0  ;;  %v1458_v63 = vpop.f32.mrf.mxu1 }
 0x171   : > { %v1753_v6 = vadd.f32 %v1752_v58, %v1451_v19  ;;  %v1888_v7 = vadd.f32 %v1887_v55, %v1825_v59  ;;  %1693 = vst [vmem:[%s3917_s12 + $0x50] sm:$0xff] %v1467_v62  ;;  %v1459_v60 = vadd.f32 %v1458_v63, %v3882_v20 }
 0x172   : > { %v3945_v8 = vpop.f32.mrf.mxu0  ;;  %v3241_v10 = vpop.f32.mrf.mxu1 }
 0x173   : > { %v1889_v15 = vadd.f32 %v1888_v7, %v1826_v3  ;;  %1691 = vst [vmem:[%s3917_s12 + $0x40] sm:$0xff] %v1459_v60  ;;  %v1754_v18 = vadd.f32 %v1753_v6, %v1454_v39  ;;  %v1470_v52 = vadd.f32 %v3241_v10, %v3894_v32  ;;  %v1828_v26 = vmul.f32 %v1459_v60, %v1459_v60 }
 0x174   : > { %v1222_v28 = vpop.f32.mrf.mxu0  ;;  %v1461_v22 = vpop.f32.mrf.mxu1  ;;  %v1830_v39 = vmul.f32 %v1467_v62, %v1467_v62 }
 0x175   : > { %v1755_v23 = vadd.f32 %v1754_v18, %v1459_v60  ;;  %v1890_v19 = vadd.f32 %v1889_v15, %v1827_v14  ;;  %1694 = vst [vmem:[%s3917_s12 + $0x58] sm:$0xff] %v1470_v52  ;;  %v1462_v0 = vadd.f32 %v1461_v22, %v3886_v24  ;;  %v1831_v47 = vmul.f32 %v1470_v52, %v1470_v52 }
 0x176   : > { %v1225_v20 = vpop.f32.mrf.mxu0  ;;  %v3244_v27 = vpop.f32.mrf.mxu1 }
 0x177   : > { %v1891_v30 = vadd.f32 %v1890_v19, %v1828_v26  ;;  %1692 = vst [vmem:[%s3917_s12 + $0x48] sm:$0xff] %v1462_v0  ;;  %v1756_v31 = vadd.f32 %v1755_v23, %v1462_v0  ;;  %v1829_v34 = vmul.f32 %v1462_v0, %v1462_v0  ;;  %v1483_v35 = vadd.f32 %v3244_v27, %v3906_v44 }
 0x178   : > { %v1227_v38 = vpop.f32.mrf.mxu0  ;;  %v1474_v32 = vpop.f32.mrf.mxu1 }
 0x179   : > { %v1757_v12 = vadd.f32 %v1756_v31, %v1467_v62  ;;  %v1892_v42 = vadd.f32 %v1891_v30, %v1829_v34  ;;  %1697 = vst [vmem:[%s3917_s12 + $0x70] sm:$0xff] %v1483_v35  ;;  %v1475_v43 = vadd.f32 %v1474_v32, %v3898_v36  ;;  %v1834_v15 = vmul.f32 %v1483_v35, %v1483_v35 }
 0x17a   : > { %v1228_v46 = vpop.f32.mrf.mxu0  ;;  %v3245_v24 = vpop.f32.mrf.mxu1 }
 0x17b   : > { %v1893_v50 = vadd.f32 %v1892_v42, %v1830_v39  ;;  %1695 = vst [vmem:[%s3917_s12 + $0x60] sm:$0xff] %v1475_v43  ;;  %v1758_v51 = vadd.f32 %v1757_v12, %v1470_v52  ;;  %v1486_v55 = vadd.f32 %v3245_v24, %v3910_v48  ;;  %v1832_v16 = vmul.f32 %v1475_v43, %v1475_v43 }
 0x17c   : > { %v1230_v58 = vpop.f32.mrf.mxu0  ;;  %v1477_v44 = vpop.f32.mrf.mxu1 }
 0x17d   : > { %v1759_v59 = vadd.f32 %v1758_v51, %v1475_v43  ;;  %v1894_v62 = vadd.f32 %v1893_v50, %v1831_v47  ;;  %1698 = vst [vmem:[%s3917_s12 + $0x78] sm:$0xff] %v1486_v55  ;;  %v1478_v63 = vadd.f32 %v1477_v44, %v3902_v40  ;;  %v1835_v23 = vmul.f32 %v1486_v55, %v1486_v55 }
 0x17e   : > { %v3959_v3 = vpop.f32.mrf.mxu0  ;;  %v3248_v36 = vpop.f32.mrf.mxu1 }
 0x17f   : > { %v1895_v6 = vadd.f32 %v1894_v62, %v1832_v16  ;;  %1696 = vst [vmem:[%s3917_s12 + $0x68] sm:$0xff] %v1478_v63  ;;  %v1760_v7 = vadd.f32 %v1759_v59, %v1478_v63  ;;  %v1833_v60 = vmul.f32 %v1478_v63, %v1478_v63  ;;  %v1499_v10 = vadd.f32 %v3248_v36, %v3927_v11 }
 0x180   : > { %v1235_v48 = vpop.f32.mrf.mxu0  ;;  %v1490_v14 = vpop.f32.mrf.mxu1 }
 0x181   : > { %v1761_v18 = vadd.f32 %v1760_v7, %v1483_v35  ;;  %v1896_v52 = vadd.f32 %v1895_v6, %v1833_v60  ;;  %1701 = vst [vmem:[%s3917_s12 + $0x90] sm:$0xff] %v1499_v10  ;;  %v1491_v28 = vadd.f32 %v1490_v14, %v3915_v54 }
 0x182   : > { %v3965_v40 = vpop.f32.mrf.mxu0  ;;  %v3249_v22 = vpop.f32.mrf.mxu1 }
 0x183   : > { %v1897_v26 = vadd.f32 %v1896_v52, %v1834_v15  ;;  %1699 = vst [vmem:[%s3917_s12 + $0x80] sm:$0xff] %v1491_v28  ;;  %v1762_v19 = vadd.f32 %v1761_v18, %v1486_v55  ;;  %v1502_v0 = vadd.f32 %v3249_v22, %v3933_v56  ;;  %v1836_v31 = vmul.f32 %v1491_v28, %v1491_v28 }
 0x184   : > { %v1238_v11 = vpop.f32.mrf.mxu0  ;;  %v1493_v27 = vpop.f32.mrf.mxu1  ;;  %v1838_v56 = vmul.f32 %v1499_v10, %v1499_v10 }
 0x185   : > { %v1763_v30 = vadd.f32 %v1762_v19, %v1491_v28  ;;  %v1898_v34 = vadd.f32 %v1897_v26, %v1835_v23  ;;  %1702 = vst [vmem:[%s3917_s12 + $0x98] sm:$0xff] %v1502_v0  ;;  %v1494_v35 = vadd.f32 %v1493_v27, %v3921_v2  ;;  %v1839_v2 = vmul.f32 %v1502_v0, %v1502_v0 }
 0x186   : > { %v1241_v54 = vpop.f32.mrf.mxu0  ;;  %v3252_v38 = vpop.f32.mrf.mxu1 }
 0x187   : > { %v1899_v32 = vadd.f32 %v1898_v34, %v1836_v31  ;;  %1700 = vst [vmem:[%s3917_s12 + $0x88] sm:$0xff] %v1494_v35  ;;  %v1764_v39 = vadd.f32 %v1763_v30, %v1494_v35  ;;  %v1837_v12 = vmul.f32 %v1494_v35, %v1494_v35  ;;  %v1515_v42 = vadd.f32 %v3252_v38, %v1225_v20 }
 0x188   : > { %v1243_v43 = vpop.f32.mrf.mxu0  ;;  %v1506_v24 = vpop.f32.mrf.mxu1 }
 0x189   : > { %v1765_v47 = vadd.f32 %v1764_v39, %v1499_v10  ;;  %v1900_v50 = vadd.f32 %v1899_v32, %v1837_v12  ;;  %1705 = vst [vmem:[%s3917_s12 + $0xb0] sm:$0xff] %v1515_v42  ;;  %v1507_v51 = vadd.f32 %v1506_v24, %v3939_v4  ;;  %v1842_v22 = vmul.f32 %v1515_v42, %v1515_v42 }
 0x18a   : > { %v1244_v55 = vpop.f32.mrf.mxu0  ;;  %v3253_v58 = vpop.f32.mrf.mxu1 }
 0x18b   : > { %v1901_v44 = vadd.f32 %v1900_v50, %v1838_v56  ;;  %1703 = vst [vmem:[%s3917_s12 + $0xa0] sm:$0xff] %v1507_v51  ;;  %v1766_v59 = vadd.f32 %v1765_v47, %v1502_v0  ;;  %v1518_v16 = vadd.f32 %v3253_v58, %v1228_v46  ;;  %v1840_v36 = vmul.f32 %v1507_v51, %v1507_v51 }
 0x18c   : > { %v1246_v62 = vpop.f32.mrf.mxu0  ;;  %v1509_v63 = vpop.f32.mrf.mxu1 }
 0x18d   : > { %v1767_v20 = vadd.f32 %v1766_v59, %v1507_v51  ;;  %v1902_v6 = vadd.f32 %v1901_v44, %v1839_v2  ;;  %1706 = vst [vmem:[%s3917_s12 + $0xb8] sm:$0xff] %v1518_v16  ;;  %v1510_v7 = vadd.f32 %v1509_v63, %v3945_v8  ;;  %v1843_v31 = vmul.f32 %v1518_v16, %v1518_v16 }
 0x18e   : > { %v1249_v60 = vpop.f32.mrf.mxu0  ;;  %v3256_v4 = vpop.f32.mrf.mxu1 }
 0x18f   : > { %v1903_v10 = vadd.f32 %v1902_v6, %v1840_v36  ;;  %1704 = vst [vmem:[%s3917_s12 + $0xa8] sm:$0xff] %v1510_v7  ;;  %v1768_v48 = vadd.f32 %v1767_v20, %v1510_v7  ;;  %v1841_v14 = vmul.f32 %v1510_v7, %v1510_v7  ;;  %v1531_v15 = vadd.f32 %v3256_v4, %v1241_v54 }
 0x190   : > { %v1251_v18 = vpop.f32.mrf.mxu0  ;;  %v1522_v46 = vpop.f32.mrf.mxu1 }
 0x191   : > { %v1904_v52 = vadd.f32 %v1903_v10, %v1841_v14  ;;  %1709 = vst [vmem:[%s3917_s12 + $0xd0] sm:$0xff] %v1531_v15  ;;  %v1523_v28 = vadd.f32 %v1522_v46, %v3959_v3  ;;  %v1769_v8 = vadd.f32 %v1768_v48, %v1515_v42  ;;  %v1846_v36 = vmul.f32 %v1531_v15, %v1531_v15 }
 0x192   : > { %v1252_v23 = vpop.f32.mrf.mxu0  ;;  %v3257_v26 = vpop.f32.mrf.mxu1 }
 0x193   : > { %1707 = vst [vmem:[%s3917_s12 + $0xc0] sm:$0xff] %v1523_v28  ;;  %v1534_v19 = vadd.f32 %v3257_v26, %v1244_v55  ;;  %v1905_v0 = vadd.f32 %v1904_v52, %v1842_v22  ;;  %v1770_v54 = vadd.f32 %v1769_v8, %v1518_v16  ;;  %v1844_v42 = vmul.f32 %v1523_v28, %v1523_v28 }
 0x194   : > { %v1254_v11 = vpop.f32.mrf.mxu0  ;;  %v1525_v27 = vpop.f32.mrf.mxu1 }
 0x195   : > { %1710 = vst [vmem:[%s3917_s12 + $0xd8] sm:$0xff] %v1534_v19  ;;  %v1526_v30 = vadd.f32 %v1525_v27, %v3965_v40  ;;  %v1906_v38 = vadd.f32 %v1905_v0, %v1843_v31  ;;  %v1771_v40 = vadd.f32 %v1770_v54, %v1523_v28  ;;  %v1847_v18 = vmul.f32 %v1534_v19, %v1534_v19 }
 0x196   : > { %v1257_v34 = vpop.f32.mrf.mxu0  ;;  %v3260_v35 = vpop.f32.mrf.mxu1 }
 0x197   : > { %1708 = vst [vmem:[%s3917_s12 + $0xc8] sm:$0xff] %v1526_v30  ;;  %v3984_v3 = vadd.f32 %v3260_v35, %v1257_v34  ;;  %v1907_v47 = vadd.f32 %v1906_v38, %v1844_v42  ;;  %v1845_v50 = vmul.f32 %v1526_v30, %v1526_v30  ;;  %v1772_v59 = vadd.f32 %v1771_v40, %v1526_v30 }
 0x198   : > { %v1259_v32 = vpop.f32.mrf.mxu0  ;;  %v1538_v39 = vpop.f32.mrf.mxu1 }
 0x199   : > { %1713 = vst [vmem:[%s3917_s12 + $0xf0] sm:$0xff] %v3984_v3  ;;  %v1539_v12 = vadd.f32 %v1538_v39, %v1249_v60  ;;  %v1908_v16 = vadd.f32 %v1907_v47, %v1845_v50  ;;  %v1773_v60 = vadd.f32 %v1772_v59, %v1531_v15 }
 0x19a   : > { %v1260_v43 = vpop.f32.mrf.mxu0  ;;  %v3261_v24 = vpop.f32.mrf.mxu1 }
 0x19b   : > { %1711 = vst [vmem:[%s3917_s12 + $0xe0] sm:$0xff] %v1539_v12  ;;  %v3989_v56 = vadd.f32 %v3261_v24, %v1260_v43  ;;  %v1909_v4 = vadd.f32 %v1908_v16, %v1846_v36  ;;  %v1774_v28 = vadd.f32 %v1773_v60, %v1534_v19  ;;  %v1848_v0 = vmul.f32 %v1539_v12, %v1539_v12 }
 0x19c   : > { %v1262_v51 = vpop.f32.mrf.mxu0  ;;  %v1541_v55 = vpop.f32.mrf.mxu1 }
 0x19d   : > { %1714 = vst [vmem:[%s3917_s12 + $0xf8] sm:$0xff] %v3989_v56  ;;  %v1542_v58 = vadd.f32 %v1541_v55, %v1252_v23  ;;  %v1910_v23 = vadd.f32 %v1909_v4, %v1847_v18  ;;  %v1775_v27 = vadd.f32 %v1774_v28, %v1539_v12  ;;  %v1850_v12 = vmul.f32 %v3984_v3, %v3984_v3 }
 0x19e   : > { %v1265_v2 = vpop.f32.mrf.mxu0  ;;  %v3264_v44 = vpop.f32.mrf.mxu1 }
 0x19f   : > { %1712 = vst [vmem:[%s3917_s12 + $0xe8] sm:$0xff] %v1542_v58  ;;  %v1911_v31 = vadd.f32 %v1910_v23, %v1848_v0  ;;  %v1849_v34 = vmul.f32 %v1542_v58, %v1542_v58  ;;  %v1776_v32 = vadd.f32 %v1775_v27, %v1542_v58 }
 0x1a0   : > { %v1267_v62 = vpop.f32.mrf.mxu0  ;;  %v1554_v63 = vpop.f32.mrf.mxu1 }
 0x1a1   : > { %v1555_v20 = vadd.f32 %v1554_v63, %v1265_v2  ;;  %v1912_v42 = vadd.f32 %v1911_v31, %v1849_v34  ;;  %v1777_v50 = vadd.f32 %v1776_v32, %v3984_v3 }
 0x1a2   : > { %v1268_v6 = vpop.f32.mrf.mxu0  ;;  %v3265_v7 = vpop.f32.mrf.mxu1 }
 0x1a3   : > { %1715 = vst [vmem:[%s3917_s12 + $0x100] sm:$0xff] %v1555_v20  ;;  %v1913_v55 = vadd.f32 %v1912_v42, %v1850_v12  ;;  %v1778_v62 = vadd.f32 %v1777_v50, %v3989_v56 }
 0x1a4   : > { %v1270_v10 = vpop.f32.mrf.mxu0  ;;  %v1557_v48 = vpop.f32.mrf.mxu1 }
 0x1a5   : > { %v1558_v14 = vadd.f32 %v1557_v48, %v1268_v6  ;;  %v1779_v10 = vadd.f32 %v1778_v62, %v1555_v20 }
 0x1a6   : > { %v1273_v46 = vpop.f32.mrf.mxu0  ;;  %v3268_v52 = vpop.f32.mrf.mxu1 }
 0x1a7   : > { %1716 = vst [vmem:[%s3917_s12 + $0x108] sm:$0xff] %v1558_v14  ;;  %v3996_v22 = vadd.f32 %v3264_v44, %v1273_v46  ;;  %v1851_v44 = vmul.f32 %v3989_v56, %v3989_v56  ;;  %v1853_v46 = vmul.f32 %v1558_v14, %v1558_v14 }
 0x1a8   : > { %v1275_v26 = vpop.f32.mrf.mxu0  ;;  %v1570_v8 = vpop.f32.mrf.mxu1 }
 0x1a9   : > { %1717 = vst [vmem:[%s3917_s12 + $0x110] sm:$0xff] %v3996_v22  ;;  %v1914_v36 = vadd.f32 %v1913_v55, %v1851_v44  ;;  %v1780_v26 = vadd.f32 %v1779_v10, %v1558_v14 }
 0x1aa   : > { %v1276_v15 = vpop.f32.mrf.mxu0  ;;  %v3269_v11 = vpop.f32.mrf.mxu1 }
 0x1ab   : > { %v4000_v30 = vadd.f32 %v3265_v7, %v1276_v15  ;;  %v1852_v7 = vmul.f32 %v1555_v20, %v1555_v20  ;;  %v1854_v20 = vmul.f32 %v3996_v22, %v3996_v22 }
 0x1ac   : > { %v1278_v35 = vpop.f32.mrf.mxu0  ;;  %v1573_v19 = vpop.f32.mrf.mxu1 }
 0x1ad   : > { %1718 = vst [vmem:[%s3917_s12 + $0x118] sm:$0xff] %v4000_v30  ;;  %v1915_v18 = vadd.f32 %v1914_v36, %v1852_v7  ;;  %v1855_v14 = vmul.f32 %v4000_v30, %v4000_v30  ;;  %v1781_v35 = vadd.f32 %v1780_v26, %v3996_v22 }
 0x1ae   : > { %v1281_v54 = vpop.f32.mrf.mxu0  ;;  %v4004_v38 = vpop.f32.mrf.mxu1 }
 0x1af   : > { %v4006_v39 = vadd.f32 %v1570_v8, %v1281_v54  ;;  %v1916_v15 = vadd.f32 %v1915_v18, %v1853_v46 }
 0x1b0   : > { %v1283_v43 = vpop.f32.mrf.mxu0  ;;  %v1586_v24 = vpop.f32.mrf.mxu1 }
 0x1b1   : > { %1719 = vst [vmem:[%s3917_s12 + $0x120] sm:$0xff] %v4006_v39  ;;  %v1917_v32 = vadd.f32 %v1916_v15, %v1854_v20  ;;  %v1856_v42 = vmul.f32 %v4006_v39, %v4006_v39 }
 0x1b2   : > { %v1284_v40 = vpop.f32.mrf.mxu0  ;;  %v4012_v47 = vpop.f32.mrf.mxu1 }
 0x1b3   : > { %v4015_v51 = vadd.f32 %v1573_v19, %v1284_v40  ;;  %v1918_v12 = vadd.f32 %v1917_v32, %v1855_v14 }
 0x1b4   : > { %v1286_v58 = vpop.f32.mrf.mxu0  ;;  %v1589_v2 = vpop.f32.mrf.mxu1 }
 0x1b5   : > { %1720 = vst [vmem:[%s3917_s12 + $0x128] sm:$0xff] %v4015_v51 }
 0x1b6   : > { %v1289_v59 = vpop.f32.mrf.mxu0  ;;  %v4021_v16 = vpop.f32.mrf.mxu1 }
 0x1b7   : > { %v1579_v63 = vadd.f32 %v3268_v52, %v1289_v59 }
 0x1b8   : > { %v1291_v6 = vpop.f32.mrf.mxu0  ;;  %v4024_v3 = vpop.f32.mrf.mxu1 }
 0x1b9   : > { %1721 = vst [vmem:[%s3917_s12 + $0x130] sm:$0xff] %v1579_v63  ;;  %v1858_v44 = vmul.f32 %v1579_v63, %v1579_v63 }
 0x1ba   : > { %v1292_v60 = vpop.f32.mrf.mxu0  ;;  %v4027_v4 = vpop.f32.mrf.mxu1 }
 0x1bb   : > { %v1582_v48 = vadd.f32 %v3269_v11, %v1292_v60 }
 0x1bc   : > { %v1294_v28 = vpop.f32.mrf.mxu0  ;;  %v4029_v23 = vpop.f32.mrf.mxu1 }
 0x1bd   : > { %1722 = vst [vmem:[%s3917_s12 + $0x138] sm:$0xff] %v1582_v48  ;;  %v1859_v6 = vmul.f32 %v1582_v48, %v1582_v48 }
 0x1be   : > { %v1297_v56 = vpop.f32.mrf.mxu0  ;;  %v3280_v52 = vpop.f32.mrf.mxu1 }
 0x1bf   : > { %v1587_v8 = vadd.f32 %v1586_v24, %v1297_v56  ;;  %v4033_v0 = vadd.f32 %v3280_v52, %v3860_v61  ;;  %v1782_v24 = vadd.f32 %v1781_v35, %v4000_v30 }
 0x1c0   : > { %v1299_v11 = vpop.f32.mrf.mxu0  ;;  %v1618_v27 = vpop.f32.mrf.mxu1 }
 0x1c1   : > { %1723 = vst [vmem:[%s3917_s12 + $0x140] sm:$0xff] %v1587_v8  ;;  %1733 = vst [vmem:[%s3917_s12 + $0x190] sm:$0xff] %v4033_v0  ;;  %v4041_v31 = vadd.f32 %v1618_v27, %v3854_v53  ;;  %v1783_v55 = vadd.f32 %v1782_v24, %v4006_v39  ;;  %v1860_v18 = vmul.f32 %v1587_v8, %v1587_v8 }
 0x1c2   : > { %v1300_v34 = vpop.f32.mrf.mxu0  ;;  %v3281_v61 = vpop.f32.mrf.mxu1 }
 0x1c3   : > { %1731 = vst [vmem:[%s3917_s12 + $0x180] sm:$0xff] %v4041_v31  ;;  %v1590_v19 = vadd.f32 %v1589_v2, %v1300_v34  ;;  %v4049_v54 = vadd.f32 %v3281_v61, %v3864_v1  ;;  %v1857_v1 = vmul.f32 %v4015_v51, %v4015_v51  ;;  %v1919_v2 = vadd.f32 %v1918_v12, %v1856_v42 }
 0x1c4   : > { %v1302_v53 = vpop.f32.mrf.mxu0  ;;  %v1621_v43 = vpop.f32.mrf.mxu1  ;;  %v1784_v62 = vadd.f32 %v1783_v55, %v4015_v51 }
 0x1c5   : > { %1724 = vst [vmem:[%s3917_s12 + $0x148] sm:$0xff] %v1590_v19  ;;  %1734 = vst [vmem:[%s3917_s12 + $0x198] sm:$0xff] %v4049_v54  ;;  %v4058_v22 = vadd.f32 %v1621_v43, %v3858_v57  ;;  %v1920_v36 = vadd.f32 %v1919_v2, %v1857_v1  ;;  %v1861_v52 = vmul.f32 %v1590_v19, %v1590_v19 }
 0x1c6   : > { %v1305_v40 = vpop.f32.mrf.mxu0  ;;  %v3284_v50 = vpop.f32.mrf.mxu1 }
 0x1c7   : > { %1732 = vst [vmem:[%s3917_s12 + $0x188] sm:$0xff] %v4058_v22  ;;  %v1595_v30 = vadd.f32 %v4004_v38, %v1305_v40  ;;  %v4067_v58 = vadd.f32 %v3284_v50, %v3876_v13  ;;  %v1785_v13 = vadd.f32 %v1784_v62, %v1579_v63  ;;  %v1921_v10 = vadd.f32 %v1920_v36, %v1858_v44 }
 0x1c8   : > { %v1307_v57 = vpop.f32.mrf.mxu0  ;;  %v1634_v59 = vpop.f32.mrf.mxu1 }
 0x1c9   : > { %1725 = vst [vmem:[%s3917_s12 + $0x150] sm:$0xff] %v1595_v30  ;;  %1737 = vst [vmem:[%s3917_s12 + $0x1b0] sm:$0xff] %v4067_v58  ;;  %v4074_v39 = vadd.f32 %v1634_v59, %v3868_v5  ;;  %v1786_v56 = vadd.f32 %v1785_v13, %v1582_v48  ;;  %v1922_v63 = vadd.f32 %v1921_v10, %v1859_v6 }
 0x1ca   : > { %v1308_v38 = vpop.f32.mrf.mxu0  ;;  %v3285_v7 = vpop.f32.mrf.mxu1  ;;  %v1862_v11 = vmul.f32 %v1595_v30, %v1595_v30 }
 0x1cb   : > { %1735 = vst [vmem:[%s3917_s12 + $0x1a0] sm:$0xff] %v4074_v39  ;;  %v1598_v60 = vadd.f32 %v4012_v47, %v1308_v38  ;;  %v4080_v51 = vadd.f32 %v3285_v7, %v3880_v17  ;;  %v1787_v15 = vadd.f32 %v1786_v56, %v1587_v8  ;;  %v1923_v20 = vadd.f32 %v1922_v63, %v1860_v18 }
 0x1cc   : > { %v1310_v46 = vpop.f32.mrf.mxu0  ;;  %v1637_v28 = vpop.f32.mrf.mxu1 }
 0x1cd   : > { %1726 = vst [vmem:[%s3917_s12 + $0x158] sm:$0xff] %v1598_v60  ;;  %1738 = vst [vmem:[%s3917_s12 + $0x1b8] sm:$0xff] %v4080_v51  ;;  %v4086_v5 = vadd.f32 %v1637_v28, %v3872_v9  ;;  %v1788_v34 = vadd.f32 %v1787_v15, %v1590_v19  ;;  %v1924_v8 = vadd.f32 %v1923_v20, %v1861_v52 }
 0x1ce   : > { %v1313_v26 = vpop.f32.mrf.mxu0  ;;  %v3288_v47 = vpop.f32.mrf.mxu1  ;;  %v1863_v61 = vmul.f32 %v1598_v60, %v1598_v60  ;;  %v1872_v20 = vmul.f32 %v4074_v39, %v4074_v39 }
 0x1cf   : > { %1736 = vst [vmem:[%s3917_s12 + $0x1a8] sm:$0xff] %v4086_v5  ;;  %v1603_v17 = vadd.f32 %v4024_v3, %v1313_v26  ;;  %v4092_v48 = vadd.f32 %v3288_v47, %v3892_v29  ;;  %v1789_v32 = vadd.f32 %v1788_v34, %v1595_v30  ;;  %v1925_v42 = vadd.f32 %v1924_v8, %v1862_v11 }
 0x1d0   : > { %v1315_v27 = vpop.f32.mrf.mxu0  ;;  %v1650_v14 = vpop.f32.mrf.mxu1  ;;  %v1870_v26 = vmul.f32 %v4033_v0, %v4033_v0 }
 0x1d1   : > { %1727 = vst [vmem:[%s3917_s12 + $0x160] sm:$0xff] %v1603_v17  ;;  %1741 = vst [vmem:[%s3917_s12 + $0x1d0] sm:$0xff] %v4092_v48  ;;  %v4098_v9 = vadd.f32 %v1650_v14, %v3884_v21  ;;  %v1790_v24 = vadd.f32 %v1789_v32, %v1598_v60  ;;  %v1864_v12 = vmul.f32 %v1603_v17, %v1603_v17 }
 0x1d2   : > { %v1316_v35 = vpop.f32.mrf.mxu0  ;;  %v3289_v3 = vpop.f32.mrf.mxu1  ;;  %v1926_v1 = vadd.f32 %v1925_v42, %v1863_v61 }
 0x1d3   : > { %1739 = vst [vmem:[%s3917_s12 + $0x1c0] sm:$0xff] %v4098_v9  ;;  %v1606_v29 = vadd.f32 %v4029_v23, %v1316_v35  ;;  %v4104_v19 = vadd.f32 %v3289_v3, %v3896_v33  ;;  %v1791_v55 = vadd.f32 %v1790_v24, %v1603_v17 }
 0x1d4   : > { %v1318_v53 = vpop.f32.mrf.mxu0  ;;  %v1653_v43 = vpop.f32.mrf.mxu1  ;;  %v1927_v57 = vadd.f32 %v1926_v1, %v1864_v12 }
 0x1d5   : > { %1728 = vst [vmem:[%s3917_s12 + $0x168] sm:$0xff] %v1606_v29  ;;  %1742 = vst [vmem:[%s3917_s12 + $0x1d8] sm:$0xff] %v4104_v19  ;;  %v1654_v21 = vadd.f32 %v1653_v43, %v3888_v25  ;;  %v1865_v23 = vmul.f32 %v1606_v29, %v1606_v29  ;;  %v1792_v59 = vadd.f32 %v1791_v55, %v1606_v29 }
 0x1d6   : > { %v1321_v40 = vpop.f32.mrf.mxu0  ;;  %v3292_v50 = vpop.f32.mrf.mxu1  ;;  %v1878_v43 = vmul.f32 %v4092_v48, %v4092_v48  ;;  %v1879_v12 = vmul.f32 %v4104_v19, %v4104_v19 }
 0x1d7   : > { %1740 = vst [vmem:[%s3917_s12 + $0x1c8] sm:$0xff] %v1654_v21  ;;  %v1611_v33 = vadd.f32 %v4021_v16, %v1321_v40  ;;  %v4113_v30 = vadd.f32 %v3292_v50, %v3908_v45  ;;  %v1928_v38 = vadd.f32 %v1927_v57, %v1865_v23 }
 0x1d8   : > { %v1323_v2 = vpop.f32.mrf.mxu0  ;;  %v1666_v44 = vpop.f32.mrf.mxu1 }
 0x1d9   : > { %1729 = vst [vmem:[%s3917_s12 + $0x170] sm:$0xff] %v1611_v33  ;;  %v1866_v62 = vmul.f32 %v1611_v33, %v1611_v33  ;;  %1745 = vst [vmem:[%s3917_s12 + $0x1f0] sm:$0xff] %v4113_v30  ;;  %v1667_v25 = vadd.f32 %v1666_v44, %v3900_v37  ;;  %v1793_v16 = vadd.f32 %v1792_v59, %v1611_v33 }
 0x1da   : > { %v1324_v36 = vpop.f32.mrf.mxu0  ;;  %v3293_v6 = vpop.f32.mrf.mxu1  ;;  %v1868_v37 = vmul.f32 %v4041_v31, %v4041_v31 }
 0x1db   : > { %1743 = vst [vmem:[%s3917_s12 + $0x1e0] sm:$0xff] %v1667_v25  ;;  %v1614_v45 = vadd.f32 %v4027_v4, %v1324_v36  ;;  %v1678_v7 = vadd.f32 %v3293_v6, %v3912_v49  ;;  %v1929_v10 = vadd.f32 %v1928_v38, %v1866_v62  ;;  %v1869_v4 = vmul.f32 %v4058_v22, %v4058_v22 }
 0x1dc   : > { %v1326_v13 = vpop.f32.mrf.mxu0  ;;  %v1669_v60 = vpop.f32.mrf.mxu1  ;;  %v1880_v40 = vmul.f32 %v1667_v25, %v1667_v25 }
 0x1dd   : > { %1730 = vst [vmem:[%s3917_s12 + $0x178] sm:$0xff] %v1614_v45  ;;  %v1794_v18 = vadd.f32 %v1793_v16, %v1614_v45  ;;  %v1867_v46 = vmul.f32 %v1614_v45, %v1614_v45  ;;  %1746 = vst [vmem:[%s3917_s12 + $0x1f8] sm:$0xff] %v1678_v7  ;;  %v1670_v28 = vadd.f32 %v1669_v60, %v3904_v41 }
 0x1de   : > { %v1871_v41 = vmul.f32 %v4049_v54, %v4049_v54 }
 0x1df   : > { %v1795_v56 = vadd.f32 %v1794_v18, %v4041_v31  ;;  %v1930_v63 = vadd.f32 %v1929_v10, %v1867_v46  ;;  %1744 = vst [vmem:[%s3917_s12 + $0x1e8] sm:$0xff] %v1670_v28  ;;  %v1881_v23 = vmul.f32 %v1670_v28, %v1670_v28  ;;  %v1747_v10 = vld [vmem:[#allocation3] sm:$0x1] }
 0x1e1   : > { %v1796_v49 = vadd.f32 %v1795_v56, %v4058_v22  ;;  %v1931_v52 = vadd.f32 %v1930_v63, %v1868_v37  ;;  %v1873_v22 = vmul.f32 %v4086_v5, %v4086_v5 }
 0x1e3   : > { %v1797_v47 = vadd.f32 %v1796_v49, %v4033_v0  ;;  %v1932_v15 = vadd.f32 %v1931_v52, %v1869_v4  ;;  %v1874_v0 = vmul.f32 %v4067_v58, %v4067_v58 }
 0x1e5   : > { %v1798_v17 = vadd.f32 %v1797_v47, %v4049_v54  ;;  %v1933_v31 = vadd.f32 %v1932_v15, %v1870_v26  ;;  %v1875_v54 = vmul.f32 %v4080_v51, %v4080_v51 }
 0x1e7   : > { %v1799_v11 = vadd.f32 %v1798_v17, %v4074_v39  ;;  %v1934_v27 = vadd.f32 %v1933_v31, %v1871_v41  ;;  %v1876_v39 = vmul.f32 %v4098_v9, %v4098_v9 }
 0x1e9   : > { %v1800_v14 = vadd.f32 %v1799_v11, %v4086_v5  ;;  %v1935_v34 = vadd.f32 %v1934_v27, %v1872_v20  ;;  %v1877_v5 = vmul.f32 %v1654_v21, %v1654_v21 }
 0x1eb   : > { %v1936_v8 = vadd.f32 %v1935_v34, %v1873_v22  ;;  %v1801_v61 = vadd.f32 %v1800_v14, %v4067_v58 }
 0x1ed   : > { %v1802_v35 = vadd.f32 %v1801_v61, %v4080_v51  ;;  %v1937_v3 = vadd.f32 %v1936_v8, %v1874_v0 }
 0x1ef   : > { %v1803_v32 = vadd.f32 %v1802_v35, %v4098_v9  ;;  %v1938_v29 = vadd.f32 %v1937_v3, %v1875_v54 }
 0x1f1   : > { %v1804_v42 = vadd.f32 %v1803_v32, %v1654_v21  ;;  %v1939_v53 = vadd.f32 %v1938_v29, %v1876_v39  ;;  %v1882_v21 = vmul.f32 %v4113_v30, %v4113_v30 }
 0x1f3   : > { %v1805_v58 = vadd.f32 %v1804_v42, %v4092_v48  ;;  %v1940_v24 = vadd.f32 %v1939_v53, %v1877_v5  ;;  %v1883_v48 = vmul.f32 %v1678_v7, %v1678_v7 }
 0x1f5   : > { %v1806_v51 = vadd.f32 %v1805_v58, %v4104_v19  ;;  %v1941_v1 = vadd.f32 %v1940_v24, %v1878_v43 }
 0x1f7   : > { %v1807_v50 = vadd.f32 %v1806_v51, %v1667_v25  ;;  %v1942_v55 = vadd.f32 %v1941_v1, %v1879_v12 }
 0x1f9   : > { %v1808_v9 = vadd.f32 %v1807_v50, %v1670_v28  ;;  %v1943_v33 = vadd.f32 %v1942_v55, %v1880_v40  ;;  %v1819_v28 = vld [vmem:[#allocation4] sm:$0x1] }
 0x1fb   : > { %v1809_v2 = vadd.f32 %v1808_v9, %v4113_v30  ;;  %v1944_v44 = vadd.f32 %v1943_v33, %v1881_v23 }
 0x1fd   : > { %v1810_v57 = vadd.f32 %v1809_v2, %v1678_v7  ;;  %v1945_v59 = vadd.f32 %v1944_v44, %v1882_v21 }
 0x1ff   : > { %v1811_v62 = vrot.slane %v1810_v57, 4  ;;  %v1946_v36 = vadd.f32 %v1945_v59, %v1883_v48 }
 0x201   : > { %v1812_v6 = vadd.f32 %v1811_v62, %v1810_v57  ;;  %v1947_v19 = vrot.slane %v1946_v36, 4 }
 0x203   : > { %v1813_v38 = vrot.slane %v1812_v6, 2  ;;  %v1948_v16 = vadd.f32 %v1947_v19, %v1946_v36 }
 0x205   : > { %v1814_v25 = vadd.f32 %v1813_v38, %v1812_v6  ;;  %v1949_v45 = vrot.slane %v1948_v16, 2 }
 0x207   : > { %v1815_v13 = vrot.slane %v1814_v25, 1  ;;  %v1950_v60 = vadd.f32 %v1949_v45, %v1948_v16 }
 0x209   : > { %v1816_v18 = vadd.f32 %v1815_v13, %v1814_v25  ;;  %v1951_v46 = vrot.slane %v1950_v60, 1 }
 0x20b   : > { %v1817_v37 = vadd.f32 %v1816_v18, %v1747_v10  ;;  %v1952_v30 = vadd.f32 %v1951_v46, %v1950_v60 }
 0x20d   : > { %1818 = vst [vmem:[#allocation3] sm:$0x1] %v1817_v37  ;;  %v1953_v56 = vadd.f32 %v1952_v30, %v1819_v28 }
 0x20f   : > { %1954 = vst [vmem:[#allocation4] sm:$0x1] %v1953_v56 }
 0x210 PF: > { %p1955_p11 = scmp.eq.s32.totalorder %s3543_s16, 1 }
 0x212   : > { %p1956_p12 = pnand %p1955_p11, %p244_p6 }
 0x214   : > { %1959 = sbr.rel (%p1956_p12) target bundleno = 569 (0x239), region = 48 }
 0x219   : > { %v1960_v7 = vld [vmem:[#allocation3] sm:$0x1]  ;;  %v1962_v63 = vld [vmem:[#allocation4] sm:$0x1] }
 0x21a   : > { %v1961_v4 = vmul.f32 0.0011337869, %v1960_v7  ;;  %v1963_v49 = vmul.f32 0.0011337869, %v1962_v63  ;;  %v1967_v41 = vld [vmem:[%s4420_s2] sm:$0x1] }
 0x21b   : > { %v1972_v20 = vld [vmem:[%s4421_s3] sm:$0x1] }
 0x21c   : > { %v1964_v52 = vmul.f32 %v1961_v4, %v1961_v4 }
 0x21e   : > { %v1965_v26 = vsub.f32 %v1963_v49, %v1964_v52 }
 0x220   : > { %v1966_v47 = vmax.f32 %v1965_v26, 0.0 }
 0x222   : > { %v1968_v15 = vadd.f32 1e-05, %v1966_v47 }
 0x224   : > { %3515 = vrsqrt.f32 %v1968_v15 }
 0x231   : > { %v3516_v17 = vpop.eup %3515 }
 0x232   : > { %v1970_v31 = vmul.f32 %v3516_v17, %v1967_v41 }
 0x234   : > { %1971 = vst [vmem:[#allocation5] sm:$0x1] %v1970_v31  ;;  %v1973_v11 = vmul.f32 %v1970_v31, %v1961_v4 }
 0x236   : > { %v1974_v27 = vsub.f32 %v1972_v20, %v1973_v11 }
 0x238   : > { %1975 = vst [vmem:[#allocation6] sm:$0x1] %v1974_v27 }
 0x239 PF: > { %p2867_p13 = scmp.ne.s32.totalorder %s3543_s16, 1 }
 0x23a   : > { %s2868_s24 = sshll.u32 (!%p2867_p13), %s3539_s15, 9 }
 0x23b   : > { %1978 = sbr.rel (%p2867_p13) target bundleno = 657 (0x291), region = 52  ;;  %s4177_s25 = scalar_lea.vmem (!%p2867_p13), [#allocation2], %s2868_s24 }
 0x240   : > { %v4173_v22 = vld [vmem:[#allocation5] ss:$0 sm:$0xff]  ;;  %v4175_v14 = vld [vmem:[#allocation6] ss:$0 sm:$0xff]  ;;  %v1982_v0 = vld [vmem:[%s4177_s25 + $0x8] sm:$0xff] }
 0x241   : > { %v1981_v34 = vld [vmem:[%s4177_s25] sm:$0xff]  ;;  %v1983_v8 = vld [vmem:[%s4177_s25 + $0x10] sm:$0xff]  ;;  %v2053_v54 = vmul.f32 %v4173_v22, %v1982_v0  ;;  %v1984_v35 = vld [vmem:[%s4177_s25 + $0x18] sm:$0xff] }
 0x242   : > { %v2052_v61 = vmul.f32 %v4173_v22, %v1981_v34  ;;  %v2054_v3 = vmul.f32 %v4173_v22, %v1983_v8  ;;  %v1985_v39 = vld [vmem:[%s4177_s25 + $0x20] sm:$0xff]  ;;  %v1986_v32 = vld [vmem:[%s4177_s25 + $0x28] sm:$0xff]  ;;  %v2055_v29 = vmul.f32 %v4173_v22, %v1984_v35  ;;  %v1987_v53 = vld [vmem:[%s4177_s25 + $0x30] sm:$0xff] }
 0x243   : > { %v2056_v5 = vmul.f32 %v4173_v22, %v1985_v39  ;;  %v2057_v42 = vmul.f32 %v4173_v22, %v1986_v32  ;;  %v1988_v43 = vld [vmem:[%s4177_s25 + $0x38] sm:$0xff]  ;;  %v2124_v24 = vadd.f32 %v4175_v14, %v2053_v54  ;;  %v2058_v51 = vmul.f32 %v4173_v22, %v1987_v53  ;;  %v1989_v9 = vld [vmem:[%s4177_s25 + $0x40] sm:$0xff]  ;;  %v1990_v23 = vld [vmem:[%s4177_s25 + $0x48] sm:$0xff] }
 0x244   : > { %v2123_v58 = vadd.f32 %v4175_v14, %v2052_v61  ;;  %v2125_v12 = vadd.f32 %v4175_v14, %v2054_v3  ;;  %v2126_v1 = vadd.f32 %v4175_v14, %v2055_v29  ;;  %v2059_v55 = vmul.f32 %v4173_v22, %v1988_v43  ;;  %v1991_v16 = vld [vmem:[%s4177_s25 + $0x50] sm:$0xff]  ;;  %v1992_v10 = vld [vmem:[%s4177_s25 + $0x58] sm:$0xff]  ;;  %v1993_v18 = vld [vmem:[%s4177_s25 + $0x60] sm:$0xff] }
 0x245   : > { %v2127_v40 = vadd.f32 %v4175_v14, %v2056_v5  ;;  %v2128_v50 = vadd.f32 %v4175_v14, %v2057_v42  ;;  %v2188_v21 = vmul.f32 0.01, %v2124_v24  ;;  %v2129_v44 = vadd.f32 %v4175_v14, %v2058_v51  ;;  %v1994_v56 = vld [vmem:[%s4177_s25 + $0x68] sm:$0xff]  ;;  %v1995_v7 = vld [vmem:[%s4177_s25 + $0x70] sm:$0xff]  ;;  %v1996_v17 = vld [vmem:[%s4177_s25 + $0x78] sm:$0xff] }
 0x246   : > { %v2187_v33 = vmul.f32 0.01, %v2123_v58  ;;  %v2189_v2 = vmul.f32 0.01, %v2125_v12  ;;  %v2190_v48 = vmul.f32 0.01, %v2126_v1  ;;  %v2130_v62 = vadd.f32 %v4175_v14, %v2059_v55 }
 0x247   : > { %v2191_v57 = vmul.f32 0.01, %v2127_v40  ;;  %v2192_v59 = vmul.f32 0.01, %v2128_v50  ;;  %v2252_v6 = vmax.f32 %v2124_v24, %v2188_v21  ;;  %v2193_v38 = vmul.f32 0.01, %v2129_v44 }
 0x248   : > { %v2251_v36 = vmax.f32 %v2123_v58, %v2187_v33  ;;  %v2253_v19 = vmax.f32 %v2125_v12, %v2189_v2  ;;  %v2254_v25 = vmax.f32 %v2126_v1, %v2190_v48  ;;  %v2194_v60 = vmul.f32 0.01, %v2130_v62  ;;  %v1997_v32 = vld [vmem:[%s4177_s25 + $0x80] sm:$0xff]  ;;  %v1998_v43 = vld [vmem:[%s4177_s25 + $0x88] sm:$0xff]  ;;  %v1999_v1 = vld [vmem:[%s4177_s25 + $0x90] sm:$0xff] }
 0x249   : > { %v2255_v45 = vmax.f32 %v2127_v40, %v2191_v57  ;;  %v2256_v13 = vmax.f32 %v2128_v50, %v2192_v59  ;;  %v2257_v28 = vmax.f32 %v2129_v44, %v2193_v38  ;;  %v2060_v37 = vmul.f32 %v4173_v22, %v1989_v9  ;;  %v2000_v40 = vld [vmem:[%s4177_s25 + $0x98] sm:$0xff]  ;;  %v2001_v33 = vld [vmem:[%s4177_s25 + $0xa0] sm:$0xff]  ;;  %v2002_v57 = vld [vmem:[%s4177_s25 + $0xa8] sm:$0xff] }
 0x24a   : > { %v3004_v46 = vpack.c.bf16 %v2252_v6, %v2251_v36  ;;  %v2061_v30 = vmul.f32 %v4173_v22, %v1990_v23  ;;  %v3009_v63 = vpack.c.bf16 %v2254_v25, %v2253_v19  ;;  %v2258_v49 = vmax.f32 %v2130_v62, %v2194_v60  ;;  %v2003_v19 = vld [vmem:[%s4177_s25 + $0xb0] sm:$0xff] }
 0x24b   : > { %v3014_v4 = vpack.c.bf16 %v2256_v13, %v2255_v45  ;;  %v2062_v52 = vmul.f32 %v4173_v22, %v1991_v16  ;;  %v2131_v26 = vadd.f32 %v4175_v14, %v2060_v37  ;;  %v2063_v15 = vmul.f32 %v4173_v22, %v1992_v10 }
 0x24c   : > { %3005 = vst [vmem:[%s3630_s6] sm:$0xff] %v3004_v46   ;;  %v2132_v47 = vadd.f32 %v4175_v14, %v2061_v30  ;;  %v2064_v41 = vmul.f32 %v4173_v22, %v1993_v18  ;;  %3161 = vst [vmem:[%s3630_s6 + $0x8] sm:$0xff] %v3009_v63   ;;  %v3019_v31 = vpack.c.bf16 %v2258_v49, %v2257_v28  ;;  %v2004_v46 = vld [vmem:[%s4177_s25 + $0xb8] sm:$0xff] }
 0x24d   : > { %3162 = vst [vmem:[%s3630_s6 + $0x10] sm:$0xff] %v3014_v4   ;;  %v2133_v20 = vadd.f32 %v4175_v14, %v2062_v52  ;;  %v2065_v11 = vmul.f32 %v4173_v22, %v1994_v56  ;;  %v2066_v27 = vmul.f32 %v4173_v22, %v1995_v7  ;;  %v2195_v34 = vmul.f32 0.01, %v2131_v26  ;;  %v2005_v7 = vld [vmem:[%s4177_s25 + $0xc0] sm:$0xff] }
 0x24e   : > { %v2196_v0 = vmul.f32 0.01, %v2132_v47  ;;  %v2134_v8 = vadd.f32 %v4175_v14, %v2063_v15  ;;  %v2135_v61 = vadd.f32 %v4175_v14, %v2064_v41  ;;  %3163 = vst [vmem:[%s3630_s6 + $0x18] sm:$0xff] %v3019_v31   ;;  %v2067_v3 = vmul.f32 %v4173_v22, %v1996_v17  ;;  %v2006_v17 = vld [vmem:[%s4177_s25 + $0xc8] sm:$0xff] }
 0x24f   : > { %v2197_v54 = vmul.f32 0.01, %v2133_v20  ;;  %v2136_v35 = vadd.f32 %v4175_v14, %v2065_v11  ;;  %v2137_v39 = vadd.f32 %v4175_v14, %v2066_v27  ;;  %v2259_v29 = vmax.f32 %v2131_v26, %v2195_v34  ;;  %v2007_v34 = vld [vmem:[%s4177_s25 + $0xd0] sm:$0xff] }
 0x250   : > { %v2260_v5 = vmax.f32 %v2132_v47, %v2196_v0  ;;  %v2198_v42 = vmul.f32 0.01, %v2134_v8  ;;  %v2199_v53 = vmul.f32 0.01, %v2135_v61  ;;  %v2138_v12 = vadd.f32 %v4175_v14, %v2067_v3  ;;  %v2008_v0 = vld [vmem:[%s4177_s25 + $0xd8] sm:$0xff]  ;;  %v2009_v3 = vld [vmem:[%s4177_s25 + $0xe0] sm:$0xff] }
 0x251   : > { %v2261_v58 = vmax.f32 %v2133_v20, %v2197_v54  ;;  %v2200_v24 = vmul.f32 0.01, %v2136_v35  ;;  %v2201_v51 = vmul.f32 0.01, %v2137_v39  ;;  %v2068_v23 = vmul.f32 %v4173_v22, %v1997_v32 }
 0x252   : > { %v3024_v50 = vpack.c.bf16 %v2260_v5, %v2259_v29  ;;  %v2262_v55 = vmax.f32 %v2134_v8, %v2198_v42  ;;  %v2263_v9 = vmax.f32 %v2135_v61, %v2199_v53  ;;  %v2202_v2 = vmul.f32 0.01, %v2138_v12  ;;  %v2010_v42 = vld [vmem:[%s4177_s25 + $0xe8] sm:$0xff] }
 0x253   : > { %v2264_v21 = vmax.f32 %v2136_v35, %v2200_v24  ;;  %v2265_v44 = vmax.f32 %v2137_v39, %v2201_v51  ;;  %v2069_v48 = vmul.f32 %v4173_v22, %v1998_v43  ;;  %v2139_v62 = vadd.f32 %v4175_v14, %v2068_v23 }
 0x254   : > { %3164 = vst [vmem:[%s3630_s6 + $0x20] sm:$0xff] %v3024_v50   ;;  %v3029_v59 = vpack.c.bf16 %v2262_v55, %v2261_v58  ;;  %v2070_v36 = vmul.f32 %v4173_v22, %v1999_v1  ;;  %v2071_v6 = vmul.f32 %v4173_v22, %v2000_v40  ;;  %v2266_v16 = vmax.f32 %v2138_v12, %v2202_v2  ;;  %v2011_v12 = vld [vmem:[%s4177_s25 + $0xf0] sm:$0xff] }
 0x255   : > { %v3034_v38 = vpack.c.bf16 %v2264_v21, %v2263_v9  ;;  %v2140_v25 = vadd.f32 %v4175_v14, %v2069_v48  ;;  %v2072_v45 = vmul.f32 %v4173_v22, %v2001_v33  ;;  %v2203_v13 = vmul.f32 0.01, %v2139_v62  ;;  %v2012_v21 = vld [vmem:[%s4177_s25 + $0xf8] sm:$0xff] }
 0x256   : > { %3165 = vst [vmem:[%s3630_s6 + $0x28] sm:$0xff] %v3029_v59   ;;  %v2141_v60 = vadd.f32 %v4175_v14, %v2070_v36  ;;  %v2142_v10 = vadd.f32 %v4175_v14, %v2071_v6  ;;  %v2073_v18 = vmul.f32 %v4173_v22, %v2002_v57  ;;  %v3039_v28 = vpack.c.bf16 %v2266_v16, %v2265_v44  ;;  %v2013_v59 = vld [vmem:[%s4177_s25 + $0x100] sm:$0xff] }
 0x257   : > { %3166 = vst [vmem:[%s3630_s6 + $0x30] sm:$0xff] %v3034_v38   ;;  %v2204_v37 = vmul.f32 0.01, %v2140_v25  ;;  %v2143_v30 = vadd.f32 %v4175_v14, %v2072_v45  ;;  %v2074_v56 = vmul.f32 %v4173_v22, %v2003_v19  ;;  %v2267_v63 = vmax.f32 %v2139_v62, %v2203_v13  ;;  %v2014_v13 = vld [vmem:[%s4177_s25 + $0x108] sm:$0xff] }
 0x258   : > { %v2205_v4 = vmul.f32 0.01, %v2141_v60  ;;  %v2206_v49 = vmul.f32 0.01, %v2142_v10  ;;  %v2144_v52 = vadd.f32 %v4175_v14, %v2073_v18  ;;  %3167 = vst [vmem:[%s3630_s6 + $0x38] sm:$0xff] %v3039_v28   ;;  %v2075_v15 = vmul.f32 %v4173_v22, %v2004_v46  ;;  %v2015_v28 = vld [vmem:[%s4177_s25 + $0x110] sm:$0xff] }
 0x259   : > { %v2268_v26 = vmax.f32 %v2140_v25, %v2204_v37  ;;  %v2207_v47 = vmul.f32 0.01, %v2143_v30  ;;  %v2145_v41 = vadd.f32 %v4175_v14, %v2074_v56  ;;  %v2076_v27 = vmul.f32 %v4173_v22, %v2005_v7  ;;  %v2016_v37 = vld [vmem:[%s4177_s25 + $0x118] sm:$0xff] }
 0x25a   : > { %v2269_v31 = vmax.f32 %v2141_v60, %v2205_v4  ;;  %v2270_v20 = vmax.f32 %v2142_v10, %v2206_v49  ;;  %v2208_v11 = vmul.f32 0.01, %v2144_v52  ;;  %v2146_v54 = vadd.f32 %v4175_v14, %v2075_v15  ;;  %v2017_v4 = vld [vmem:[%s4177_s25 + $0x120] sm:$0xff]  ;;  %v2018_v15 = vld [vmem:[%s4177_s25 + $0x128] sm:$0xff] }
 0x25b   : > { %v3044_v8 = vpack.c.bf16 %v2268_v26, %v2267_v63  ;;  %v2271_v61 = vmax.f32 %v2143_v30, %v2207_v47  ;;  %v2209_v35 = vmul.f32 0.01, %v2145_v41  ;;  %v2077_v29 = vmul.f32 %v4173_v22, %v2006_v17 }
 0x25c   : > { %v3049_v39 = vpack.c.bf16 %v2270_v20, %v2269_v31  ;;  %v2272_v32 = vmax.f32 %v2144_v52, %v2208_v11  ;;  %v2147_v5 = vadd.f32 %v4175_v14, %v2076_v27  ;;  %v2210_v53 = vmul.f32 0.01, %v2146_v54  ;;  %v2019_v11 = vld [vmem:[%s4177_s25 + $0x130] sm:$0xff] }
 0x25d   : > { %3168 = vst [vmem:[%s3630_s6 + $0x40] sm:$0xff] %v3044_v8   ;;  %v2273_v43 = vmax.f32 %v2145_v41, %v2209_v35  ;;  %v2078_v58 = vmul.f32 %v4173_v22, %v2007_v34  ;;  %v2079_v24 = vmul.f32 %v4173_v22, %v2008_v0  ;;  %v2148_v1 = vadd.f32 %v4175_v14, %v2077_v29 }
 0x25e   : > { %3169 = vst [vmem:[%s3630_s6 + $0x48] sm:$0xff] %v3049_v39   ;;  %v3054_v51 = vpack.c.bf16 %v2272_v32, %v2271_v61  ;;  %v2211_v40 = vmul.f32 0.01, %v2147_v5  ;;  %v2080_v50 = vmul.f32 %v4173_v22, %v2009_v3  ;;  %v2274_v55 = vmax.f32 %v2146_v54, %v2210_v53  ;;  %v2020_v39 = vld [vmem:[%s4177_s25 + $0x138] sm:$0xff]  ;;  %v2021_v53 = vld [vmem:[%s4177_s25 + $0x140] sm:$0xff] }
 0x25f   : > { %v2149_v9 = vadd.f32 %v4175_v14, %v2078_v58  ;;  %v2150_v23 = vadd.f32 %v4175_v14, %v2079_v24  ;;  %v2081_v33 = vmul.f32 %v4173_v22, %v2010_v42  ;;  %v2212_v2 = vmul.f32 0.01, %v2148_v1 }
 0x260   : > { %3170 = vst [vmem:[%s3630_s6 + $0x50] sm:$0xff] %v3054_v51   ;;  %v2275_v44 = vmax.f32 %v2147_v5, %v2211_v40  ;;  %v2151_v48 = vadd.f32 %v4175_v14, %v2080_v50  ;;  %v2082_v57 = vmul.f32 %v4173_v22, %v2011_v12  ;;  %v3059_v62 = vpack.c.bf16 %v2274_v55, %v2273_v43  ;;  %v2022_v55 = vld [vmem:[%s4177_s25 + $0x148] sm:$0xff] }
 0x261   : > { %v2213_v36 = vmul.f32 0.01, %v2149_v9  ;;  %v2214_v6 = vmul.f32 0.01, %v2150_v23  ;;  %v2152_v19 = vadd.f32 %v4175_v14, %v2081_v33  ;;  %v2276_v38 = vmax.f32 %v2148_v1, %v2212_v2  ;;  %v2023_v2 = vld [vmem:[%s4177_s25 + $0x150] sm:$0xff] }
 0x262   : > { %v2215_v16 = vmul.f32 0.01, %v2151_v48  ;;  %v2083_v25 = vmul.f32 %v4173_v22, %v2012_v21  ;;  %v2153_v45 = vadd.f32 %v4175_v14, %v2082_v57  ;;  %3171 = vst [vmem:[%s3630_s6 + $0x58] sm:$0xff] %v3059_v62   ;;  %v2084_v46 = vmul.f32 %v4173_v22, %v2013_v59 }
 0x263   : > { %v2277_v60 = vmax.f32 %v2149_v9, %v2213_v36  ;;  %v2278_v10 = vmax.f32 %v2150_v23, %v2214_v6  ;;  %v2216_v18 = vmul.f32 0.01, %v2152_v19  ;;  %v3064_v30 = vpack.c.bf16 %v2276_v38, %v2275_v44  ;;  %v2024_v44 = vld [vmem:[%s4177_s25 + $0x158] sm:$0xff]  ;;  %v2025_v36 = vld [vmem:[%s4177_s25 + $0x160] sm:$0xff] }
 0x264   : > { %v2279_v56 = vmax.f32 %v2151_v48, %v2215_v16  ;;  %v2154_v7 = vadd.f32 %v4175_v14, %v2083_v25  ;;  %v2217_v63 = vmul.f32 0.01, %v2153_v45  ;;  %v2085_v26 = vmul.f32 %v4173_v22, %v2014_v13  ;;  %v2026_v25 = vld [vmem:[%s4177_s25 + $0x168] sm:$0xff] }
 0x265   : > { %v3069_v49 = vpack.c.bf16 %v2278_v10, %v2277_v60  ;;  %v2280_v52 = vmax.f32 %v2152_v19, %v2216_v18  ;;  %v2155_v47 = vadd.f32 %v4175_v14, %v2084_v46  ;;  %3172 = vst [vmem:[%s3630_s6 + $0x60] sm:$0xff] %v3064_v30   ;;  %v2086_v31 = vmul.f32 %v4173_v22, %v2015_v28  ;;  %v2027_v18 = vld [vmem:[%s4177_s25 + $0x170] sm:$0xff] }
 0x266   : > { %v2218_v41 = vmul.f32 0.01, %v2154_v7  ;;  %v2281_v17 = vmax.f32 %v2153_v45, %v2217_v63  ;;  %v2087_v20 = vmul.f32 %v4173_v22, %v2016_v37  ;;  %v2156_v34 = vadd.f32 %v4175_v14, %v2085_v26 }
 0x267   : > { %3173 = vst [vmem:[%s3630_s6 + $0x68] sm:$0xff] %v3069_v49   ;;  %v3074_v27 = vpack.c.bf16 %v2280_v52, %v2279_v56  ;;  %v2219_v0 = vmul.f32 0.01, %v2155_v47  ;;  %v2088_v8 = vmul.f32 %v4173_v22, %v2017_v4  ;;  %v2157_v54 = vadd.f32 %v4175_v14, %v2086_v31  ;;  %v2028_v49 = vld [vmem:[%s4177_s25 + $0x178] sm:$0xff] }
 0x268   : > { %v2282_v61 = vmax.f32 %v2154_v7, %v2218_v41  ;;  %v2158_v35 = vadd.f32 %v4175_v14, %v2087_v20  ;;  %v2089_v3 = vmul.f32 %v4173_v22, %v2018_v15  ;;  %v2220_v32 = vmul.f32 0.01, %v2156_v34  ;;  %v2029_v41 = vld [vmem:[%s4177_s25 + $0x180] sm:$0xff] }
 0x269   : > { %3174 = vst [vmem:[%s3630_s6 + $0x70] sm:$0xff] %v3074_v27   ;;  %v2283_v29 = vmax.f32 %v2155_v47, %v2219_v0  ;;  %v2159_v5 = vadd.f32 %v4175_v14, %v2088_v8  ;;  %v2090_v42 = vmul.f32 %v4173_v22, %v2019_v11  ;;  %v2221_v58 = vmul.f32 0.01, %v2157_v54 }
 0x26a   : > { %v3079_v43 = vpack.c.bf16 %v2282_v61, %v2281_v17  ;;  %v2222_v24 = vmul.f32 0.01, %v2158_v35  ;;  %v2160_v12 = vadd.f32 %v4175_v14, %v2089_v3  ;;  %v2284_v51 = vmax.f32 %v2156_v34, %v2220_v32  ;;  %v2030_v61 = vld [vmem:[%s4177_s25 + $0x188] sm:$0xff]  ;;  %v2031_v32 = vld [vmem:[%s4177_s25 + $0x190] sm:$0xff] }
 0x26b   : > { %v2223_v1 = vmul.f32 0.01, %v2159_v5  ;;  %v2091_v40 = vmul.f32 %v4173_v22, %v2020_v39  ;;  %v2161_v50 = vadd.f32 %v4175_v14, %v2090_v42  ;;  %v2285_v9 = vmax.f32 %v2157_v54, %v2221_v58  ;;  %v2033_v58 = vld [vmem:[%s4177_s25 + $0x1a0] sm:$0xff] }
 0x26c   : > { %3175 = vst [vmem:[%s3630_s6 + $0x78] sm:$0xff] %v3079_v43   ;;  %v2286_v23 = vmax.f32 %v2158_v35, %v2222_v24  ;;  %v2224_v33 = vmul.f32 0.01, %v2160_v12  ;;  %v2092_v21 = vmul.f32 %v4173_v22, %v2021_v53  ;;  %v3084_v48 = vpack.c.bf16 %v2284_v51, %v2283_v29  ;;  %v2032_v29 = vld [vmem:[%s4177_s25 + $0x198] sm:$0xff] }
 0x26d   : > { %v2287_v57 = vmax.f32 %v2159_v5, %v2223_v1  ;;  %v2162_v59 = vadd.f32 %v4175_v14, %v2091_v40  ;;  %v2225_v62 = vmul.f32 0.01, %v2161_v50  ;;  %v2093_v38 = vmul.f32 %v4173_v22, %v2022_v55  ;;  %v2034_v40 = vld [vmem:[%s4177_s25 + $0x1a8] sm:$0xff] }
 0x26e   : > { %v3089_v6 = vpack.c.bf16 %v2286_v23, %v2285_v9  ;;  %v2288_v19 = vmax.f32 %v2160_v12, %v2224_v33  ;;  %v2163_v16 = vadd.f32 %v4175_v14, %v2092_v21  ;;  %3176 = vst [vmem:[%s3630_s6 + $0x80] sm:$0xff] %v3084_v48   ;;  %v2094_v60 = vmul.f32 %v4173_v22, %v2023_v2  ;;  %v2035_v33 = vld [vmem:[%s4177_s25 + $0x1b0] sm:$0xff] }
 0x26f   : > { %v2226_v45 = vmul.f32 0.01, %v2162_v59  ;;  %v2289_v13 = vmax.f32 %v2161_v50, %v2225_v62  ;;  %v2095_v10 = vmul.f32 %v4173_v22, %v2024_v44  ;;  %v2164_v28 = vadd.f32 %v4175_v14, %v2093_v38 }
 0x270   : > { %3177 = vst [vmem:[%s3630_s6 + $0x88] sm:$0xff] %v3089_v6   ;;  %v3094_v46 = vpack.c.bf16 %v2288_v19, %v2287_v57  ;;  %v2227_v37 = vmul.f32 0.01, %v2163_v16  ;;  %v2096_v30 = vmul.f32 %v4173_v22, %v2025_v36  ;;  %v2165_v7 = vadd.f32 %v4175_v14, %v2094_v60  ;;  %v2036_v6 = vld [vmem:[%s4177_s25 + $0x1b8] sm:$0xff] }
 0x271   : > { %v2290_v56 = vmax.f32 %v2162_v59, %v2226_v45  ;;  %v2166_v63 = vadd.f32 %v4175_v14, %v2095_v10  ;;  %v2097_v4 = vmul.f32 %v4173_v22, %v2026_v25  ;;  %v2228_v52 = vmul.f32 0.01, %v2164_v28  ;;  %v2037_v45 = vld [vmem:[%s4177_s25 + $0x1c0] sm:$0xff] }
 0x272   : > { %3178 = vst [vmem:[%s3630_s6 + $0x90] sm:$0xff] %v3094_v46   ;;  %v2291_v26 = vmax.f32 %v2163_v16, %v2227_v37  ;;  %v2167_v47 = vadd.f32 %v4175_v14, %v2096_v30  ;;  %v2098_v15 = vmul.f32 %v4173_v22, %v2027_v18  ;;  %v2229_v31 = vmul.f32 0.01, %v2165_v7 }
 0x273   : > { %v3099_v17 = vpack.c.bf16 %v2290_v56, %v2289_v13  ;;  %v2230_v20 = vmul.f32 0.01, %v2166_v63  ;;  %v2168_v11 = vadd.f32 %v4175_v14, %v2097_v4  ;;  %v2292_v27 = vmax.f32 %v2164_v28, %v2228_v52  ;;  %v2038_v56 = vld [vmem:[%s4177_s25 + $0x1c8] sm:$0xff]  ;;  %v2039_v52 = vld [vmem:[%s4177_s25 + $0x1d0] sm:$0xff] }
 0x274   : > { %v2231_v34 = vmul.f32 0.01, %v2167_v47  ;;  %v2099_v0 = vmul.f32 %v4173_v22, %v2028_v49  ;;  %v2169_v8 = vadd.f32 %v4175_v14, %v2098_v15  ;;  %v2293_v54 = vmax.f32 %v2165_v7, %v2229_v31  ;;  %v2041_v31 = vld [vmem:[%s4177_s25 + $0x1e0] sm:$0xff] }
 0x275   : > { %3179 = vst [vmem:[%s3630_s6 + $0x98] sm:$0xff] %v3099_v17   ;;  %v2294_v35 = vmax.f32 %v2166_v63, %v2230_v20  ;;  %v2232_v3 = vmul.f32 0.01, %v2168_v11  ;;  %v2100_v39 = vmul.f32 %v4173_v22, %v2029_v41  ;;  %v3104_v5 = vpack.c.bf16 %v2292_v27, %v2291_v26  ;;  %v2040_v26 = vld [vmem:[%s4177_s25 + $0x1d8] sm:$0xff] }
 0x276   : > { %v2295_v42 = vmax.f32 %v2167_v47, %v2231_v34  ;;  %v2170_v53 = vadd.f32 %v4175_v14, %v2099_v0  ;;  %v2233_v43 = vmul.f32 0.01, %v2169_v8  ;;  %v2101_v51 = vmul.f32 %v4173_v22, %v2030_v61  ;;  %v2042_v0 = vld [vmem:[%s4177_s25 + $0x1e8] sm:$0xff] }
 0x277   : > { %v3109_v24 = vpack.c.bf16 %v2294_v35, %v2293_v54  ;;  %v2296_v12 = vmax.f32 %v2168_v11, %v2232_v3  ;;  %v2171_v1 = vadd.f32 %v4175_v14, %v2100_v39  ;;  %3180 = vst [vmem:[%s3630_s6 + $0xa0] sm:$0xff] %v3104_v5   ;;  %v2102_v9 = vmul.f32 %v4173_v22, %v2031_v32  ;;  %v2043_v3 = vld [vmem:[%s4177_s25 + $0x1f0] sm:$0xff] }
 0x278   : > { %v2234_v50 = vmul.f32 0.01, %v2170_v53  ;;  %v2297_v55 = vmax.f32 %v2169_v8, %v2233_v43  ;;  %v2103_v23 = vmul.f32 %v4173_v22, %v2032_v29  ;;  %v2172_v2 = vadd.f32 %v4175_v14, %v2101_v51 }
 0x279   : > { %3181 = vst [vmem:[%s3630_s6 + $0xa8] sm:$0xff] %v3109_v24   ;;  %v3114_v21 = vpack.c.bf16 %v2296_v12, %v2295_v42  ;;  %v2235_v44 = vmul.f32 0.01, %v2171_v1  ;;  %v2104_v48 = vmul.f32 %v4173_v22, %v2033_v58  ;;  %v2173_v59 = vadd.f32 %v4175_v14, %v2102_v9  ;;  %v2044_v24 = vld [vmem:[%s4177_s25 + $0x1f8] sm:$0xff] }
 0x27a   : > { %v2298_v57 = vmax.f32 %v2170_v53, %v2234_v50  ;;  %v2174_v62 = vadd.f32 %v4175_v14, %v2103_v23  ;;  %v2105_v36 = vmul.f32 %v4173_v22, %v2034_v40  ;;  %v2236_v19 = vmul.f32 0.01, %v2172_v2 }
 0x27b   : > { %3182 = vst [vmem:[%s3630_s6 + $0xb0] sm:$0xff] %v3114_v21   ;;  %v2299_v38 = vmax.f32 %v2171_v1, %v2235_v44  ;;  %v2175_v16 = vadd.f32 %v4175_v14, %v2104_v48  ;;  %v2106_v25 = vmul.f32 %v4173_v22, %v2035_v33  ;;  %v2237_v60 = vmul.f32 0.01, %v2173_v59 }
 0x27c   : > { %v3119_v13 = vpack.c.bf16 %v2298_v57, %v2297_v55  ;;  %v2238_v10 = vmul.f32 0.01, %v2174_v62  ;;  %v2176_v18 = vadd.f32 %v4175_v14, %v2105_v36  ;;  %v2300_v46 = vmax.f32 %v2172_v2, %v2236_v19 }
 0x27d   : > { %v2239_v28 = vmul.f32 0.01, %v2175_v16  ;;  %v2107_v37 = vmul.f32 %v4173_v22, %v2036_v6  ;;  %v2177_v30 = vadd.f32 %v4175_v14, %v2106_v25  ;;  %v2301_v7 = vmax.f32 %v2173_v59, %v2237_v60 }
 0x27e   : > { %3183 = vst [vmem:[%s3630_s6 + $0xb8] sm:$0xff] %v3119_v13   ;;  %v2302_v63 = vmax.f32 %v2174_v62, %v2238_v10  ;;  %v2240_v4 = vmul.f32 0.01, %v2176_v18  ;;  %v2108_v49 = vmul.f32 %v4173_v22, %v2037_v45  ;;  %v3124_v47 = vpack.c.bf16 %v2300_v46, %v2299_v38 }
 0x27f   : > { %v2303_v15 = vmax.f32 %v2175_v16, %v2239_v28  ;;  %v2178_v41 = vadd.f32 %v4175_v14, %v2107_v37  ;;  %v2241_v17 = vmul.f32 0.01, %v2177_v30  ;;  %v2109_v27 = vmul.f32 %v4173_v22, %v2038_v56 }
 0x280   : > { %v3129_v20 = vpack.c.bf16 %v2302_v63, %v2301_v7  ;;  %v2304_v11 = vmax.f32 %v2176_v18, %v2240_v4  ;;  %v2179_v34 = vadd.f32 %v4175_v14, %v2108_v49  ;;  %3184 = vst [vmem:[%s3630_s6 + $0xc0] sm:$0xff] %v3124_v47   ;;  %v2110_v54 = vmul.f32 %v4173_v22, %v2039_v52 }
 0x281   : > { %v2242_v8 = vmul.f32 0.01, %v2178_v41  ;;  %v2305_v61 = vmax.f32 %v2177_v30, %v2241_v17  ;;  %v2111_v35 = vmul.f32 %v4173_v22, %v2040_v26  ;;  %v2180_v32 = vadd.f32 %v4175_v14, %v2109_v27 }
 0x282   : > { %3185 = vst [vmem:[%s3630_s6 + $0xc8] sm:$0xff] %v3129_v20   ;;  %v3134_v39 = vpack.c.bf16 %v2304_v11, %v2303_v15  ;;  %v2243_v29 = vmul.f32 0.01, %v2179_v34  ;;  %v2112_v5 = vmul.f32 %v4173_v22, %v2041_v31  ;;  %v2181_v53 = vadd.f32 %v4175_v14, %v2110_v54 }
 0x283   : > { %v2306_v42 = vmax.f32 %v2178_v41, %v2242_v8  ;;  %v2182_v43 = vadd.f32 %v4175_v14, %v2111_v35  ;;  %v2113_v58 = vmul.f32 %v4173_v22, %v2042_v0  ;;  %v2244_v12 = vmul.f32 0.01, %v2180_v32 }
 0x284   : > { %3186 = vst [vmem:[%s3630_s6 + $0xd0] sm:$0xff] %v3134_v39   ;;  %v2307_v51 = vmax.f32 %v2179_v34, %v2243_v29  ;;  %v2183_v1 = vadd.f32 %v4175_v14, %v2112_v5  ;;  %v2114_v40 = vmul.f32 %v4173_v22, %v2043_v3  ;;  %v2245_v55 = vmul.f32 0.01, %v2181_v53 }
 0x285   : > { %v3139_v50 = vpack.c.bf16 %v2306_v42, %v2305_v61  ;;  %v2246_v9 = vmul.f32 0.01, %v2182_v43  ;;  %v2184_v23 = vadd.f32 %v4175_v14, %v2113_v58  ;;  %v2308_v33 = vmax.f32 %v2180_v32, %v2244_v12 }
 0x286   : > { %v2247_v21 = vmul.f32 0.01, %v2183_v1  ;;  %v2115_v2 = vmul.f32 %v4173_v22, %v2044_v24  ;;  %v2185_v44 = vadd.f32 %v4175_v14, %v2114_v40  ;;  %v2309_v48 = vmax.f32 %v2181_v53, %v2245_v55 }
 0x287   : > { %3187 = vst [vmem:[%s3630_s6 + $0xd8] sm:$0xff] %v3139_v50   ;;  %v2310_v57 = vmax.f32 %v2182_v43, %v2246_v9  ;;  %v2248_v59 = vmul.f32 0.01, %v2184_v23  ;;  %v3144_v62 = vpack.c.bf16 %v2308_v33, %v2307_v51 }
 0x288   : > { %v2311_v36 = vmax.f32 %v2183_v1, %v2247_v21  ;;  %v2186_v6 = vadd.f32 %v4175_v14, %v2115_v2  ;;  %v2249_v19 = vmul.f32 0.01, %v2185_v44 }
 0x289   : > { %v3149_v38 = vpack.c.bf16 %v2310_v57, %v2309_v48  ;;  %v2312_v16 = vmax.f32 %v2184_v23, %v2248_v59  ;;  %3188 = vst [vmem:[%s3630_s6 + $0xe0] sm:$0xff] %v3144_v62  }
 0x28a   : > { %v2250_v25 = vmul.f32 0.01, %v2186_v6  ;;  %v2313_v45 = vmax.f32 %v2185_v44, %v2249_v19 }
 0x28b   : > { %3189 = vst [vmem:[%s3630_s6 + $0xe8] sm:$0xff] %v3149_v38   ;;  %v3154_v22 = vpack.c.bf16 %v2312_v16, %v2311_v36 }
 0x28c   : > { %v2314_v13 = vmax.f32 %v2186_v6, %v2250_v25 }
 0x28d   : > { %3190 = vst [vmem:[%s3630_s6 + $0xf0] sm:$0xff] %v3154_v22  }
 0x28e   : > { %v3159_v60 = vpack.c.bf16 %v2314_v13, %v2313_v45 }
 0x290   : > { %3191 = vst [vmem:[%s3630_s6 + $0xf8] sm:$0xff] %v3159_v60  }
 0x291 PF: > { %s14_s19 = sadd.s32 1, %s3555_s19   ;;  %s4423_s15 = smov %s3547_s17 }
 0x292   : > { %p11_p0 = scmp.ge.s32.totalorder %s14_s19, 6   ;;  %s4424_s16 = smov %s3551_s18 }
 0x293   : > { %s4425_s17 = smov %s4428_s20  ;;  %s4426_s18 = smov %s4432_s21 }
 0x294   :  { %13 = sbr.rel (!%p11_p0) target bundleno = 3 (0x3), region = 84 }

// kernel: reducedim2_forward.7
= control target key start
LH: loop header
LB: loop body
LE: loop exit
PB: predicated region body
PF: predicated region fallthrough
CT: control target
= control target key end

     0   :  { %s2244_s15 = smov 0   ;;  %s2246_s16 = smov 0   ;;  %s2661_s0 = inlined_call_operand.vmem [shape: bf16[256,288], index: 0, kind: input, shape index: {}]   ;;  %s2662_s1 = inlined_call_operand.vmem [shape: bf16[288,128], index: 1, kind: input, shape index: {}]   ;;  %s2663_s2 = inlined_call_operand.vmem [shape: f32[1,128], index: 2, kind: input, shape index: {}]   ;;  %s2664_s3 = inlined_call_operand.vmem [shape: f32[1,128], index: 3, kind: input, shape index: {}]   ;;  %s2665_s4 = inlined_call_operand.vmem [shape: bf16[256,128], index: 4, kind: output, shape index: {}]  }
   0x1   :  { %s2248_s17 = smov 0  }
   0x2 LB: > { %s26_s18 = sadd.s32 1, %s2212_s16  ;;  %p1649_p0 = scmp.ge.s32.totalorder %s2216_s17, 1  ;;  %s2216_s17 = sphi %s2248_s17, %s14_s17   ;;  %s2212_s16 = sphi %s2246_s16, %s2667_s16   ;;  %s2208_s15 = sphi %s2244_s15, %s2666_s15  }
   0x3   : > { %p28_p1 = scmp.ge.s32.totalorder %s26_s18, 2  ;;  %p186_p2 = scmp.lt.s32.totalorder %s2216_s17, 3 }
   0x5   : > { %s2669_s18 = smov (%p28_p1, %s26_s18), 0  ;;  %p187_p3 = pnand %p1649_p0, %p186_p2 }
   0x6   : > { %p236_p4 = scmp.eq.s32.totalorder (!%p187_p3), %s2208_s15, 0 }
   0x7   : > { %190 = sbr.rel (%p187_p3) target bundleno = 471 (0x1d7), region = 36 }
   0xc   : > { %241 = sbr.rel (!%p236_p4) target bundleno = 17 (0x11), region = 40  ;;  %v2218_v0 = vmov (%p236_p4), 0.0  }
   0xd   : > { %242 = vst [vmem:[#allocation3] sm:$0x1] (%p236_p4), %v2218_v0  ;;  %243 = vst [vmem:[#allocation4] sm:$0x1] (%p236_p4), %v2218_v0 }
  0x11 PF: > { %p1651_p5 = scmp.ne.s32.totalorder %s2208_s15, 0 }
  0x13   : > { %246 = sbr.rel (%p1651_p5) target bundleno = 383 (0x17f), region = 44 }
  0x18   : > { %v2110_v1 = vld [vmem:[%s2662_s1 + $0x78] sm:$0xff]   ;;  %v2112_v3 = vld [vmem:[%s2662_s1 + $0x70] sm:$0xff]   ;;  %v2114_v5 = vld [vmem:[%s2662_s1 + $0x68] sm:$0xff]   ;;  %vm695_vm0 = vcmask 261120  }
  0x19   : > { %v2111_v2 = vld [vmem:[%s2662_s1 + $0x38] sm:$0xff]   ;;  %1903 = vmatprep.subr.bf16.mxu0 %v2110_v1  ;;  %2069 = vmatprep.subr.bf16.mxu1 %v2110_v1  ;;  %v2113_v4 = vld [vmem:[%s2662_s1 + $0x30] sm:$0xff]   ;;  %v2115_v6 = vld [vmem:[%s2662_s1 + $0x28] sm:$0xff]  }
  0x1a   : > { %1904 = vmatpush3.bf16.msra.mxu0 %v2111_v2  ;;  %2077 = vmatpush3.bf16.msra.mxu1 %v2111_v2  ;;  %v2116_v7 = vld [vmem:[%s2662_s1 + $0x60] sm:$0xff]   ;;  %v2118_v9 = vld [vmem:[%s2662_s1 + $0x58] sm:$0xff]   ;;  %v2120_v11 = vld [vmem:[%s2662_s1 + $0x50] sm:$0xff]  }
  0x1b   : > { %1905 = vmatprep.subr.bf16.mxu0 %v2112_v3  ;;  %2070 = vmatprep.subr.bf16.mxu1 %v2112_v3  ;;  %v2117_v8 = vld [vmem:[%s2662_s1 + $0x20] sm:$0xff]   ;;  %v2119_v10 = vld [vmem:[%s2662_s1 + $0x18] sm:$0xff]   ;;  %v2121_v14 = vld [vmem:[%s2662_s1 + $0x10] sm:$0xff]  }
  0x1c   : > { %v2128_v12 = vld [vmem:[%s2661_s0 + $0x4] ss:$12 sps:$4 sm:$0xff]   ;;  %v2122_v15 = vld [vmem:[%s2662_s1 + $0x48] sm:$0xff]   ;;  %v2139_v27 = vld [vmem:[%s2661_s0 + $0x34] ss:$12 sps:$4 sm:$0xff]  }
  0x1d   : > { %v2131_v13 = vld [vmem:[%s2661_s0 + $0x124] ss:$12 sps:$4 sm:$0xff]   ;;  %776 = vmatprep.mubr.bf16.mxu0 %v2128_v12  ;;  %v2123_v16 = vld [vmem:[%s2662_s1 + $0x8] sm:$0xff]   ;;  %v2141_v28 = vld [vmem:[%s2661_s0 + $0x154] ss:$12 sps:$4 sm:$0xff]  }
  0x1e   : > { %1906 = vmatpush3.bf16.msra.mxu0 %v2113_v4  ;;  %2078 = vmatpush3.bf16.msra.mxu1 %v2113_v4  ;;  %v2124_v17 = vld [vmem:[%s2662_s1 + $0x40] sm:$0xff]   ;;  %v2138_v19 = vld [vmem:[%s2662_s1 + $0x88] sm:$0xff]   ;;  %v2143_v29 = vld [vmem:[%s2661_s0 + $0x30] ss:$12 sps:$4 sm:$0xff]  }
  0x1f   : > { %1907 = vmatprep.subr.bf16.mxu0 %v2114_v5  ;;  %2071 = vmatprep.subr.bf16.mxu1 %v2114_v5  ;;  %v2125_v18 = vld [vmem:[%s2662_s1] sm:$0xff]   ;;  %v2132_v22 = vld [vmem:[%s2661_s0 + $0x1c] ss:$12 sps:$4 sm:$0xff]   ;;  %v2145_v31 = vld [vmem:[%s2661_s0 + $0x4c] ss:$12 sps:$4 sm:$0xff]  }
  0x20   : > { %872 = vmatprep.mubr.bf16.mxu1 %v2131_v13  ;;  %v2126_v20 = vld [vmem:[%s2661_s0] ss:$12 sps:$4 sm:$0xff]   ;;  %v2134_v23 = vld [vmem:[%s2661_s0 + $0x13c] ss:$12 sps:$4 sm:$0xff]   ;;  %v2136_v25 = vld [vmem:[%s2661_s0 + $0x18] ss:$12 sps:$4 sm:$0xff]  }
  0x21   : > { %v2129_v21 = vld [vmem:[%s2661_s0 + $0x120] ss:$12 sps:$4 sm:$0xff]   ;;  %v2137_v26 = vld [vmem:[%s2661_s0 + $0x138] ss:$12 sps:$4 sm:$0xff]   ;;  %v2144_v30 = vld [vmem:[%s2661_s0 + $0x150] ss:$12 sps:$4 sm:$0xff]  }
  0x22   : > { %1908 = vmatpush3.bf16.msra.mxu0 %v2115_v6  ;;  %2079 = vmatpush3.bf16.msra.mxu1 %v2115_v6  ;;  %v2151_v24 = vld [vmem:[%s2662_s1 + $0x80] sm:$0xff]   ;;  %v2147_v32 = vld [vmem:[%s2661_s0 + $0x16c] ss:$12 sps:$4 sm:$0xff]   ;;  %v2149_v33 = vld [vmem:[%s2661_s0 + $0x48] ss:$12 sps:$4 sm:$0xff]  }
  0x23   : > { %1909 = vmatprep.subr.bf16.mxu0 %v2116_v7  ;;  %2072 = vmatprep.subr.bf16.mxu1 %v2116_v7  ;;  %v2150_v34 = vld [vmem:[%s2661_s0 + $0x168] ss:$12 sps:$4 sm:$0xff]   ;;  %v2152_v35 = vld [vmem:[%s2661_s0 + $0x64] ss:$12 sps:$4 sm:$0xff]   ;;  %v2155_v37 = vld [vmem:[%s2661_s0 + $0x60] ss:$12 sps:$4 sm:$0xff]  }
  0x24   : > { %v2154_v36 = vld [vmem:[%s2661_s0 + $0x8] ss:$12 sps:$4 sm:$0xff]   ;;  %v2156_v38 = vld [vmem:[%s2661_s0 + $0x20] ss:$12 sps:$4 sm:$0xff]   ;;  %v2159_v40 = vld [vmem:[%s2661_s0 + $0x38] ss:$12 sps:$4 sm:$0xff]  }
  0x25   : > { %v2157_v39 = vld [vmem:[%s2661_s0 + $0x7c] ss:$12 sps:$4 sm:$0xff]   ;;  %v2160_v41 = vld [vmem:[%s2661_s0 + $0x78] ss:$12 sps:$4 sm:$0xff]   ;;  %v2162_v43 = vld [vmem:[%s2661_s0 + $0x94] ss:$12 sps:$4 sm:$0xff]  }
  0x26   : > { %1910 = vmatpush3.bf16.msra.mxu0 %v2117_v8  ;;  %2080 = vmatpush3.bf16.msra.mxu1 %v2117_v8  ;;  %v2161_v42 = vld [vmem:[%s2661_s0 + $0x50] ss:$12 sps:$4 sm:$0xff]   ;;  %v2164_v44 = vld [vmem:[%s2661_s0 + $0x68] ss:$12 sps:$4 sm:$0xff]   ;;  %v2166_v46 = vld [vmem:[%s2661_s0 + $0x80] ss:$12 sps:$4 sm:$0xff]  }
  0x27   : > { %1911 = vmatprep.subr.bf16.mxu0 %v2118_v9  ;;  %2073 = vmatprep.subr.bf16.mxu1 %v2118_v9  ;;  %v2165_v45 = vld [vmem:[%s2661_s0 + $0x90] ss:$12 sps:$4 sm:$0xff]   ;;  %v2167_v47 = vld [vmem:[%s2661_s0 + $0xac] ss:$12 sps:$4 sm:$0xff]   ;;  %v2170_v49 = vld [vmem:[%s2661_s0 + $0xa8] ss:$12 sps:$4 sm:$0xff]  }
  0x28   : > { %v2169_v48 = vld [vmem:[%s2661_s0 + $0x98] ss:$12 sps:$4 sm:$0xff]   ;;  %v2171_v50 = vld [vmem:[%s2661_s0 + $0xb0] ss:$12 sps:$4 sm:$0xff]   ;;  %v2174_v52 = vld [vmem:[%s2661_s0 + $0xc8] ss:$12 sps:$4 sm:$0xff]  }
  0x29   : > { %v2172_v51 = vld [vmem:[%s2661_s0 + $0xc4] ss:$12 sps:$4 sm:$0xff]   ;;  %v2175_v53 = vld [vmem:[%s2661_s0 + $0xc0] ss:$12 sps:$4 sm:$0xff]   ;;  %v2177_v55 = vld [vmem:[%s2661_s0 + $0xdc] ss:$12 sps:$4 sm:$0xff]  }
  0x2a   : > { %1912 = vmatpush3.bf16.msra.mxu0 %v2119_v10  ;;  %2081 = vmatpush3.bf16.msra.mxu1 %v2119_v10  ;;  %v2176_v54 = vld [vmem:[%s2661_s0 + $0xe0] ss:$12 sps:$4 sm:$0xff]   ;;  %v2179_v56 = vld [vmem:[%s2661_s0 + $0xf8] ss:$12 sps:$4 sm:$0xff]   ;;  %v2181_v58 = vld [vmem:[%s2661_s0 + $0x110] ss:$12 sps:$4 sm:$0xff]  }
  0x2b   : > { %1913 = vmatprep.subr.bf16.mxu0 %v2120_v11  ;;  %2074 = vmatprep.subr.bf16.mxu1 %v2120_v11  ;;  %v2180_v57 = vld [vmem:[%s2661_s0 + $0xd8] ss:$12 sps:$4 sm:$0xff]   ;;  %v2182_v59 = vld [vmem:[%s2661_s0 + $0xf4] ss:$12 sps:$4 sm:$0xff]   ;;  %v2185_v61 = vld [vmem:[%s2661_s0 + $0xf0] ss:$12 sps:$4 sm:$0xff]  }
  0x2c   : > { %v2184_v60 = vld [vmem:[%s2661_s0 + $0x128] ss:$12 sps:$4 sm:$0xff]   ;;  %v2186_v62 = vld [vmem:[%s2661_s0 + $0x140] ss:$12 sps:$4 sm:$0xff]   ;;  %v2189_v0 = vld [vmem:[%s2661_s0 + $0x158] ss:$12 sps:$4 sm:$0xff]  }
  0x2d   : > { %v2187_v63 = vld [vmem:[%s2661_s0 + $0x10c] ss:$12 sps:$4 sm:$0xff]   ;;  %v2190_v1 = vld [vmem:[%s2661_s0 + $0x108] ss:$12 sps:$4 sm:$0xff]   ;;  %v2191_v2 = vld [vmem:[%s2661_s0 + $0x170] ss:$12 sps:$4 sm:$0xff]  }
  0x2e   : > { %1914 = vmatpush3.bf16.msra.mxu0 %v2121_v14  ;;  %2082 = vmatpush3.bf16.msra.mxu1 %v2121_v14 }
  0x2f   : > { %1915 = vmatprep.subr.bf16.mxu0 %v2122_v15  ;;  %2075 = vmatprep.subr.bf16.mxu1 %v2122_v15 }
  0x32   : > { %1916 = vmatpush3.bf16.msra.mxu0 %v2123_v16  ;;  %2083 = vmatpush3.bf16.msra.mxu1 %v2123_v16 }
  0x33   : > { %1917 = vmatprep.subr.bf16.mxu0 %v2124_v17  ;;  %2076 = vmatprep.subr.bf16.mxu1 %v2124_v17 }
  0x36   : > { %1918 = vmatpush3.bf16.msra.mxu0 %v2125_v18  ;;  %2084 = vmatpush3.bf16.msra.mxu1 %v2125_v18 }
  0x37   : > { %2033 = vmatprep.subr.bf16.mxu1 %v2138_v19 }
  0x39   : > { %777 = vmatmul.mubr.bf16.vlgmr.msra.gmra.mxu0 %v2126_v20  ;;  %873 = vmatmul.mubr.bf16.vlgmr.msra.gmra.mxu1 %v2129_v21 }
  0x3a   : > { %784 = vmatprep.mubr.bf16.mxu0 %v2132_v22  ;;  %880 = vmatprep.mubr.bf16.mxu1 %v2134_v23 }
  0x3b   : > { %2034 = vmatpush3.bf16.msra.mxu1 %v2138_v19 }
  0x3c   : > { %2035 = vmatprep.subr.bf16.mxu1 %v2151_v24 }
  0x3f   : > { %2036 = vmatpush3.bf16.msra.mxu1 %v2151_v24 }
  0x41   : > { %785 = vmatmul.mubr.bf16.gmra.mxu0 %v2136_v25  ;;  %881 = vmatmul.mubr.bf16.gmra.mxu1 %v2137_v26 }
  0x42   : > { %792 = vmatprep.mubr.bf16.mxu0 %v2139_v27  ;;  %888 = vmatprep.mubr.bf16.mxu1 %v2141_v28 }
  0x49   : > { %793 = vmatmul.mubr.bf16.gmra.mxu0 %v2143_v29  ;;  %889 = vmatmul.mubr.bf16.gmra.mxu1 %v2144_v30 }
  0x4a   : > { %800 = vmatprep.mubr.bf16.mxu0 %v2145_v31  ;;  %896 = vmatprep.mubr.bf16.mxu1 %v2147_v32 }
  0x51   : > { %801 = vmatmul.mubr.bf16.gmra.mxu0 %v2149_v33  ;;  %897 = vmatmul.mubr.bf16.gmra.mxu1 %v2150_v34 }
  0x52   : > { %808 = vmatprep.mubr.bf16.mxu0 %v2152_v35  ;;  %2037 = vmatprep.mubr.msk.bf16.mxu1 %vm695_vm0, %v2154_v36 }
  0x59   : > { %809 = vmatmul.mubr.bf16.gmra.mxu0 %v2155_v37  ;;  %2038 = vmatmul.mubr.msk.bf16.vlgmr.msra.gmra.mxu1 %vm695_vm0, %v2156_v38 }
  0x5a   : > { %816 = vmatprep.mubr.bf16.mxu0 %v2157_v39  ;;  %2041 = vmatprep.mubr.msk.bf16.mxu1 %vm695_vm0, %v2159_v40 }
  0x61   : > { %817 = vmatmul.mubr.bf16.gmra.mxu0 %v2160_v41  ;;  %2042 = vmatmul.mubr.msk.bf16.gmra.mxu1 %vm695_vm0, %v2161_v42 }
  0x62   : > { %824 = vmatprep.mubr.bf16.mxu0 %v2162_v43  ;;  %2045 = vmatprep.mubr.msk.bf16.mxu1 %vm695_vm0, %v2164_v44 }
  0x69   : > { %825 = vmatmul.mubr.bf16.gmra.mxu0 %v2165_v45  ;;  %2046 = vmatmul.mubr.msk.bf16.gmra.mxu1 %vm695_vm0, %v2166_v46 }
  0x6a   : > { %832 = vmatprep.mubr.bf16.mxu0 %v2167_v47  ;;  %2049 = vmatprep.mubr.msk.bf16.mxu1 %vm695_vm0, %v2169_v48 }
  0x71   : > { %833 = vmatmul.mubr.bf16.gmra.mxu0 %v2170_v49  ;;  %2050 = vmatmul.mubr.msk.bf16.gmra.mxu1 %vm695_vm0, %v2171_v50 }
  0x72   : > { %840 = vmatprep.mubr.bf16.mxu0 %v2172_v51  ;;  %2053 = vmatprep.mubr.msk.bf16.mxu1 %vm695_vm0, %v2174_v52 }
  0x79   : > { %841 = vmatmul.mubr.bf16.gmra.mxu0 %v2175_v53  ;;  %2054 = vmatmul.mubr.msk.bf16.gmra.mxu1 %vm695_vm0, %v2176_v54 }
  0x7a   : > { %848 = vmatprep.mubr.bf16.mxu0 %v2177_v55  ;;  %2057 = vmatprep.mubr.msk.bf16.mxu1 %vm695_vm0, %v2179_v56 }
  0x81   : > { %849 = vmatmul.mubr.bf16.gmra.mxu0 %v2180_v57  ;;  %2058 = vmatmul.mubr.msk.bf16.gmra.mxu1 %vm695_vm0, %v2181_v58 }
  0x82   : > { %856 = vmatprep.mubr.bf16.mxu0 %v2182_v59  ;;  %2061 = vmatprep.mubr.msk.bf16.mxu1 %vm695_vm0, %v2184_v60 }
  0x89   : > { %857 = vmatmul.mubr.bf16.gmra.mxu0 %v2185_v61  ;;  %2062 = vmatmul.mubr.msk.bf16.gmra.mxu1 %vm695_vm0, %v2186_v62 }
  0x8a   : > { %864 = vmatprep.mubr.bf16.mxu0 %v2187_v63  ;;  %2065 = vmatprep.mubr.msk.bf16.mxu1 %vm695_vm0, %v2189_v0 }
  0x91   : > { %865 = vmatmul.mubr.bf16.gmra.mxu0 %v2190_v1  ;;  %2066 = vmatmul.mubr.msk.bf16.gmra.mxu1 %vm695_vm0, %v2191_v2 }
  0xf9   : > { %v1919_v3 = vpop.f32.mrf.mxu0  ;;  %v1991_v4 = vpop.f32.mrf.mxu1 }
  0xfb   : > { %v1920_v5 = vpop.f32.mrf.mxu0  ;;  %v1992_v6 = vpop.f32.mrf.mxu1 }
  0xfc   : > { %v2480_v7 = vadd.f32 %v1992_v6, %v1991_v4  ;;  %v1921_v44 = vadd.f32 %v1920_v5, %v1919_v3 }
  0xfd   : > { %v1922_v8 = vpop.f32.mrf.mxu0  ;;  %v1994_v9 = vpop.f32.mrf.mxu1 }
  0xff   : > { %v1923_v10 = vpop.f32.mrf.mxu0  ;;  %v1995_v11 = vpop.f32.mrf.mxu1 }
 0x100   : > { %v2482_v12 = vadd.f32 %v1995_v11, %v1994_v9  ;;  %v1924_v52 = vadd.f32 %v1923_v10, %v1922_v8 }
 0x101   : > { %v1925_v13 = vpop.f32.mrf.mxu0  ;;  %v1997_v14 = vpop.f32.mrf.mxu1 }
 0x103   : > { %v1926_v15 = vpop.f32.mrf.mxu0  ;;  %v1998_v16 = vpop.f32.mrf.mxu1 }
 0x104   : > { %v2484_v17 = vadd.f32 %v1998_v16, %v1997_v14  ;;  %v1927_v41 = vadd.f32 %v1926_v15, %v1925_v13 }
 0x105   : > { %v1928_v18 = vpop.f32.mrf.mxu0  ;;  %v2000_v19 = vpop.f32.mrf.mxu1 }
 0x107   : > { %v1929_v20 = vpop.f32.mrf.mxu0  ;;  %v2001_v21 = vpop.f32.mrf.mxu1 }
 0x108   : > { %v2486_v22 = vadd.f32 %v2001_v21, %v2000_v19  ;;  %v1930_v48 = vadd.f32 %v1929_v20, %v1928_v18 }
 0x109   : > { %v1931_v23 = vpop.f32.mrf.mxu0  ;;  %v2003_v24 = vpop.f32.mrf.mxu1 }
 0x10b   : > { %v1932_v25 = vpop.f32.mrf.mxu0  ;;  %v2004_v26 = vpop.f32.mrf.mxu1 }
 0x10c   : > { %v2488_v27 = vadd.f32 %v2004_v26, %v2003_v24  ;;  %v1933_v0 = vadd.f32 %v1932_v25, %v1931_v23 }
 0x10d   : > { %v1934_v28 = vpop.f32.mrf.mxu0  ;;  %v2006_v29 = vpop.f32.mrf.mxu1 }
 0x10f   : > { %v1935_v30 = vpop.f32.mrf.mxu0  ;;  %v2007_v31 = vpop.f32.mrf.mxu1 }
 0x110   : > { %v2490_v32 = vadd.f32 %v2007_v31, %v2006_v29  ;;  %v1936_v16 = vadd.f32 %v1935_v30, %v1934_v28 }
 0x111   : > { %v1937_v33 = vpop.f32.mrf.mxu0  ;;  %v2492_v34 = vpop.f32.mrf.mxu1 }
 0x113   : > { %v1938_v35 = vpop.f32.mrf.mxu0  ;;  %v2494_v36 = vpop.f32.mrf.mxu1 }
 0x114   : > { %v1939_v56 = vadd.f32 %v1938_v35, %v1937_v33 }
 0x115   : > { %v1940_v37 = vpop.f32.mrf.mxu0  ;;  %v2496_v38 = vpop.f32.mrf.mxu1 }
 0x117   : > { %v1941_v39 = vpop.f32.mrf.mxu0  ;;  %v2498_v40 = vpop.f32.mrf.mxu1 }
 0x118   : > { %v1942_v3 = vadd.f32 %v1941_v39, %v1940_v37 }
 0x119   : > { %v1943_v42 = vpop.f32.mrf.mxu0  ;;  %v2039_v43 = vpop.f32.mrf.mxu1 }
 0x11a   : > { %v948_v45 = vadd.f32 %v2039_v43, %v1927_v41 }
 0x11b   : > { %v1944_v46 = vpop.f32.mrf.mxu0  ;;  %v939_v47 = vpop.f32.mrf.mxu1 }
 0x11c   : > { %1070 = vst [vmem:[#allocation2 + $0xd8] sm:$0xff] %v948_v45  ;;  %v940_v49 = vadd.f32 %v1921_v44, %v939_v47  ;;  %v1143_v4 = vmul.f32 %v948_v45, %v948_v45  ;;  %v1945_v31 = vadd.f32 %v1944_v46, %v1943_v42 }
 0x11d   : > { %v1946_v50 = vpop.f32.mrf.mxu0  ;;  %v2040_v51 = vpop.f32.mrf.mxu1 }
 0x11e   : > { %1068 = vst [vmem:[#allocation2 + $0xb0] sm:$0xff] %v940_v49  ;;  %v951_v53 = vadd.f32 %v2040_v51, %v1930_v48  ;;  %v1141_v60 = vmul.f32 %v940_v49, %v940_v49 }
 0x11f   : > { %v1947_v54 = vpop.f32.mrf.mxu0  ;;  %v942_v55 = vpop.f32.mrf.mxu1 }
 0x120   : > { %1071 = vst [vmem:[#allocation2 + $0x18] sm:$0xff] %v951_v53  ;;  %v943_v57 = vadd.f32 %v1924_v52, %v942_v55  ;;  %v1144_v11 = vmul.f32 %v951_v53, %v951_v53  ;;  %v1948_v51 = vadd.f32 %v1947_v54, %v1946_v50 }
 0x121   : > { %v1949_v58 = vpop.f32.mrf.mxu0  ;;  %v2043_v59 = vpop.f32.mrf.mxu1 }
 0x122   : > { %1069 = vst [vmem:[#allocation2] sm:$0xff] %v943_v57  ;;  %v1101_v61 = vadd.f32 %v943_v57, %v940_v49  ;;  %v1142_v62 = vmul.f32 %v943_v57, %v943_v57  ;;  %v964_v63 = vadd.f32 %v2043_v59, %v1939_v56 }
 0x123   : > { %v1950_v1 = vpop.f32.mrf.mxu0  ;;  %v955_v2 = vpop.f32.mrf.mxu1 }
 0x124   : > { %v1102_v5 = vadd.f32 %v1101_v61, %v948_v45  ;;  %v1173_v6 = vadd.f32 %v1142_v62, %v1141_v60  ;;  %1074 = vst [vmem:[#allocation2 + $0x30] sm:$0xff] %v964_v63  ;;  %v956_v8 = vadd.f32 %v1933_v0, %v955_v2  ;;  %v1951_v20 = vadd.f32 %v1950_v1, %v1949_v58 }
 0x125   : > { %v1952_v9 = vpop.f32.mrf.mxu0  ;;  %v2044_v10 = vpop.f32.mrf.mxu1  ;;  %v1147_v44 = vmul.f32 %v964_v63, %v964_v63 }
 0x126   : > { %v1174_v13 = vadd.f32 %v1173_v6, %v1143_v4  ;;  %v1103_v14 = vadd.f32 %v1102_v5, %v951_v53  ;;  %v967_v15 = vadd.f32 %v2044_v10, %v1942_v3  ;;  %1072 = vst [vmem:[#allocation2 + $0x50] sm:$0xff] %v956_v8  ;;  %v1145_v23 = vmul.f32 %v956_v8, %v956_v8 }
 0x127   : > { %v1953_v18 = vpop.f32.mrf.mxu0  ;;  %v958_v19 = vpop.f32.mrf.mxu1 }
 0x128   : > { %v1104_v21 = vadd.f32 %v1103_v14, %v956_v8  ;;  %v1175_v24 = vadd.f32 %v1174_v13, %v1144_v11  ;;  %1075 = vst [vmem:[#allocation2 + $0x48] sm:$0xff] %v967_v15  ;;  %v959_v25 = vadd.f32 %v1936_v16, %v958_v19  ;;  %v1954_v28 = vadd.f32 %v1953_v18, %v1952_v9 }
 0x129   : > { %v1955_v26 = vpop.f32.mrf.mxu0  ;;  %v2047_v29 = vpop.f32.mrf.mxu1  ;;  %v1148_v53 = vmul.f32 %v967_v15, %v967_v15 }
 0x12a   : > { %v1176_v33 = vadd.f32 %v1175_v24, %v1145_v23  ;;  %v980_v35 = vadd.f32 %v2047_v29, %v1951_v20  ;;  %1073 = vst [vmem:[#allocation2 + $0x68] sm:$0xff] %v959_v25  ;;  %v1105_v37 = vadd.f32 %v1104_v21, %v959_v25  ;;  %v1146_v39 = vmul.f32 %v959_v25, %v959_v25 }
 0x12b   : > { %v1956_v41 = vpop.f32.mrf.mxu0  ;;  %v971_v43 = vpop.f32.mrf.mxu1 }
 0x12c   : > { %1078 = vst [vmem:[#allocation2 + $0xe8] sm:$0xff] %v980_v35  ;;  %v972_v30 = vadd.f32 %v1945_v31, %v971_v43  ;;  %v1106_v45 = vadd.f32 %v1105_v37, %v964_v63  ;;  %v1177_v47 = vadd.f32 %v1176_v33, %v1146_v39  ;;  %v1957_v0 = vadd.f32 %v1956_v41, %v1955_v26 }
 0x12d   : > { %v1958_v48 = vpop.f32.mrf.mxu0  ;;  %v2048_v49 = vpop.f32.mrf.mxu1  ;;  %v1151_v5 = vmul.f32 %v980_v35, %v980_v35 }
 0x12e   : > { %1076 = vst [vmem:[#allocation2 + $0x80] sm:$0xff] %v972_v30  ;;  %v983_v52 = vadd.f32 %v2048_v49, %v1954_v28  ;;  %v1178_v42 = vadd.f32 %v1177_v47, %v1147_v44  ;;  %v1107_v46 = vadd.f32 %v1106_v45, %v967_v15  ;;  %v1149_v59 = vmul.f32 %v972_v30, %v972_v30 }
 0x12f   : > { %v1959_v55 = vpop.f32.mrf.mxu0  ;;  %v974_v56 = vpop.f32.mrf.mxu1 }
 0x130   : > { %1079 = vst [vmem:[#allocation2 + $0xb8] sm:$0xff] %v983_v52  ;;  %v975_v57 = vadd.f32 %v1948_v51, %v974_v56  ;;  %v1108_v58 = vadd.f32 %v1107_v46, %v972_v30  ;;  %v1179_v60 = vadd.f32 %v1178_v42, %v1148_v53  ;;  %v1960_v10 = vadd.f32 %v1959_v55, %v1958_v48 }
 0x131   : > { %v1961_v61 = vpop.f32.mrf.mxu0  ;;  %v2051_v62 = vpop.f32.mrf.mxu1  ;;  %v1152_v20 = vmul.f32 %v983_v52, %v983_v52 }
 0x132   : > { %1077 = vst [vmem:[#allocation2 + $0x88] sm:$0xff] %v975_v57  ;;  %v1150_v63 = vmul.f32 %v975_v57, %v975_v57  ;;  %v1180_v1 = vadd.f32 %v1179_v60, %v1149_v59  ;;  %v1109_v2 = vadd.f32 %v1108_v58, %v975_v57 }
 0x133   : > { %v1962_v50 = vpop.f32.mrf.mxu0  ;;  %v987_v54 = vpop.f32.mrf.mxu1 }
 0x134   : > { %v1963_v3 = vadd.f32 %v1962_v50, %v1961_v61  ;;  %v988_v4 = vadd.f32 %v1957_v0, %v987_v54  ;;  %v1181_v6 = vadd.f32 %v1180_v1, %v1150_v63  ;;  %v1110_v11 = vadd.f32 %v1109_v2, %v980_v35 }
 0x135   : > { %v1964_v8 = vpop.f32.mrf.mxu0  ;;  %v2052_v9 = vpop.f32.mrf.mxu1 }
 0x136   : > { %v996_v13 = vadd.f32 %v2051_v62, %v1963_v3  ;;  %1080 = vst [vmem:[#allocation2 + $0x60] sm:$0xff] %v988_v4  ;;  %v1182_v14 = vadd.f32 %v1181_v6, %v1151_v5  ;;  %v1111_v24 = vadd.f32 %v1110_v11, %v983_v52  ;;  %v1153_v35 = vmul.f32 %v988_v4, %v988_v4 }
 0x137   : > { %v1965_v15 = vpop.f32.mrf.mxu0  ;;  %v990_v16 = vpop.f32.mrf.mxu1 }
 0x138   : > { %1082 = vst [vmem:[#allocation2 + $0x8] sm:$0xff] %v996_v13  ;;  %v1966_v18 = vadd.f32 %v1965_v15, %v1964_v8  ;;  %v991_v19 = vadd.f32 %v1960_v10, %v990_v16  ;;  %v1183_v26 = vadd.f32 %v1182_v14, %v1152_v20  ;;  %v1112_v41 = vadd.f32 %v1111_v24, %v988_v4 }
 0x139   : > { %v1967_v21 = vpop.f32.mrf.mxu0  ;;  %v2055_v23 = vpop.f32.mrf.mxu1  ;;  %v1155_v56 = vmul.f32 %v996_v13, %v996_v13  ;;  %v2011_v24 = vadd.f32 %v2494_v36, %v2492_v34  ;;  %v2014_v34 = vadd.f32 %v2498_v40, %v2496_v38 }
 0x13a   : > { %v999_v25 = vadd.f32 %v2052_v9, %v1966_v18  ;;  %1081 = vst [vmem:[#allocation2 + $0xf0] sm:$0xff] %v991_v19  ;;  %v1184_v28 = vadd.f32 %v1183_v26, %v1153_v35  ;;  %v1154_v30 = vmul.f32 %v991_v19, %v991_v19  ;;  %v1113_v51 = vadd.f32 %v1112_v41, %v991_v19 }
 0x13b   : > { %v1968_v29 = vpop.f32.mrf.mxu0  ;;  %v1003_v31 = vpop.f32.mrf.mxu1 }
 0x13c   : > { %1083 = vst [vmem:[#allocation2 + $0x78] sm:$0xff] %v999_v25  ;;  %v1969_v33 = vadd.f32 %v1968_v29, %v1967_v21  ;;  %v1185_v53 = vadd.f32 %v1184_v28, %v1154_v30  ;;  %v1114_v59 = vadd.f32 %v1113_v51, %v996_v13  ;;  %v1156_v1 = vmul.f32 %v999_v25, %v999_v25 }
 0x13d   : > { %v1970_v37 = vpop.f32.mrf.mxu0  ;;  %v2056_v39 = vpop.f32.mrf.mxu1 }
 0x13e   : > { %v1004_v43 = vadd.f32 %v1969_v33, %v1003_v31  ;;  %v1186_v61 = vadd.f32 %v1185_v53, %v1155_v56  ;;  %v1115_v54 = vadd.f32 %v1114_v59, %v999_v25 }
 0x13f   : > { %v1971_v44 = vpop.f32.mrf.mxu0  ;;  %v1006_v45 = vpop.f32.mrf.mxu1 }
 0x140   : > { %1084 = vst [vmem:[#allocation2 + $0x38] sm:$0xff] %v1004_v43  ;;  %v1972_v47 = vadd.f32 %v1971_v44, %v1970_v37  ;;  %v1157_v5 = vmul.f32 %v1004_v43, %v1004_v43  ;;  %v1187_v6 = vadd.f32 %v1186_v61, %v1156_v1  ;;  %v1116_v16 = vadd.f32 %v1115_v54, %v1004_v43 }
 0x141   : > { %v1973_v48 = vpop.f32.mrf.mxu0  ;;  %v2500_v49 = vpop.f32.mrf.mxu1 }
 0x142   : > { %v1007_v52 = vadd.f32 %v1972_v47, %v1006_v45 }
 0x143   : > { %v1974_v42 = vpop.f32.mrf.mxu0  ;;  %v1019_v46 = vpop.f32.mrf.mxu1 }
 0x144   : > { %1085 = vst [vmem:[#allocation2 + $0x58] sm:$0xff] %v1007_v52  ;;  %v1975_v55 = vadd.f32 %v1974_v42, %v1973_v48  ;;  %v1158_v11 = vmul.f32 %v1007_v52, %v1007_v52  ;;  %v1117_v25 = vadd.f32 %v1116_v16, %v1007_v52 }
 0x145   : > { %v1976_v57 = vpop.f32.mrf.mxu0  ;;  %v2502_v58 = vpop.f32.mrf.mxu1 }
 0x146   : > { %v1012_v60 = vadd.f32 %v2055_v23, %v1975_v55 }
 0x147   : > { %v1977_v62 = vpop.f32.mrf.mxu0  ;;  %v1022_v0 = vpop.f32.mrf.mxu1 }
 0x148   : > { %1086 = vst [vmem:[#allocation2 + $0x40] sm:$0xff] %v1012_v60  ;;  %v1978_v63 = vadd.f32 %v1977_v62, %v1976_v57  ;;  %v1159_v20 = vmul.f32 %v1012_v60, %v1012_v60  ;;  %v1118_v35 = vadd.f32 %v1117_v25, %v1012_v60 }
 0x149   : > { %v1979_v2 = vpop.f32.mrf.mxu0  ;;  %v2063_v50 = vpop.f32.mrf.mxu1 }
 0x14a   : > { %v1015_v3 = vadd.f32 %v2056_v39, %v1978_v63  ;;  %v2505_v4 = vadd.f32 %v2063_v50, %v2484_v17  ;;  %v1188_v17 = vadd.f32 %v1187_v6, %v1157_v5 }
 0x14b   : > { %v1980_v8 = vpop.f32.mrf.mxu0  ;;  %v1035_v9 = vpop.f32.mrf.mxu1 }
 0x14c   : > { %1087 = vst [vmem:[#allocation2 + $0xc8] sm:$0xff] %v1015_v3  ;;  %1094 = vst [vmem:[#allocation2 + $0x10] sm:$0xff] %v2505_v4  ;;  %v1981_v10 = vadd.f32 %v1980_v8, %v1979_v2  ;;  %v1036_v13 = vadd.f32 %v2480_v7, %v1035_v9  ;;  %v1189_v26 = vadd.f32 %v1188_v17, %v1158_v11 }
 0x14d   : > { %v1982_v14 = vpop.f32.mrf.mxu0  ;;  %v2064_v15 = vpop.f32.mrf.mxu1  ;;  %v1160_v29 = vmul.f32 %v1015_v3, %v1015_v3  ;;  %v1119_v36 = vadd.f32 %v1118_v35, %v1015_v3  ;;  %v1167_v5 = vmul.f32 %v2505_v4, %v2505_v4 }
 0x14e   : > { %v1020_v18 = vadd.f32 %v1981_v10, %v1019_v46  ;;  %v2510_v19 = vadd.f32 %v2064_v15, %v2486_v22  ;;  %1092 = vst [vmem:[#allocation2 + $0xa8] sm:$0xff] %v1036_v13  ;;  %v1190_v41 = vadd.f32 %v1189_v26, %v1159_v20  ;;  %v1165_v63 = vmul.f32 %v1036_v13, %v1036_v13 }
 0x14f   : > { %v1983_v21 = vpop.f32.mrf.mxu0  ;;  %v1038_v23 = vpop.f32.mrf.mxu1 }
 0x150   : > { %1088 = vst [vmem:[#allocation2 + $0xe0] sm:$0xff] %v1020_v18  ;;  %1095 = vst [vmem:[#allocation2 + $0x28] sm:$0xff] %v2510_v19  ;;  %v1984_v7 = vadd.f32 %v1983_v21, %v1982_v14  ;;  %v1039_v31 = vadd.f32 %v2482_v12, %v1038_v23  ;;  %v1161_v30 = vmul.f32 %v1020_v18, %v1020_v18 }
 0x151   : > { %v1985_v33 = vpop.f32.mrf.mxu0  ;;  %v2067_v22 = vpop.f32.mrf.mxu1  ;;  %v1191_v45 = vadd.f32 %v1190_v41, %v1160_v29  ;;  %v1120_v51 = vadd.f32 %v1119_v36, %v1020_v18 }
 0x152   : > { %v1023_v37 = vadd.f32 %v1984_v7, %v1022_v0  ;;  %v1060_v39 = vadd.f32 %v2067_v22, %v2011_v24  ;;  %1093 = vst [vmem:[#allocation2 + $0xd0] sm:$0xff] %v1039_v31  ;;  %v1166_v50 = vmul.f32 %v1039_v31, %v1039_v31 }
 0x153   : > { %v1986_v43 = vpop.f32.mrf.mxu0  ;;  %v1051_v28 = vpop.f32.mrf.mxu1  ;;  %v1192_v56 = vadd.f32 %v1191_v45, %v1161_v30 }
 0x154   : > { %1089 = vst [vmem:[#allocation2 + $0x90] sm:$0xff] %v1023_v37  ;;  %1098 = vst [vmem:[#allocation2 + $0x20] sm:$0xff] %v1060_v39  ;;  %v1987_v44 = vadd.f32 %v1986_v43, %v1985_v33  ;;  %v1052_v12 = vadd.f32 %v2488_v27, %v1051_v28  ;;  %v1162_v52 = vmul.f32 %v1023_v37, %v1023_v37  ;;  %v1140_v28 = vld [vmem:[#allocation4] sm:$0x1] }
 0x155   : > { %v1988_v47 = vpop.f32.mrf.mxu0  ;;  %v2068_v48 = vpop.f32.mrf.mxu1  ;;  %v1121_v38 = vadd.f32 %v1120_v51, %v1023_v37  ;;  %v1171_v18 = vmul.f32 %v1060_v39, %v1060_v39  ;;  %v1100_v37 = vld [vmem:[#allocation3] sm:$0x1] }
 0x156   : > { %v1028_v53 = vadd.f32 %v2500_v49, %v1987_v44  ;;  %v1063_v42 = vadd.f32 %v2068_v48, %v2014_v34  ;;  %1096 = vst [vmem:[#allocation2 + $0xa0] sm:$0xff] %v1052_v12  ;;  %v1193_v60 = vadd.f32 %v1192_v56, %v1162_v52  ;;  %v1169_v10 = vmul.f32 %v1052_v12, %v1052_v12 }
 0x157   : > { %v1989_v46 = vpop.f32.mrf.mxu0  ;;  %v1054_v55 = vpop.f32.mrf.mxu1 }
 0x158   : > { %1090 = vst [vmem:[#allocation2 + $0x70] sm:$0xff] %v1028_v53  ;;  %v1163_v40 = vmul.f32 %v1028_v53, %v1028_v53  ;;  %1099 = vst [vmem:[#allocation2 + $0x98] sm:$0xff] %v1063_v42  ;;  %v1990_v57 = vadd.f32 %v1989_v46, %v1988_v47  ;;  %v1055_v59 = vadd.f32 %v2490_v32, %v1054_v55 }
 0x159   : > { %v1122_v27 = vadd.f32 %v1121_v38, %v1028_v53  ;;  %v1172_v21 = vmul.f32 %v1063_v42, %v1063_v42 }
 0x15a   : > { %v1031_v61 = vadd.f32 %v2502_v58, %v1990_v57  ;;  %1097 = vst [vmem:[#allocation2 + $0xf8] sm:$0xff] %v1055_v59  ;;  %v1194_v62 = vadd.f32 %v1193_v60, %v1163_v40  ;;  %v1168_v58 = vmul.f32 %v2510_v19, %v2510_v19  ;;  %v1170_v15 = vmul.f32 %v1055_v59, %v1055_v59 }
 0x15c   : > { %1091 = vst [vmem:[#allocation2 + $0xc0] sm:$0xff] %v1031_v61  ;;  %v1123_v49 = vadd.f32 %v1122_v27, %v1031_v61  ;;  %v1164_v0 = vmul.f32 %v1031_v61, %v1031_v61 }
 0x15e   : > { %v1124_v1 = vadd.f32 %v1123_v49, %v1036_v13  ;;  %v1195_v2 = vadd.f32 %v1194_v62, %v1164_v0 }
 0x160   : > { %v1125_v54 = vadd.f32 %v1124_v1, %v1039_v31  ;;  %v1196_v3 = vadd.f32 %v1195_v2, %v1165_v63 }
 0x162   : > { %v1197_v6 = vadd.f32 %v1196_v3, %v1166_v50  ;;  %v1126_v32 = vadd.f32 %v1125_v54, %v2505_v4 }
 0x164   : > { %v1127_v8 = vadd.f32 %v1126_v32, %v2510_v19  ;;  %v1198_v9 = vadd.f32 %v1197_v6, %v1167_v5 }
 0x166   : > { %v1128_v11 = vadd.f32 %v1127_v8, %v1052_v12  ;;  %v1199_v14 = vadd.f32 %v1198_v9, %v1168_v58 }
 0x168   : > { %v1129_v13 = vadd.f32 %v1128_v11, %v1055_v59  ;;  %v1200_v16 = vadd.f32 %v1199_v14, %v1169_v10 }
 0x16a   : > { %v1130_v17 = vadd.f32 %v1129_v13, %v1060_v39  ;;  %v1201_v20 = vadd.f32 %v1200_v16, %v1170_v15 }
 0x16c   : > { %v1131_v23 = vadd.f32 %v1130_v17, %v1063_v42  ;;  %v1202_v24 = vadd.f32 %v1201_v20, %v1171_v18 }
 0x16e   : > { %v1132_v25 = vrot.slane %v1131_v23, 4  ;;  %v1203_v4 = vadd.f32 %v1202_v24, %v1172_v21 }
 0x170   : > { %v1133_v7 = vadd.f32 %v1132_v25, %v1131_v23  ;;  %v1204_v26 = vrot.slane %v1203_v4, 4 }
 0x172   : > { %v1134_v29 = vrot.slane %v1133_v7, 2  ;;  %v1205_v31 = vadd.f32 %v1204_v26, %v1203_v4 }
 0x174   : > { %v1135_v19 = vadd.f32 %v1134_v29, %v1133_v7  ;;  %v1206_v33 = vrot.slane %v1205_v31, 2 }
 0x176   : > { %v1136_v22 = vrot.slane %v1135_v19, 1  ;;  %v1207_v35 = vadd.f32 %v1206_v33, %v1205_v31 }
 0x178   : > { %v1137_v41 = vadd.f32 %v1136_v22, %v1135_v19  ;;  %v1208_v43 = vrot.slane %v1207_v35, 1 }
 0x17a   : > { %v1138_v34 = vadd.f32 %v1137_v41, %v1100_v37  ;;  %v1209_v39 = vadd.f32 %v1208_v43, %v1207_v35 }
 0x17c   : > { %1139 = vst [vmem:[#allocation3] sm:$0x1] %v1138_v34  ;;  %v1210_v36 = vadd.f32 %v1209_v39, %v1140_v28 }
 0x17e   : > { %1211 = vst [vmem:[#allocation4] sm:$0x1] %v1210_v36 }
 0x17f PF: > { %p1212_p6 = scmp.eq.s32.totalorder %s2208_s15, 1 }
 0x180   : > { %v1224_v53 = vld [vmem:[%s2663_s2] sm:$0x1] (%p1212_p6) }
 0x181   : > { %1216 = sbr.rel (!%p1212_p6) target bundleno = 419 (0x1a3), region = 48  ;;  %v1229_v55 = vld [vmem:[%s2664_s3] sm:$0x1] (%p1212_p6) }
 0x183   : > { %v1217_v30 = vld [vmem:[#allocation3] sm:$0x1] (%p1212_p6) }
 0x184   : > { %v1218_v45 = vmul.f32 (%p1212_p6), 0.004132231, %v1217_v30 }
 0x185   : > { %v1219_v44 = vld [vmem:[#allocation4] sm:$0x1] (%p1212_p6) }
 0x186   : > { %v1220_v12 = vmul.f32 0.004132231, %v1219_v44  ;;  %v1221_v47 = vmul.f32 %v1218_v45, %v1218_v45 }
 0x188   : > { %v1222_v48 = vsub.f32 %v1220_v12, %v1221_v47 }
 0x18a   : > { %v1223_v51 = vmax.f32 %v1222_v48, 0.0 }
 0x18c   : > { %v1225_v52 = vadd.f32 1e-05, %v1223_v51 }
 0x18e   : > { %2192 = vrsqrt.f32 %v1225_v52 }
 0x19b   : > { %v2193_v42 = vpop.eup %2192 }
 0x19c   : > { %v1227_v46 = vmul.f32 %v2193_v42, %v1224_v53 }
 0x19e   : > { %1228 = vst [vmem:[#allocation5] sm:$0x1] %v1227_v46  ;;  %v1230_v56 = vmul.f32 %v1227_v46, %v1218_v45 }
 0x1a0   : > { %v1231_v38 = vsub.f32 %v1229_v55, %v1230_v56 }
 0x1a2   : > { %1232 = vst [vmem:[#allocation6] sm:$0x1] %v1231_v38 }
 0x1a3 PF: > { %p1735_p7 = scmp.ne.s32.totalorder %s2208_s15, 1 }
 0x1a5   : > { %1235 = sbr.rel (%p1735_p7) target bundleno = 471 (0x1d7), region = 52 }
 0x1aa   : > { %v1238_v40 = vld [vmem:[#allocation2 + $0xb0] sm:$0xff]  ;;  %v1239_v57 = vld [vmem:[#allocation2] sm:$0xff]  ;;  %v1240_v62 = vld [vmem:[#allocation2 + $0xd8] sm:$0xff] }
 0x1ab   : > { %v2536_v59 = vld [vmem:[#allocation5] ss:$0 sm:$0xff]  ;;  %v2540_v61 = vld [vmem:[#allocation6] ss:$0 sm:$0xff]  ;;  %v1241_v49 = vld [vmem:[#allocation2 + $0x18] sm:$0xff] }
 0x1ac   : > { %v1277_v60 = vmul.f32 %v2536_v59, %v1238_v40  ;;  %v1278_v27 = vmul.f32 %v2536_v59, %v1239_v57  ;;  %v1279_v0 = vmul.f32 %v2536_v59, %v1240_v62  ;;  %v1280_v63 = vmul.f32 %v2536_v59, %v1241_v49  ;;  %v1242_v1 = vld [vmem:[#allocation2 + $0x50] sm:$0xff]  ;;  %v1243_v2 = vld [vmem:[#allocation2 + $0x68] sm:$0xff]  ;;  %v1246_v21 = vld [vmem:[#allocation2 + $0x80] sm:$0xff] }
 0x1ad   : > { %v1244_v50 = vld [vmem:[#allocation2 + $0x30] sm:$0xff]  ;;  %v1281_v5 = vmul.f32 %v2536_v59, %v1242_v1  ;;  %v1282_v6 = vmul.f32 %v2536_v59, %v1243_v2  ;;  %v1245_v32 = vld [vmem:[#allocation2 + $0x48] sm:$0xff]  ;;  %v1249_v22 = vld [vmem:[#allocation2 + $0xb8] sm:$0xff]  ;;  %v1285_v43 = vmul.f32 %v2536_v59, %v1246_v21 }
 0x1ae   : > { %v1316_v54 = vadd.f32 %v2540_v61, %v1277_v60  ;;  %v1317_v3 = vadd.f32 %v2540_v61, %v1278_v27  ;;  %v1318_v58 = vadd.f32 %v2540_v61, %v1279_v0  ;;  %v1319_v8 = vadd.f32 %v2540_v61, %v1280_v63  ;;  %v1247_v7 = vld [vmem:[#allocation2 + $0x88] sm:$0xff]  ;;  %v1250_v28 = vld [vmem:[#allocation2 + $0x60] sm:$0xff]  ;;  %v1251_v34 = vld [vmem:[#allocation2 + $0xf0] sm:$0xff] }
 0x1af   : > { %v1283_v9 = vmul.f32 %v2536_v59, %v1244_v50  ;;  %v1284_v10 = vmul.f32 %v2536_v59, %v1245_v32  ;;  %v1320_v13 = vadd.f32 %v2540_v61, %v1281_v5  ;;  %v1321_v15 = vadd.f32 %v2540_v61, %v1282_v6  ;;  %v1248_v33 = vld [vmem:[#allocation2 + $0xe8] sm:$0xff]  ;;  %v1253_v52 = vld [vmem:[#allocation2 + $0x78] sm:$0xff] }
 0x1b0   : > { %v1348_v11 = vmul.f32 0.01, %v1316_v54  ;;  %v1349_v14 = vmul.f32 0.01, %v1317_v3  ;;  %v1350_v16 = vmul.f32 0.01, %v1318_v58  ;;  %v1286_v44 = vmul.f32 %v2536_v59, %v1247_v7 }
 0x1b1   : > { %v1351_v18 = vmul.f32 0.01, %v1319_v8  ;;  %v1322_v17 = vadd.f32 %v2540_v61, %v1283_v9  ;;  %v1323_v20 = vadd.f32 %v2540_v61, %v1284_v10  ;;  %v1352_v25 = vmul.f32 0.01, %v1320_v13  ;;  %v1252_v45 = vld [vmem:[#allocation2 + $0x8] sm:$0xff]  ;;  %v1254_v0 = vld [vmem:[#allocation2 + $0x38] sm:$0xff] }
 0x1b2   : > { %v1380_v23 = vmax.f32 %v1316_v54, %v1348_v11  ;;  %v1381_v24 = vmax.f32 %v1317_v3, %v1349_v14  ;;  %v1353_v4 = vmul.f32 0.01, %v1321_v15  ;;  %v1382_v26 = vmax.f32 %v1318_v58, %v1350_v16  ;;  %v1255_v32 = vld [vmem:[#allocation2 + $0x58] sm:$0xff]  ;;  %v1256_v11 = vld [vmem:[#allocation2 + $0x40] sm:$0xff]  ;;  %v1257_v14 = vld [vmem:[#allocation2 + $0xc8] sm:$0xff] }
 0x1b3   : > { %v1383_v29 = vmax.f32 %v1319_v8, %v1351_v18  ;;  %v1354_v31 = vmul.f32 0.01, %v1322_v17  ;;  %v1355_v19 = vmul.f32 0.01, %v1323_v20  ;;  %v1384_v37 = vmax.f32 %v1320_v13, %v1352_v25 }
 0x1b4   : > { %v1811_v35 = vpack.c.bf16 %v1381_v24, %v1380_v23  ;;  %v1385_v41 = vmax.f32 %v1321_v15, %v1353_v4  ;;  %v1324_v47 = vadd.f32 %v2540_v61, %v1285_v43  ;;  %v1287_v48 = vmul.f32 %v2536_v59, %v1248_v33  ;;  %v1260_v4 = vld [vmem:[#allocation2 + $0x70] sm:$0xff] }
 0x1b5   : > { %v1816_v39 = vpack.c.bf16 %v1383_v29, %v1382_v26  ;;  %v1386_v36 = vmax.f32 %v1322_v17, %v1354_v31  ;;  %v1387_v30 = vmax.f32 %v1323_v20, %v1355_v19  ;;  %v1288_v51 = vmul.f32 %v2536_v59, %v1249_v22  ;;  %v1258_v17 = vld [vmem:[#allocation2 + $0xe0] sm:$0xff]  ;;  %v1259_v20 = vld [vmem:[#allocation2 + $0x90] sm:$0xff] }
 0x1b6   : > { %1812 = vst [vmem:[%s2665_s4] sm:$0xff] %v1811_v35   ;;  %v1821_v12 = vpack.c.bf16 %v1385_v41, %v1384_v37  ;;  %v1325_v42 = vadd.f32 %v2540_v61, %v1286_v44  ;;  %v1289_v46 = vmul.f32 %v2536_v59, %v1250_v28  ;;  %v1290_v55 = vmul.f32 %v2536_v59, %v1251_v34  ;;  %v1261_v37 = vld [vmem:[#allocation2 + $0xc0] sm:$0xff] }
 0x1b7   : > { %1888 = vst [vmem:[%s2665_s4 + $0x8] sm:$0xff] %v1816_v39   ;;  %v1826_v53 = vpack.c.bf16 %v1387_v30, %v1386_v36  ;;  %v1356_v56 = vmul.f32 0.01, %v1324_v47  ;;  %v1326_v38 = vadd.f32 %v2540_v61, %v1287_v48  ;;  %v1327_v40 = vadd.f32 %v2540_v61, %v1288_v51  ;;  %v1262_v39 = vld [vmem:[#allocation2 + $0xa8] sm:$0xff] }
 0x1b8   : > { %1889 = vst [vmem:[%s2665_s4 + $0x10] sm:$0xff] %v1821_v12   ;;  %v1291_v57 = vmul.f32 %v2536_v59, %v1252_v45  ;;  %v1357_v60 = vmul.f32 0.01, %v1325_v42  ;;  %v1328_v27 = vadd.f32 %v2540_v61, %v1289_v46  ;;  %v1329_v62 = vadd.f32 %v2540_v61, %v1290_v55 }
 0x1b9   : > { %1890 = vst [vmem:[%s2665_s4 + $0x18] sm:$0xff] %v1826_v53   ;;  %v1292_v49 = vmul.f32 %v2536_v59, %v1253_v52  ;;  %v1388_v63 = vmax.f32 %v1324_v47, %v1356_v56  ;;  %v1358_v1 = vmul.f32 0.01, %v1326_v38  ;;  %v1359_v2 = vmul.f32 0.01, %v1327_v40  ;;  %v1263_v52 = vld [vmem:[#allocation2 + $0xd0] sm:$0xff] }
 0x1ba   : > { %v1330_v50 = vadd.f32 %v2540_v61, %v1291_v57  ;;  %v1389_v54 = vmax.f32 %v1325_v42, %v1357_v60  ;;  %v1360_v3 = vmul.f32 0.01, %v1328_v27  ;;  %v1361_v5 = vmul.f32 0.01, %v1329_v62  ;;  %v1264_v60 = vld [vmem:[#allocation2 + $0x10] sm:$0xff] }
 0x1bb   : > { %v1331_v6 = vadd.f32 %v2540_v61, %v1292_v49  ;;  %v1390_v58 = vmax.f32 %v1326_v38, %v1358_v1  ;;  %v1391_v8 = vmax.f32 %v1327_v40, %v1359_v2  ;;  %v1293_v10 = vmul.f32 %v2536_v59, %v1254_v0  ;;  %v1266_v1 = vld [vmem:[#allocation2 + $0xa0] sm:$0xff]  ;;  %v1267_v2 = vld [vmem:[#allocation2 + $0xf8] sm:$0xff] }
 0x1bc   : > { %v1362_v9 = vmul.f32 0.01, %v1330_v50  ;;  %v1831_v13 = vpack.c.bf16 %v1389_v54, %v1388_v63  ;;  %v1392_v15 = vmax.f32 %v1328_v27, %v1360_v3  ;;  %v1393_v16 = vmax.f32 %v1329_v62, %v1361_v5  ;;  %v1265_v27 = vld [vmem:[#allocation2 + $0x28] sm:$0xff] }
 0x1bd   : > { %v1363_v18 = vmul.f32 0.01, %v1331_v6  ;;  %v1836_v21 = vpack.c.bf16 %v1391_v8, %v1390_v58  ;;  %v1294_v24 = vmul.f32 %v2536_v59, %v1255_v32  ;;  %v1332_v25 = vadd.f32 %v2540_v61, %v1293_v10 }
 0x1be   : > { %v1394_v23 = vmax.f32 %v1330_v50, %v1362_v9  ;;  %1891 = vst [vmem:[%s2665_s4 + $0x20] sm:$0xff] %v1831_v13   ;;  %v1841_v7 = vpack.c.bf16 %v1393_v16, %v1392_v15  ;;  %v1295_v29 = vmul.f32 %v2536_v59, %v1256_v11  ;;  %v1296_v31 = vmul.f32 %v2536_v59, %v1257_v14  ;;  %v1269_v15 = vld [vmem:[#allocation2 + $0x98] sm:$0xff] }
 0x1bf   : > { %v1395_v26 = vmax.f32 %v1331_v6, %v1363_v18  ;;  %1892 = vst [vmem:[%s2665_s4 + $0x28] sm:$0xff] %v1836_v21   ;;  %v1333_v19 = vadd.f32 %v2540_v61, %v1294_v24  ;;  %v1364_v33 = vmul.f32 0.01, %v1332_v25  ;;  %v1297_v22 = vmul.f32 %v2536_v59, %v1258_v17  ;;  %v1268_v6 = vld [vmem:[#allocation2 + $0x20] sm:$0xff] }
 0x1c0   : > { %v1298_v35 = vmul.f32 %v2536_v59, %v1259_v20  ;;  %1893 = vst [vmem:[%s2665_s4 + $0x30] sm:$0xff] %v1841_v7   ;;  %v1334_v43 = vadd.f32 %v2540_v61, %v1295_v29  ;;  %v1335_v28 = vadd.f32 %v2540_v61, %v1296_v31  ;;  %v1299_v34 = vmul.f32 %v2536_v59, %v1260_v4 }
 0x1c1   : > { %v1846_v41 = vpack.c.bf16 %v1395_v26, %v1394_v23  ;;  %v1365_v36 = vmul.f32 0.01, %v1333_v19  ;;  %v1396_v30 = vmax.f32 %v1332_v25, %v1364_v33  ;;  %v1336_v44 = vadd.f32 %v2540_v61, %v1297_v22 }
 0x1c2   : > { %v1337_v45 = vadd.f32 %v2540_v61, %v1298_v35  ;;  %v1366_v12 = vmul.f32 0.01, %v1334_v43  ;;  %v1367_v47 = vmul.f32 0.01, %v1335_v28  ;;  %v1300_v48 = vmul.f32 %v2536_v59, %v1261_v37 }
 0x1c3   : > { %1894 = vst [vmem:[%s2665_s4 + $0x38] sm:$0xff] %v1846_v41   ;;  %v1338_v51 = vadd.f32 %v2540_v61, %v1299_v34  ;;  %v1397_v53 = vmax.f32 %v1333_v19, %v1365_v36  ;;  %v1368_v42 = vmul.f32 0.01, %v1336_v44  ;;  %v1301_v55 = vmul.f32 %v2536_v59, %v1262_v39 }
 0x1c4   : > { %v1369_v46 = vmul.f32 0.01, %v1337_v45  ;;  %v1398_v56 = vmax.f32 %v1334_v43, %v1366_v12  ;;  %v1399_v38 = vmax.f32 %v1335_v28, %v1367_v47  ;;  %v1339_v40 = vadd.f32 %v2540_v61, %v1300_v48 }
 0x1c5   : > { %v1370_v57 = vmul.f32 0.01, %v1338_v51  ;;  %v1851_v62 = vpack.c.bf16 %v1397_v53, %v1396_v30  ;;  %v1400_v49 = vmax.f32 %v1336_v44, %v1368_v42  ;;  %v1302_v63 = vmul.f32 %v2536_v59, %v1263_v52 }
 0x1c6   : > { %v1401_v0 = vmax.f32 %v1337_v45, %v1369_v46  ;;  %v1856_v50 = vpack.c.bf16 %v1399_v38, %v1398_v56  ;;  %v1371_v54 = vmul.f32 0.01, %v1339_v40  ;;  %v1340_v5 = vadd.f32 %v2540_v61, %v1301_v55 }
 0x1c7   : > { %v1402_v3 = vmax.f32 %v1338_v51, %v1370_v57  ;;  %1895 = vst [vmem:[%s2665_s4 + $0x40] sm:$0xff] %v1851_v62   ;;  %v1341_v58 = vadd.f32 %v2540_v61, %v1302_v63  ;;  %v1303_v8 = vmul.f32 %v2536_v59, %v1264_v60  ;;  %v1304_v9 = vmul.f32 %v2536_v59, %v1265_v27 }
 0x1c8   : > { %v1861_v32 = vpack.c.bf16 %v1401_v0, %v1400_v49  ;;  %1896 = vst [vmem:[%s2665_s4 + $0x48] sm:$0xff] %v1856_v50   ;;  %v1403_v10 = vmax.f32 %v1339_v40, %v1371_v54  ;;  %v1372_v11 = vmul.f32 0.01, %v1340_v5  ;;  %v1305_v14 = vmul.f32 %v2536_v59, %v1266_v1 }
 0x1c9   : > { %v1306_v13 = vmul.f32 %v2536_v59, %v1267_v2  ;;  %v1373_v16 = vmul.f32 0.01, %v1341_v58  ;;  %v1342_v18 = vadd.f32 %v2540_v61, %v1303_v8  ;;  %v1343_v17 = vadd.f32 %v2540_v61, %v1304_v9 }
 0x1ca   : > { %1897 = vst [vmem:[%s2665_s4 + $0x50] sm:$0xff] %v1861_v32   ;;  %v1307_v20 = vmul.f32 %v2536_v59, %v1268_v6  ;;  %v1866_v21 = vpack.c.bf16 %v1403_v10, %v1402_v3  ;;  %v1404_v23 = vmax.f32 %v1340_v5, %v1372_v11  ;;  %v1344_v24 = vadd.f32 %v2540_v61, %v1305_v14 }
 0x1cb   : > { %v1345_v25 = vadd.f32 %v2540_v61, %v1306_v13  ;;  %v1405_v4 = vmax.f32 %v1341_v58, %v1373_v16  ;;  %v1374_v7 = vmul.f32 0.01, %v1342_v18  ;;  %v1375_v26 = vmul.f32 0.01, %v1343_v17 }
 0x1cc   : > { %v1308_v29 = vmul.f32 %v2536_v59, %v1269_v15  ;;  %1898 = vst [vmem:[%s2665_s4 + $0x58] sm:$0xff] %v1866_v21   ;;  %v1376_v31 = vmul.f32 0.01, %v1344_v24  ;;  %v1346_v33 = vadd.f32 %v2540_v61, %v1307_v20 }
 0x1cd   : > { %v1377_v19 = vmul.f32 0.01, %v1345_v25  ;;  %v1871_v22 = vpack.c.bf16 %v1405_v4, %v1404_v23  ;;  %v1406_v35 = vmax.f32 %v1342_v18, %v1374_v7  ;;  %v1407_v37 = vmax.f32 %v1343_v17, %v1375_v26 }
 0x1ce   : > { %v1347_v41 = vadd.f32 %v2540_v61, %v1308_v29  ;;  %v1408_v43 = vmax.f32 %v1344_v24, %v1376_v31  ;;  %v1378_v34 = vmul.f32 0.01, %v1346_v33 }
 0x1cf   : > { %v1409_v28 = vmax.f32 %v1345_v25, %v1377_v19  ;;  %1899 = vst [vmem:[%s2665_s4 + $0x60] sm:$0xff] %v1871_v22   ;;  %v1876_v59 = vpack.c.bf16 %v1407_v37, %v1406_v35 }
 0x1d0   : > { %v1379_v39 = vmul.f32 0.01, %v1347_v41  ;;  %v1410_v30 = vmax.f32 %v1346_v33, %v1378_v34 }
 0x1d1   : > { %v1881_v36 = vpack.c.bf16 %v1409_v28, %v1408_v43  ;;  %1900 = vst [vmem:[%s2665_s4 + $0x68] sm:$0xff] %v1876_v59  }
 0x1d2   : > { %v1411_v44 = vmax.f32 %v1347_v41, %v1379_v39 }
 0x1d3   : > { %1901 = vst [vmem:[%s2665_s4 + $0x70] sm:$0xff] %v1881_v36  }
 0x1d4   : > { %v1886_v61 = vpack.c.bf16 %v1411_v44, %v1410_v30 }
 0x1d6   : > { %1902 = vst [vmem:[%s2665_s4 + $0x78] sm:$0xff] %v1886_v61  }
 0x1d7 PF: > { %s14_s17 = sadd.s32 1, %s2216_s17   ;;  %s2666_s15 = smov %s2212_s16 }
 0x1d8   : > { %p11_p8 = scmp.ge.s32.totalorder %s14_s17, 4   ;;  %s2667_s16 = smov %s2669_s18 }
 0x1da   :  { %13 = sbr.rel (!%p11_p8) target bundleno = 2 (0x2), region = 84 }

// kernel: reducedim2_forward.9
= control target key start
LH: loop header
LB: loop body
LE: loop exit
PB: predicated region body
PF: predicated region fallthrough
CT: control target
= control target key end

     0   :  { %s1219_s15 = smov 0   ;;  %s1221_s16 = smov 0   ;;  %s1382_s0 = inlined_call_operand.vmem [shape: bf16[80,288], index: 0, kind: input, shape index: {}]   ;;  %s1383_s1 = inlined_call_operand.vmem [shape: bf16[288,128], index: 1, kind: input, shape index: {}]   ;;  %s1384_s2 = inlined_call_operand.vmem [shape: f32[1,128], index: 2, kind: input, shape index: {}]   ;;  %s1385_s3 = inlined_call_operand.vmem [shape: f32[1,128], index: 3, kind: input, shape index: {}]   ;;  %s1386_s4 = inlined_call_operand.vmem [shape: bf16[80,128], index: 4, kind: output, shape index: {}]  }
   0x1   :  { %s1223_s17 = smov 0  }
   0x2 LB: > { %s26_s18 = sadd.s32 1, %s1185_s16  ;;  %p923_p0 = scmp.ge.s32.totalorder %s1189_s17, 1  ;;  %s1189_s17 = sphi %s1223_s17, %s14_s17   ;;  %s1185_s16 = sphi %s1221_s16, %s1388_s16   ;;  %s1181_s15 = sphi %s1219_s15, %s1387_s15  }
   0x3   : > { %p28_p1 = scmp.ge.s32.totalorder %s26_s18, 2  ;;  %p186_p2 = scmp.lt.s32.totalorder %s1189_s17, 3 }
   0x5   : > { %s1390_s18 = smov (%p28_p1, %s26_s18), 0  ;;  %p187_p3 = pnand %p923_p0, %p186_p2 }
   0x6   : > { %p236_p4 = scmp.eq.s32.totalorder (!%p187_p3), %s1181_s15, 0 }
   0x7   : > { %190 = sbr.rel (%p187_p3) target bundleno = 375 (0x177), region = 36 }
   0xc   : > { %241 = sbr.rel (!%p236_p4) target bundleno = 17 (0x11), region = 40  ;;  %v1191_v0 = vmov (%p236_p4), 0.0  }
   0xd   : > { %242 = vst [vmem:[#allocation3] sm:$0x1] (%p236_p4), %v1191_v0  ;;  %243 = vst [vmem:[#allocation4] sm:$0x1] (%p236_p4), %v1191_v0 }
  0x11 PF: > { %p925_p5 = scmp.ne.s32.totalorder %s1181_s15, 0 }
  0x13   : > { %246 = sbr.rel (%p925_p5) target bundleno = 311 (0x137), region = 44 }
  0x18   : > { %v1127_v1 = vld [vmem:[%s1383_s1 + $0x78] sm:$0xff]   ;;  %v1192_v3 = vmov 0.0   ;;  %v1129_v4 = vld [vmem:[%s1383_s1 + $0x70] sm:$0xff]   ;;  %vm1193_vm0 = vmmov 0   ;;  %v1131_v6 = vld [vmem:[%s1383_s1 + $0x68] sm:$0xff]   ;;  %vm486_vm1 = vcmask 261120  }
  0x19   : > { %v1128_v2 = vld [vmem:[%s1383_s1 + $0x38] sm:$0xff]   ;;  %1076 = vmatprep.subr.bf16.mxu1 %v1192_v3  ;;  %1023 = vmatprep.subr.bf16.mxu0 %v1127_v1  ;;  %v1130_v5 = vld [vmem:[%s1383_s1 + $0x30] sm:$0xff]   ;;  %v1132_v7 = vld [vmem:[%s1383_s1 + $0x28] sm:$0xff]  }
  0x1a   : > { %1080 = vmatprep.mubr.msk.bf16.mxu1 %vm1193_vm0, %v1192_v3  ;;  %1024 = vmatpush3.bf16.msra.mxu0 %v1128_v2  ;;  %v1133_v8 = vld [vmem:[%s1383_s1 + $0x60] sm:$0xff]   ;;  %v1135_v10 = vld [vmem:[%s1383_s1 + $0x58] sm:$0xff]   ;;  %v1139_v11 = vld [vmem:[%s1383_s1 + $0x88] sm:$0xff]  }
  0x1b   : > { %1025 = vmatprep.subr.bf16.mxu0 %v1129_v4  ;;  %v1134_v9 = vld [vmem:[%s1383_s1 + $0x20] sm:$0xff]   ;;  %v1136_v12 = vld [vmem:[%s1383_s1 + $0x18] sm:$0xff]   ;;  %1077 = vmatpush3.bf16.msra.mxu1 %v1139_v11  ;;  %v1137_v14 = vld [vmem:[%s1383_s1 + $0x50] sm:$0xff]  }
  0x1c   : > { %1078 = vmatprep.subr.bf16.mxu1 %v1192_v3  ;;  %v1142_v13 = vld [vmem:[%s1383_s1 + $0x80] sm:$0xff]   ;;  %v1138_v15 = vld [vmem:[%s1383_s1 + $0x10] sm:$0xff]   ;;  %v1140_v17 = vld [vmem:[%s1383_s1 + $0x48] sm:$0xff]  }
  0x1d   : > { %v1145_v16 = vld [vmem:[%s1382_s0 + $0x8] ss:$12 sps:$4 sm:$0xff]   ;;  %v1148_v18 = vld [vmem:[%s1382_s0 + $0x4] ss:$12 sps:$4 sm:$0xff]   ;;  %v1149_v21 = vld [vmem:[%s1382_s0 + $0x20] ss:$12 sps:$4 sm:$0xff]  }
  0x1e   : > { %1026 = vmatpush3.bf16.msra.mxu0 %v1130_v5  ;;  %534 = vmatprep.mubr.bf16.mxu0 %v1148_v18  ;;  %v1141_v19 = vld [vmem:[%s1383_s1 + $0x8] sm:$0xff]   ;;  %v1143_v20 = vld [vmem:[%s1383_s1 + $0x40] sm:$0xff]   ;;  %v1157_v28 = vld [vmem:[%s1382_s0 + $0x50] ss:$12 sps:$4 sm:$0xff]  }
  0x1f   : > { %1027 = vmatprep.subr.bf16.mxu0 %v1131_v6  ;;  %1079 = vmatpush3.bf16.msra.mxu1 %v1142_v13  ;;  %v1144_v22 = vld [vmem:[%s1383_s1] sm:$0xff]   ;;  %v1150_v24 = vld [vmem:[%s1382_s0 + $0x1c] ss:$12 sps:$4 sm:$0xff]   ;;  %v1158_v30 = vld [vmem:[%s1382_s0 + $0x4c] ss:$12 sps:$4 sm:$0xff]  }
  0x20   : > { %v1146_v23 = vld [vmem:[%s1382_s0] ss:$12 sps:$4 sm:$0xff]   ;;  %v1153_v25 = vld [vmem:[%s1382_s0 + $0x38] ss:$12 sps:$4 sm:$0xff]   ;;  %v1156_v29 = vld [vmem:[%s1382_s0 + $0x30] ss:$12 sps:$4 sm:$0xff]  }
  0x21   : > { %v1152_v26 = vld [vmem:[%s1382_s0 + $0x18] ss:$12 sps:$4 sm:$0xff]   ;;  %v1154_v27 = vld [vmem:[%s1382_s0 + $0x34] ss:$12 sps:$4 sm:$0xff]  }
  0x22   : > { %1028 = vmatpush3.bf16.msra.mxu0 %v1132_v7  ;;  %1081 = vmatmul.mubr.msk.bf16.vlgmr.msra.gmra.mxu1 %vm486_vm1, %v1145_v16  ;;  %v1161_v31 = vld [vmem:[%s1382_s0 + $0x68] ss:$12 sps:$4 sm:$0xff]   ;;  %v1162_v33 = vld [vmem:[%s1382_s0 + $0x64] ss:$12 sps:$4 sm:$0xff]   ;;  %v1164_v34 = vld [vmem:[%s1382_s0 + $0x60] ss:$12 sps:$4 sm:$0xff]  }
  0x23   : > { %1029 = vmatprep.subr.bf16.mxu0 %v1133_v8  ;;  %1084 = vmatprep.mubr.msk.bf16.mxu1 %vm1193_vm0, %v1192_v3  ;;  %v1160_v32 = vld [vmem:[%s1382_s0 + $0x48] ss:$12 sps:$4 sm:$0xff]  }
  0x26   : > { %1030 = vmatpush3.bf16.msra.mxu0 %v1134_v9 }
  0x27   : > { %1031 = vmatprep.subr.bf16.mxu0 %v1135_v10 }
  0x2a   : > { %1032 = vmatpush3.bf16.msra.mxu0 %v1136_v12  ;;  %1085 = vmatmul.mubr.msk.bf16.gmra.mxu1 %vm486_vm1, %v1149_v21 }
  0x2b   : > { %1033 = vmatprep.subr.bf16.mxu0 %v1137_v14  ;;  %1088 = vmatprep.mubr.msk.bf16.mxu1 %vm1193_vm0, %v1192_v3 }
  0x2e   : > { %1034 = vmatpush3.bf16.msra.mxu0 %v1138_v15 }
  0x2f   : > { %1035 = vmatprep.subr.bf16.mxu0 %v1140_v17 }
  0x32   : > { %1036 = vmatpush3.bf16.msra.mxu0 %v1141_v19  ;;  %1089 = vmatmul.mubr.msk.bf16.gmra.mxu1 %vm486_vm1, %v1153_v25 }
  0x33   : > { %1037 = vmatprep.subr.bf16.mxu0 %v1143_v20  ;;  %1092 = vmatprep.mubr.msk.bf16.mxu1 %vm1193_vm0, %v1192_v3 }
  0x36   : > { %1038 = vmatpush3.bf16.msra.mxu0 %v1144_v22 }
  0x39   : > { %535 = vmatmul.mubr.bf16.vlgmr.msra.gmra.mxu0 %v1146_v23 }
  0x3a   : > { %542 = vmatprep.mubr.bf16.mxu0 %v1150_v24  ;;  %1093 = vmatmul.mubr.msk.bf16.gmra.mxu1 %vm486_vm1, %v1157_v28 }
  0x3b   : > { %1096 = vmatprep.mubr.msk.bf16.mxu1 %vm1193_vm0, %v1192_v3 }
  0x41   : > { %543 = vmatmul.mubr.bf16.gmra.mxu0 %v1152_v26 }
  0x42   : > { %550 = vmatprep.mubr.bf16.mxu0 %v1154_v27  ;;  %1097 = vmatmul.mubr.msk.bf16.gmra.mxu1 %vm486_vm1, %v1161_v31 }
  0x49   : > { %551 = vmatmul.mubr.bf16.gmra.mxu0 %v1156_v29 }
  0x4a   : > { %558 = vmatprep.mubr.bf16.mxu0 %v1158_v30 }
  0x51   : > { %559 = vmatmul.mubr.bf16.gmra.mxu0 %v1160_v32 }
  0x52   : > { %566 = vmatprep.mubr.bf16.mxu0 %v1162_v33 }
  0x59   : > { %567 = vmatmul.mubr.bf16.gmra.mxu0 %v1164_v34 }
  0xe2   : > { %v609_v35 = vpop.f32.mrf.mxu1 }
  0xe4   : > { %v1082_v36 = vpop.f32.mrf.mxu1 }
  0xe6   : > { %v612_v37 = vpop.f32.mrf.mxu1 }
  0xe8   : > { %v1083_v38 = vpop.f32.mrf.mxu1 }
  0xea   : > { %v617_v39 = vpop.f32.mrf.mxu1 }
  0xec   : > { %v1086_v40 = vpop.f32.mrf.mxu1 }
  0xee   : > { %v620_v41 = vpop.f32.mrf.mxu1 }
  0xf0   : > { %v1087_v43 = vpop.f32.mrf.mxu1 }
  0xf2   : > { %v625_v46 = vpop.f32.mrf.mxu1 }
  0xf4   : > { %v1090_v49 = vpop.f32.mrf.mxu1 }
  0xf6   : > { %v628_v52 = vpop.f32.mrf.mxu1 }
  0xf8   : > { %v1091_v55 = vpop.f32.mrf.mxu1 }
  0xf9   : > { %v1039_v42 = vpop.f32.mrf.mxu0 }
  0xfa   : > { %v633_v58 = vpop.f32.mrf.mxu1 }
  0xfb   : > { %v1040_v44 = vpop.f32.mrf.mxu0 }
  0xfc   : > { %v1041_v45 = vadd.f32 %v1040_v44, %v1039_v42  ;;  %v1094_v61 = vpop.f32.mrf.mxu1 }
  0xfd   : > { %v1042_v47 = vpop.f32.mrf.mxu0 }
  0xfe   : > { %v610_v48 = vadd.f32 %v1041_v45, %v609_v35  ;;  %v636_v0 = vpop.f32.mrf.mxu1 }
  0xff   : > { %v1043_v50 = vpop.f32.mrf.mxu0 }
 0x100   : > { %650 = vst [vmem:[#allocation2 + $0x30] sm:$0xff] %v610_v48  ;;  %v1044_v51 = vadd.f32 %v1043_v50, %v1042_v47  ;;  %v1095_v3 = vpop.f32.mrf.mxu1  ;;  %v679_v18 = vmul.f32 %v610_v48, %v610_v48 }
 0x101   : > { %v1045_v53 = vpop.f32.mrf.mxu0 }
 0x102   : > { %v613_v54 = vadd.f32 %v1044_v51, %v612_v37  ;;  %v641_v6 = vpop.f32.mrf.mxu1 }
 0x103   : > { %v1046_v56 = vpop.f32.mrf.mxu0 }
 0x104   : > { %651 = vst [vmem:[#allocation2] sm:$0xff] %v613_v54  ;;  %v1047_v57 = vadd.f32 %v1046_v56, %v1045_v53  ;;  %v1098_v9 = vpop.f32.mrf.mxu1  ;;  %v680_v14 = vmul.f32 %v613_v54, %v613_v54  ;;  %v661_v19 = vadd.f32 %v613_v54, %v610_v48 }
 0x105   : > { %v1048_v59 = vpop.f32.mrf.mxu0 }
 0x106   : > { %v618_v60 = vadd.f32 %v1047_v57, %v617_v39  ;;  %v644_v12 = vpop.f32.mrf.mxu1  ;;  %v689_v23 = vadd.f32 %v680_v14, %v679_v18 }
 0x107   : > { %v1049_v62 = vpop.f32.mrf.mxu0 }
 0x108   : > { %652 = vst [vmem:[#allocation2 + $0x18] sm:$0xff] %v618_v60  ;;  %v1050_v63 = vadd.f32 %v1049_v62, %v1048_v59  ;;  %v1099_v16 = vpop.f32.mrf.mxu1  ;;  %v681_v20 = vmul.f32 %v618_v60, %v618_v60  ;;  %v662_v24 = vadd.f32 %v661_v19, %v618_v60 }
 0x109   : > { %v1051_v1 = vpop.f32.mrf.mxu0 }
 0x10a   : > { %v621_v2 = vadd.f32 %v1050_v63, %v620_v41  ;;  %v690_v28 = vadd.f32 %v689_v23, %v681_v20 }
 0x10b   : > { %v1052_v4 = vpop.f32.mrf.mxu0 }
 0x10c   : > { %653 = vst [vmem:[#allocation2 + $0x10] sm:$0xff] %v621_v2  ;;  %v1053_v5 = vadd.f32 %v1052_v4, %v1051_v1  ;;  %v682_v25 = vmul.f32 %v621_v2, %v621_v2  ;;  %v663_v29 = vadd.f32 %v662_v24, %v621_v2  ;;  %v660_v4 = vld [vmem:[#allocation3] sm:$0x1] }
 0x10d   : > { %v1054_v7 = vpop.f32.mrf.mxu0 }
 0x10e   : > { %v626_v8 = vadd.f32 %v1053_v5, %v625_v46  ;;  %v691_v33 = vadd.f32 %v690_v28, %v682_v25 }
 0x10f   : > { %v1055_v10 = vpop.f32.mrf.mxu0 }
 0x110   : > { %654 = vst [vmem:[#allocation2 + $0x48] sm:$0xff] %v626_v8  ;;  %v1056_v11 = vadd.f32 %v1055_v10, %v1054_v7  ;;  %v683_v30 = vmul.f32 %v626_v8, %v626_v8  ;;  %v664_v34 = vadd.f32 %v663_v29, %v626_v8  ;;  %v678_v7 = vld [vmem:[#allocation4] sm:$0x1] }
 0x111   : > { %v1057_v13 = vpop.f32.mrf.mxu0 }
 0x112   : > { %v629_v15 = vadd.f32 %v1056_v11, %v628_v52  ;;  %v692_v38 = vadd.f32 %v691_v33, %v683_v30 }
 0x113   : > { %v1058_v17 = vpop.f32.mrf.mxu0 }
 0x114   : > { %655 = vst [vmem:[#allocation2 + $0x28] sm:$0xff] %v629_v15  ;;  %v1059_v21 = vadd.f32 %v1058_v17, %v1057_v13  ;;  %v684_v35 = vmul.f32 %v629_v15, %v629_v15  ;;  %v665_v39 = vadd.f32 %v664_v34, %v629_v15 }
 0x115   : > { %v1060_v22 = vpop.f32.mrf.mxu0 }
 0x116   : > { %v634_v26 = vadd.f32 %v1059_v21, %v633_v58  ;;  %v693_v43 = vadd.f32 %v692_v38, %v684_v35 }
 0x117   : > { %v1061_v27 = vpop.f32.mrf.mxu0 }
 0x118   : > { %656 = vst [vmem:[#allocation2 + $0x8] sm:$0xff] %v634_v26  ;;  %v1062_v31 = vadd.f32 %v1061_v27, %v1060_v22  ;;  %v685_v40 = vmul.f32 %v634_v26, %v634_v26  ;;  %v666_v44 = vadd.f32 %v665_v39, %v634_v26 }
 0x119   : > { %v1063_v32 = vpop.f32.mrf.mxu0 }
 0x11a   : > { %v637_v36 = vadd.f32 %v1062_v31, %v636_v0  ;;  %v694_v48 = vadd.f32 %v693_v43, %v685_v40 }
 0x11b   : > { %v1064_v37 = vpop.f32.mrf.mxu0 }
 0x11c   : > { %657 = vst [vmem:[#allocation2 + $0x20] sm:$0xff] %v637_v36  ;;  %v1065_v41 = vadd.f32 %v1064_v37, %v1063_v32  ;;  %v686_v45 = vmul.f32 %v637_v36, %v637_v36  ;;  %v667_v49 = vadd.f32 %v666_v44, %v637_v36 }
 0x11d   : > { %v1066_v42 = vpop.f32.mrf.mxu0 }
 0x11e   : > { %v642_v46 = vadd.f32 %v1065_v41, %v641_v6  ;;  %v695_v52 = vadd.f32 %v694_v48, %v686_v45 }
 0x11f   : > { %v1067_v47 = vpop.f32.mrf.mxu0 }
 0x120   : > { %658 = vst [vmem:[#allocation2 + $0x40] sm:$0xff] %v642_v46  ;;  %v687_v50 = vmul.f32 %v642_v46, %v642_v46  ;;  %v1068_v51 = vadd.f32 %v1067_v47, %v1066_v42  ;;  %v668_v53 = vadd.f32 %v667_v49, %v642_v46 }
 0x122   : > { %v645_v54 = vadd.f32 %v1068_v51, %v644_v12  ;;  %v696_v55 = vadd.f32 %v695_v52, %v687_v50 }
 0x124   : > { %659 = vst [vmem:[#allocation2 + $0x38] sm:$0xff] %v645_v54  ;;  %v669_v56 = vadd.f32 %v668_v53, %v645_v54  ;;  %v688_v57 = vmul.f32 %v645_v54, %v645_v54 }
 0x126   : > { %v670_v58 = vrot.slane %v669_v56, 4  ;;  %v697_v59 = vadd.f32 %v696_v55, %v688_v57 }
 0x128   : > { %v671_v60 = vadd.f32 %v670_v58, %v669_v56  ;;  %v698_v61 = vrot.slane %v697_v59, 4 }
 0x12a   : > { %v672_v62 = vrot.slane %v671_v60, 2  ;;  %v699_v63 = vadd.f32 %v698_v61, %v697_v59 }
 0x12c   : > { %v673_v0 = vadd.f32 %v672_v62, %v671_v60  ;;  %v700_v1 = vrot.slane %v699_v63, 2 }
 0x12e   : > { %v674_v2 = vrot.slane %v673_v0, 1  ;;  %v701_v3 = vadd.f32 %v700_v1, %v699_v63 }
 0x130   : > { %v675_v5 = vadd.f32 %v674_v2, %v673_v0  ;;  %v702_v6 = vrot.slane %v701_v3, 1 }
 0x132   : > { %v676_v8 = vadd.f32 %v675_v5, %v660_v4  ;;  %v703_v9 = vadd.f32 %v702_v6, %v701_v3 }
 0x134   : > { %677 = vst [vmem:[#allocation3] sm:$0x1] %v676_v8  ;;  %v704_v10 = vadd.f32 %v703_v9, %v678_v7 }
 0x136   : > { %705 = vst [vmem:[#allocation4] sm:$0x1] %v704_v10 }
 0x137 PF: > { %p706_p6 = scmp.eq.s32.totalorder %s1181_s15, 1 }
 0x138   : > { %v718_v19 = vld [vmem:[%s1384_s2] sm:$0x1] (%p706_p6) }
 0x139   : > { %710 = sbr.rel (!%p706_p6) target bundleno = 347 (0x15b), region = 48  ;;  %v723_v22 = vld [vmem:[%s1385_s3] sm:$0x1] (%p706_p6) }
 0x13b   : > { %v711_v11 = vld [vmem:[#allocation3] sm:$0x1] (%p706_p6) }
 0x13c   : > { %v712_v13 = vmul.f32 (%p706_p6), 0.013888889, %v711_v11 }
 0x13d   : > { %v713_v12 = vld [vmem:[#allocation4] sm:$0x1] (%p706_p6) }
 0x13e   : > { %v714_v14 = vmul.f32 0.013888889, %v713_v12  ;;  %v715_v15 = vmul.f32 %v712_v13, %v712_v13 }
 0x140   : > { %v716_v16 = vsub.f32 %v714_v14, %v715_v15 }
 0x142   : > { %v717_v17 = vmax.f32 %v716_v16, 0.0 }
 0x144   : > { %v719_v18 = vadd.f32 1e-05, %v717_v17 }
 0x146   : > { %1165 = vrsqrt.f32 %v719_v18 }
 0x153   : > { %v1166_v20 = vpop.eup %1165 }
 0x154   : > { %v721_v21 = vmul.f32 %v1166_v20, %v718_v19 }
 0x156   : > { %722 = vst [vmem:[#allocation5] sm:$0x1] %v721_v21  ;;  %v724_v23 = vmul.f32 %v721_v21, %v712_v13 }
 0x158   : > { %v725_v24 = vsub.f32 %v723_v22, %v724_v23 }
 0x15a   : > { %726 = vst [vmem:[#allocation6] sm:$0x1] %v725_v24 }
 0x15b PF: > { %p965_p7 = scmp.ne.s32.totalorder %s1181_s15, 1 }
 0x15d   : > { %729 = sbr.rel (%p965_p7) target bundleno = 375 (0x177), region = 52 }
 0x162   : > { %v732_v25 = vld [vmem:[#allocation2 + $0x30] sm:$0xff]  ;;  %v733_v26 = vld [vmem:[#allocation2] sm:$0xff]  ;;  %v734_v31 = vld [vmem:[#allocation2 + $0x18] sm:$0xff] }
 0x163   : > { %v966_v27 = vld [vmem:[#allocation5] ss:$0 sm:$0xff]  ;;  %v967_v30 = vld [vmem:[#allocation6] ss:$0 sm:$0xff]  ;;  %v736_v35 = vld [vmem:[#allocation2 + $0x48] sm:$0xff] }
 0x164   : > { %v749_v28 = vmul.f32 %v966_v27, %v732_v25  ;;  %v750_v29 = vmul.f32 %v966_v27, %v733_v26  ;;  %v735_v32 = vld [vmem:[#allocation2 + $0x10] sm:$0xff]  ;;  %v751_v33 = vmul.f32 %v966_v27, %v734_v31  ;;  %v737_v36 = vld [vmem:[#allocation2 + $0x28] sm:$0xff]  ;;  %v753_v40 = vmul.f32 %v966_v27, %v736_v35  ;;  %v739_v42 = vld [vmem:[#allocation2 + $0x20] sm:$0xff] }
 0x165   : > { %v752_v34 = vmul.f32 %v966_v27, %v735_v32  ;;  %v738_v37 = vld [vmem:[#allocation2 + $0x8] sm:$0xff]  ;;  %v754_v41 = vmul.f32 %v966_v27, %v737_v36  ;;  %v756_v46 = vmul.f32 %v966_v27, %v739_v42  ;;  %v740_v55 = vld [vmem:[#allocation2 + $0x40] sm:$0xff]  ;;  %v741_v60 = vld [vmem:[#allocation2 + $0x38] sm:$0xff] }
 0x166   : > { %v766_v38 = vadd.f32 %v967_v30, %v749_v28  ;;  %v767_v39 = vadd.f32 %v967_v30, %v750_v29  ;;  %v768_v43 = vadd.f32 %v967_v30, %v751_v33  ;;  %v755_v45 = vmul.f32 %v966_v27, %v738_v37 }
 0x167   : > { %v769_v44 = vadd.f32 %v967_v30, %v752_v34  ;;  %v770_v49 = vadd.f32 %v967_v30, %v753_v40  ;;  %v771_v50 = vadd.f32 %v967_v30, %v754_v41  ;;  %v773_v54 = vadd.f32 %v967_v30, %v756_v46 }
 0x168   : > { %v776_v47 = vmul.f32 0.01, %v766_v38  ;;  %v777_v48 = vmul.f32 0.01, %v767_v39  ;;  %v778_v51 = vmul.f32 0.01, %v768_v43  ;;  %v772_v53 = vadd.f32 %v967_v30, %v755_v45 }
 0x169   : > { %v779_v52 = vmul.f32 0.01, %v769_v44  ;;  %v780_v58 = vmul.f32 0.01, %v770_v49  ;;  %v781_v59 = vmul.f32 0.01, %v771_v50  ;;  %v757_v4 = vmul.f32 %v966_v27, %v740_v55 }
 0x16a   : > { %v786_v56 = vmax.f32 %v766_v38, %v776_v47  ;;  %v787_v57 = vmax.f32 %v767_v39, %v777_v48  ;;  %v788_v61 = vmax.f32 %v768_v43, %v778_v51  ;;  %v782_v63 = vmul.f32 0.01, %v772_v53 }
 0x16b   : > { %v789_v62 = vmax.f32 %v769_v44, %v779_v52  ;;  %v783_v0 = vmul.f32 0.01, %v773_v54  ;;  %v790_v2 = vmax.f32 %v770_v49, %v780_v58  ;;  %v791_v3 = vmax.f32 %v771_v50, %v781_v59 }
 0x16c   : > { %v997_v1 = vpack.c.bf16 %v787_v57, %v786_v56  ;;  %v792_v6 = vmax.f32 %v772_v53, %v782_v63  ;;  %v758_v8 = vmul.f32 %v966_v27, %v741_v60  ;;  %v774_v10 = vadd.f32 %v967_v30, %v757_v4 }
 0x16d   : > { %v1002_v5 = vpack.c.bf16 %v789_v62, %v788_v61  ;;  %v793_v7 = vmax.f32 %v773_v54, %v783_v0  ;;  %v1007_v9 = vpack.c.bf16 %v791_v3, %v790_v2 }
 0x16e   : > { %998 = vst [vmem:[%s1386_s4] sm:$0xff] %v997_v1   ;;  %v775_v12 = vadd.f32 %v967_v30, %v758_v8  ;;  %v784_v13 = vmul.f32 0.01, %v774_v10 }
 0x16f   : > { %1019 = vst [vmem:[%s1386_s4 + $0x8] sm:$0xff] %v1002_v5   ;;  %v1012_v11 = vpack.c.bf16 %v793_v7, %v792_v6  ;;  %1020 = vst [vmem:[%s1386_s4 + $0x10] sm:$0xff] %v1007_v9  }
 0x170   : > { %v785_v14 = vmul.f32 0.01, %v775_v12  ;;  %v794_v15 = vmax.f32 %v774_v10, %v784_v13 }
 0x171   : > { %1021 = vst [vmem:[%s1386_s4 + $0x18] sm:$0xff] %v1012_v11  }
 0x172   : > { %v795_v16 = vmax.f32 %v775_v12, %v785_v14 }
 0x174   : > { %v1017_v17 = vpack.c.bf16 %v795_v16, %v794_v15 }
 0x176   : > { %1022 = vst [vmem:[%s1386_s4 + $0x20] sm:$0xff] %v1017_v17  }
 0x177 PF: > { %s14_s17 = sadd.s32 1, %s1189_s17   ;;  %s1387_s15 = smov %s1185_s16 }
 0x178   : > { %p11_p8 = scmp.ge.s32.totalorder %s14_s17, 4   ;;  %s1388_s16 = smov %s1390_s18 }
 0x17a   :  { %13 = sbr.rel (!%p11_p8) target bundleno = 2 (0x2), region = 84 }

// kernel: reducedim2_forward.11
= control target key start
LH: loop header
LB: loop body
LE: loop exit
PB: predicated region body
PF: predicated region fallthrough
CT: control target
= control target key end

     0   :  { %s887_s15 = smov 0   ;;  %s889_s16 = smov 0   ;;  %s1010_s0 = inlined_call_operand.vmem [shape: bf16[32,288], index: 0, kind: input, shape index: {}]   ;;  %s1011_s1 = inlined_call_operand.vmem [shape: bf16[288,128], index: 1, kind: input, shape index: {}]   ;;  %s1012_s2 = inlined_call_operand.vmem [shape: f32[1,128], index: 2, kind: input, shape index: {}]   ;;  %s1013_s3 = inlined_call_operand.vmem [shape: f32[1,128], index: 3, kind: input, shape index: {}]   ;;  %s1014_s4 = inlined_call_operand.vmem [shape: f32[32,128], index: 4, kind: output, shape index: {}]  }
   0x1   :  { %s891_s17 = smov 0  }
   0x2 LB: > { %s26_s18 = sadd.s32 1, %s855_s16  ;;  %p705_p0 = scmp.ge.s32.totalorder %s859_s17, 1  ;;  %s859_s17 = sphi %s891_s17, %s14_s17   ;;  %s855_s16 = sphi %s889_s16, %s1016_s16   ;;  %s851_s15 = sphi %s887_s15, %s1015_s15  }
   0x3   : > { %p28_p1 = scmp.ge.s32.totalorder %s26_s18, 2  ;;  %p186_p2 = scmp.lt.s32.totalorder %s859_s17, 3 }
   0x5   : > { %s1018_s18 = smov (%p28_p1, %s26_s18), 0  ;;  %p187_p3 = pnand %p705_p0, %p186_p2 }
   0x6   : > { %p236_p4 = scmp.eq.s32.totalorder (!%p187_p3), %s851_s15, 0 }
   0x7   : > { %190 = sbr.rel (%p187_p3) target bundleno = 340 (0x154), region = 36 }
   0xc   : > { %241 = sbr.rel (!%p236_p4) target bundleno = 17 (0x11), region = 40  ;;  %v861_v0 = vmov (%p236_p4), 0.0  }
   0xd   : > { %242 = vst [vmem:[#allocation3] sm:$0x1] (%p236_p4), %v861_v0  ;;  %243 = vst [vmem:[#allocation4] sm:$0x1] (%p236_p4), %v861_v0 }
  0x11 PF: > { %p707_p5 = scmp.ne.s32.totalorder %s851_s15, 0 }
  0x13   : > { %246 = sbr.rel (%p707_p5) target bundleno = 287 (0x11f), region = 44 }
  0x18   : > { %v809_v1 = vld [vmem:[%s1011_s1 + $0x78] sm:$0xff]   ;;  %v811_v3 = vld [vmem:[%s1011_s1 + $0x70] sm:$0xff]   ;;  %v813_v5 = vld [vmem:[%s1011_s1 + $0x68] sm:$0xff]   ;;  %vm429_vm0 = vcmask 261120  }
  0x19   : > { %v810_v2 = vld [vmem:[%s1011_s1 + $0x38] sm:$0xff]   ;;  %744 = vmatprep.subr.bf16.mxu0 %v809_v1  ;;  %v812_v4 = vld [vmem:[%s1011_s1 + $0x30] sm:$0xff]   ;;  %v814_v6 = vld [vmem:[%s1011_s1 + $0x28] sm:$0xff]  }
  0x1a   : > { %745 = vmatpush3.bf16.msra.mxu0 %v810_v2  ;;  %v815_v7 = vld [vmem:[%s1011_s1 + $0x60] sm:$0xff]   ;;  %v817_v9 = vld [vmem:[%s1011_s1 + $0x58] sm:$0xff]   ;;  %v822_v10 = vld [vmem:[%s1011_s1 + $0x88] sm:$0xff]  }
  0x1b   : > { %746 = vmatprep.subr.bf16.mxu0 %v811_v3  ;;  %v816_v8 = vld [vmem:[%s1011_s1 + $0x20] sm:$0xff]   ;;  %v818_v11 = vld [vmem:[%s1011_s1 + $0x18] sm:$0xff]   ;;  %v819_v12 = vld [vmem:[%s1011_s1 + $0x50] sm:$0xff]   ;;  %776 = vmatprep.subr.bf16.mxu1 %v822_v10 }
  0x1c   : > { %777 = vmatpush3.bf16.msra.mxu1 %v822_v10  ;;  %v825_v13 = vld [vmem:[%s1011_s1 + $0x80] sm:$0xff]   ;;  %v820_v14 = vld [vmem:[%s1011_s1 + $0x10] sm:$0xff]   ;;  %v821_v15 = vld [vmem:[%s1011_s1 + $0x48] sm:$0xff]  }
  0x1d   : > { %778 = vmatprep.subr.bf16.mxu1 %v825_v13  ;;  %v829_v16 = vld [vmem:[%s1010_s0 + $0x4] ss:$12 sps:$4 sm:$0xff]   ;;  %v830_v17 = vld [vmem:[%s1010_s0 + $0x8] ss:$12 sps:$4 sm:$0xff]   ;;  %v831_v18 = vld [vmem:[%s1010_s0 + $0x20] ss:$12 sps:$4 sm:$0xff]  }
  0x1e   : > { %747 = vmatpush3.bf16.msra.mxu0 %v812_v4  ;;  %468 = vmatprep.mubr.bf16.mxu0 %v829_v16  ;;  %v823_v19 = vld [vmem:[%s1011_s1 + $0x8] sm:$0xff]   ;;  %v824_v20 = vld [vmem:[%s1011_s1 + $0x40] sm:$0xff]  }
  0x1f   : > { %748 = vmatprep.subr.bf16.mxu0 %v813_v5  ;;  %780 = vmatprep.mubr.msk.bf16.mxu1 %vm429_vm0, %v830_v17  ;;  %v826_v21 = vld [vmem:[%s1011_s1] sm:$0xff]   ;;  %v832_v23 = vld [vmem:[%s1010_s0 + $0x1c] ss:$12 sps:$4 sm:$0xff]  }
  0x20   : > { %779 = vmatpush3.bf16.msra.mxu1 %v825_v13  ;;  %v827_v22 = vld [vmem:[%s1010_s0] ss:$12 sps:$4 sm:$0xff]   ;;  %v834_v24 = vld [vmem:[%s1010_s0 + $0x18] ss:$12 sps:$4 sm:$0xff]  }
  0x21   : > { %v540_v0 = vld [vmem:[#allocation3] sm:$0x1]  ;;  %v552_v3 = vld [vmem:[#allocation4] sm:$0x1] }
  0x22   : > { %749 = vmatpush3.bf16.msra.mxu0 %v814_v6 }
  0x23   : > { %750 = vmatprep.subr.bf16.mxu0 %v815_v7  ;;  %781 = vmatmul.mubr.msk.bf16.vlgmr.msra.gmra.mxu1 %vm429_vm0, %v831_v18 }
  0x26   : > { %751 = vmatpush3.bf16.msra.mxu0 %v816_v8 }
  0x27   : > { %752 = vmatprep.subr.bf16.mxu0 %v817_v9 }
  0x2a   : > { %753 = vmatpush3.bf16.msra.mxu0 %v818_v11 }
  0x2b   : > { %754 = vmatprep.subr.bf16.mxu0 %v819_v12 }
  0x2e   : > { %755 = vmatpush3.bf16.msra.mxu0 %v820_v14 }
  0x2f   : > { %756 = vmatprep.subr.bf16.mxu0 %v821_v15 }
  0x32   : > { %757 = vmatpush3.bf16.msra.mxu0 %v823_v19 }
  0x33   : > { %758 = vmatprep.subr.bf16.mxu0 %v824_v20 }
  0x36   : > { %759 = vmatpush3.bf16.msra.mxu0 %v826_v21 }
  0x39   : > { %469 = vmatmul.mubr.bf16.vlgmr.msra.gmra.mxu0 %v827_v22 }
  0x3a   : > { %476 = vmatprep.mubr.bf16.mxu0 %v832_v23 }
  0x41   : > { %477 = vmatmul.mubr.bf16.gmra.mxu0 %v834_v24 }
  0xe3   : > { %v782_v25 = vpop.f32.mrf.mxu1 }
  0xe5   : > { %v519_v27 = vpop.f32.mrf.mxu1 }
  0xe7   : > { %v783_v31 = vpop.f32.mrf.mxu1 }
  0xe9   : > { %v522_v35 = vpop.f32.mrf.mxu1 }
  0xf9   : > { %v760_v26 = vpop.f32.mrf.mxu0 }
  0xfb   : > { %v761_v28 = vpop.f32.mrf.mxu0 }
  0xfc   : > { %v762_v29 = vadd.f32 %v761_v28, %v760_v26 }
  0xfd   : > { %v763_v30 = vpop.f32.mrf.mxu0 }
  0xfe   : > { %v520_v32 = vadd.f32 %v762_v29, %v519_v27 }
  0xff   : > { %v764_v33 = vpop.f32.mrf.mxu0 }
 0x100   : > { %536 = vst [vmem:[#allocation2 + $0x10] sm:$0xff] %v520_v32  ;;  %v765_v34 = vadd.f32 %v764_v33, %v763_v30  ;;  %v553_v44 = vmul.f32 %v520_v32, %v520_v32 }
 0x101   : > { %v766_v36 = vpop.f32.mrf.mxu0 }
 0x102   : > { %v523_v37 = vadd.f32 %v765_v34, %v522_v35 }
 0x103   : > { %v767_v38 = vpop.f32.mrf.mxu0 }
 0x104   : > { %537 = vst [vmem:[#allocation2] sm:$0xff] %v523_v37  ;;  %v768_v39 = vadd.f32 %v767_v38, %v766_v36  ;;  %v554_v41 = vmul.f32 %v523_v37, %v523_v37  ;;  %v541_v45 = vadd.f32 %v523_v37, %v520_v32 }
 0x105   : > { %v769_v40 = vpop.f32.mrf.mxu0 }
 0x106   : > { %v528_v42 = vadd.f32 %v782_v25, %v768_v39  ;;  %v557_v48 = vadd.f32 %v554_v41, %v553_v44 }
 0x107   : > { %v770_v43 = vpop.f32.mrf.mxu0 }
 0x108   : > { %538 = vst [vmem:[#allocation2 + $0x18] sm:$0xff] %v528_v42  ;;  %v555_v46 = vmul.f32 %v528_v42, %v528_v42  ;;  %v771_v47 = vadd.f32 %v770_v43, %v769_v40  ;;  %v542_v49 = vadd.f32 %v541_v45, %v528_v42 }
 0x10a   : > { %v531_v50 = vadd.f32 %v783_v31, %v771_v47  ;;  %v558_v51 = vadd.f32 %v557_v48, %v555_v46 }
 0x10c   : > { %539 = vst [vmem:[#allocation2 + $0x8] sm:$0xff] %v531_v50  ;;  %v543_v52 = vadd.f32 %v542_v49, %v531_v50  ;;  %v556_v53 = vmul.f32 %v531_v50, %v531_v50 }
 0x10e   : > { %v544_v54 = vrot.slane %v543_v52, 4  ;;  %v559_v55 = vadd.f32 %v558_v51, %v556_v53 }
 0x110   : > { %v545_v56 = vadd.f32 %v544_v54, %v543_v52  ;;  %v560_v57 = vrot.slane %v559_v55, 4 }
 0x112   : > { %v546_v58 = vrot.slane %v545_v56, 2  ;;  %v561_v59 = vadd.f32 %v560_v57, %v559_v55 }
 0x114   : > { %v547_v60 = vadd.f32 %v546_v58, %v545_v56  ;;  %v562_v61 = vrot.slane %v561_v59, 2 }
 0x116   : > { %v548_v62 = vrot.slane %v547_v60, 1  ;;  %v563_v63 = vadd.f32 %v562_v61, %v561_v59 }
 0x118   : > { %v549_v1 = vadd.f32 %v548_v62, %v547_v60  ;;  %v564_v2 = vrot.slane %v563_v63, 1 }
 0x11a   : > { %v550_v4 = vadd.f32 %v549_v1, %v540_v0  ;;  %v565_v5 = vadd.f32 %v564_v2, %v563_v63 }
 0x11c   : > { %551 = vst [vmem:[#allocation3] sm:$0x1] %v550_v4  ;;  %v566_v6 = vadd.f32 %v565_v5, %v552_v3 }
 0x11e   : > { %567 = vst [vmem:[#allocation4] sm:$0x1] %v566_v6 }
 0x11f PF: > { %p568_p6 = scmp.eq.s32.totalorder %s851_s15, 1 }
 0x120   : > { %v580_v15 = vld [vmem:[%s1012_s2] sm:$0x1] (%p568_p6) }
 0x121   : > { %572 = sbr.rel (!%p568_p6) target bundleno = 323 (0x143), region = 48  ;;  %v585_v18 = vld [vmem:[%s1013_s3] sm:$0x1] (%p568_p6) }
 0x123   : > { %v573_v7 = vld [vmem:[#allocation3] sm:$0x1] (%p568_p6) }
 0x124   : > { %v574_v9 = vmul.f32 (%p568_p6), 0.055555556, %v573_v7 }
 0x125   : > { %v575_v8 = vld [vmem:[#allocation4] sm:$0x1] (%p568_p6) }
 0x126   : > { %v576_v10 = vmul.f32 0.055555556, %v575_v8  ;;  %v577_v11 = vmul.f32 %v574_v9, %v574_v9 }
 0x128   : > { %v578_v12 = vsub.f32 %v576_v10, %v577_v11 }
 0x12a   : > { %v579_v13 = vmax.f32 %v578_v12, 0.0 }
 0x12c   : > { %v581_v14 = vadd.f32 1e-05, %v579_v13 }
 0x12e   : > { %835 = vrsqrt.f32 %v581_v14 }
 0x13b   : > { %v836_v16 = vpop.eup %835 }
 0x13c   : > { %v583_v17 = vmul.f32 %v836_v16, %v580_v15 }
 0x13e   : > { %584 = vst [vmem:[#allocation5] sm:$0x1] %v583_v17  ;;  %v586_v19 = vmul.f32 %v583_v17, %v574_v9 }
 0x140   : > { %v587_v20 = vsub.f32 %v585_v18, %v586_v19 }
 0x142   : > { %588 = vst [vmem:[#allocation6] sm:$0x1] %v587_v20 }
 0x143 PF: > { %p735_p7 = scmp.ne.s32.totalorder %s851_s15, 1 }
 0x145   : > { %591 = sbr.rel (%p735_p7) target bundleno = 340 (0x154), region = 52 }
 0x14a   : > { %v594_v21 = vld [vmem:[#allocation2 + $0x10] sm:$0xff]  ;;  %v736_v22 = vld [vmem:[#allocation5] ss:$0 sm:$0xff]  ;;  %v737_v23 = vld [vmem:[#allocation6] ss:$0 sm:$0xff] }
 0x14b   : > { %v605_v24 = vmul.f32 %v736_v22, %v594_v21  ;;  %v595_v25 = vld [vmem:[#allocation2] sm:$0xff]  ;;  %v596_v26 = vld [vmem:[#allocation2 + $0x18] sm:$0xff]  ;;  %v597_v27 = vld [vmem:[#allocation2 + $0x8] sm:$0xff] }
 0x14c   : > { %v606_v28 = vmul.f32 %v736_v22, %v595_v25  ;;  %v607_v29 = vmul.f32 %v736_v22, %v596_v26  ;;  %v608_v30 = vmul.f32 %v736_v22, %v597_v27 }
 0x14d   : > { %v616_v31 = vadd.f32 %v737_v23, %v605_v24 }
 0x14e   : > { %v617_v32 = vadd.f32 %v737_v23, %v606_v28  ;;  %v618_v33 = vadd.f32 %v737_v23, %v607_v29  ;;  %v619_v34 = vadd.f32 %v737_v23, %v608_v30 }
 0x14f   : > { %v620_v35 = vmax.f32 %v616_v31, 0.0 }
 0x150   : > { %v621_v36 = vmax.f32 %v617_v32, 0.0  ;;  %v622_v37 = vmax.f32 %v618_v33, 0.0  ;;  %v623_v38 = vmax.f32 %v619_v34, 0.0 }
 0x151   : > { %624 = vst [vmem:[%s1014_s4] sm:$0xff] %v620_v35 }
 0x152   : > { %625 = vst [vmem:[%s1014_s4 + $0x8] sm:$0xff] %v621_v36  ;;  %626 = vst [vmem:[%s1014_s4 + $0x10] sm:$0xff] %v622_v37 }
 0x153   : > { %627 = vst [vmem:[%s1014_s4 + $0x18] sm:$0xff] %v623_v38 }
 0x154 PF: > { %s14_s17 = sadd.s32 1, %s859_s17   ;;  %s1015_s15 = smov %s855_s16 }
 0x155   : > { %p11_p8 = scmp.ge.s32.totalorder %s14_s17, 4   ;;  %s1016_s16 = smov %s1018_s18 }
 0x157   :  { %13 = sbr.rel (!%p11_p8) target bundleno = 2 (0x2), region = 84 }

</bundles_post_ra>
